<compile_context>
chip_gen: v5e
topology: v5e:2x2
jax: 0.10.0
libtpu: 0.0.40
codegen_flags: <defaults>
</compile_context>

<pallas_src>
import functools
import math

import jax
import jax.numpy as jnp
from jax.experimental import pallas as pl
from jax.experimental.pallas import tpu as pltpu

IMG_CHANNEL = 1
BN_EPS = 1e-5
LANE = 128      # TPU vreg lane width
KPAD = 16       # bf16 sublane packing granularity


def _round_up(x, m):
    return ((x + m - 1) // m) * m


def _cdiv(a, b):
    return -(-a // b)


# ----------------------------------------------------------------------------
# Pallas kernel: fused matmul (BN scale folded into W) + bias + optional ReLU
# ----------------------------------------------------------------------------
def _mm_bias_relu_kernel(a_ref, w_ref, b_ref, o_ref, *, relu):
    acc = jnp.dot(a_ref[...], w_ref[...], preferred_element_type=jnp.float32)
    out = acc + b_ref[...]                        # f32 epilogue (v5e-safe)
    if relu:
        out = jnp.maximum(out, 0.0)
    o_ref[...] = out.astype(o_ref.dtype)


def fused_matmul(a, w, scale, bias, relu):
    """a: (M, K) bf16/f32, w: (K, N) f32, scale/bias: (N,) -> (M, N) float32."""
    m, k = a.shape
    k2, n = w.shape
    assert k == k2

    # Fold the per-output-channel BN scale into the weights (f32, trace time).
    w = w * scale.reshape(1, n)

    # Pad K so the bf16 weight tile is sublane-aligned (stem_1 has K = 9).
    kp = _round_up(k, KPAD)
    if kp != k:
        a = jnp.pad(a, ((0, 0), (0, kp - k)))
        w = jnp.pad(w, ((0, kp - k), (0, 0)))

    # Pad N to a full lane width: dense stores, no wasted MXU result columns.
    npad = _round_up(n, LANE)
    if npad != n:
        w = jnp.pad(w, ((0, 0), (0, npad - n)))
        bias = jnp.pad(bias, (0, npad - n))

    # M tiling: big tiles (<=512), at least 2 grid steps (v7x has 2 TCs).
    g = max(2, _cdiv(m, 512))
    tm = _round_up(_cdiv(m, g), KPAD)
    mp = tm * g
    if mp != m:
        a = jnp.pad(a, ((0, mp - m), (0, 0)))

    a_bf = a.astype(jnp.bfloat16)
    w_bf = w.astype(jnp.bfloat16)
    bias2 = bias.reshape(1, npad).astype(jnp.float32)

    out = pl.pallas_call(
        functools.partial(_mm_bias_relu_kernel, relu=relu),
        out_shape=jax.ShapeDtypeStruct((mp, npad), jnp.float32),
        grid=(g,),
        in_specs=[
            pl.BlockSpec((tm, kp), lambda i: (i, 0)),    # bf16 patch tile
            pl.BlockSpec((kp, npad), lambda i: (0, 0)),  # bf16 weight, resident
            pl.BlockSpec((1, npad), lambda i: (0, 0)),   # folded bn bias (f32)
        ],
        out_specs=pl.BlockSpec((tm, npad), lambda i: (i, 0)),
        compiler_params=pltpu.CompilerParams(dimension_semantics=("parallel",)),
    )(a_bf, w_bf, bias2)
    return out[:m, :n]


# ----------------------------------------------------------------------------
# Plain-JAX glue: im2col, pooling, parameter init
# ----------------------------------------------------------------------------
def im2col(x, k, stride, pad):
    """x: (N, H, W, C) -> patches (N*Ho*Wo, k*k*C), plus (N, Ho, Wo)."""
    n, h, w, c = x.shape
    if pad > 0:
        x = jnp.pad(x, ((0, 0), (pad, pad), (pad, pad), (0, 0)))
    ho = (h + 2 * pad - k) // stride + 1
    wo = (w + 2 * pad - k) // stride + 1
    if k == 1 and stride == 1:
        return x.reshape(n * ho * wo, c), (n, ho, wo)
    cols = []
    for dy in range(k):
        for dx in range(k):
            cols.append(x[:, dy:dy + stride * ho:stride, dx:dx + stride * wo:stride, :])
    a = jnp.concatenate(cols, axis=-1)            # index = (dy*k+dx)*C + c
    return a.reshape(n * ho * wo, k * k * c), (n, ho, wo)


def conv_bn_relu(x, p, stride, pad, relu=True):
    """x: NHWC float32.  p['w'] in PyTorch layout (Cout, Cin, kh, kw)."""
    w = p["w"]
    cout, cin, kh, kw = w.shape
    # Emit the kxk-expanded patch matrix in bf16 -> halves its HBM traffic.
    a, (n, ho, wo) = im2col(x.astype(jnp.bfloat16), kh, stride, pad)
    wm = jnp.transpose(w, (2, 3, 1, 0)).reshape(kh * kw * cin, cout)
    out = fused_matmul(a, wm, p["scale"], p["bias"], relu)
    return out.reshape(n, ho, wo, cout)


def maxpool2(x):  # kernel 2, stride 2 (floor, like nn.MaxPool2d)
    n, h, w, c = x.shape
    h2, w2 = h // 2, w // 2
    x = x[:, :h2 * 2, :w2 * 2, :]
    return x.reshape(n, h2, 2, w2, 2, c).max(axis=(2, 4))


def avgpool2(x):  # kernel 2, stride 2
    n, h, w, c = x.shape
    h2, w2 = h // 2, w // 2
    x = x[:, :h2 * 2, :w2 * 2, :]
    return x.reshape(n, h2, 2, w2, 2, c).mean(axis=(2, 4))


def avgpool_k(x, k):  # F.avg_pool2d(x, kernel_size=k), stride=k, no pad
    n, h, w, c = x.shape
    ho, wo = h // k, w // k
    x = x[:, :ho * k, :wo * k, :]
    return x.reshape(n, ho, k, wo, k, c).mean(axis=(2, 4))


def conv_params(key, inp, oup, k):
    # PyTorch init: normal(0, sqrt(2 / (k*k*out_channels))); BN folded (eval).
    std = math.sqrt(2.0 / (k * k * oup))
    w = std * jax.random.normal(key, (oup, inp, k, k), jnp.float32)
    scale = jnp.full((oup,), 1.0 / math.sqrt(1.0 + BN_EPS), jnp.float32)
    bias = jnp.zeros((oup,), jnp.float32)
    return {"w": w, "scale": scale, "bias": bias}


def dense_block_params(keys, di, ic, hg):
    """Create the 5 convs of a DenseBlock and pre-fuse the sibling branches."""
    cb1_a = conv_params(next(keys), di, ic, 1)
    cb1_b = conv_params(next(keys), ic, hg, 3)
    cb2_a = conv_params(next(keys), di, ic, 1)
    cb2_b = conv_params(next(keys), ic, hg, 3)
    cb2_c = conv_params(next(keys), hg, hg, 3)

    # cb1_a || cb2_a share the same input: concat weights along out-channels.
    a_fused = {
        "w": jnp.concatenate([cb1_a["w"], cb2_a["w"]], axis=0),
        "scale": jnp.concatenate([cb1_a["scale"], cb2_a["scale"]]),
        "bias": jnp.concatenate([cb1_a["bias"], cb2_a["bias"]]),
    }
    # cb1_b || cb2_b: block-diagonal weight over the concatenated 2*ic input
    # channels (branch 1 reads ch[:ic], branch 2 reads ch[ic:]).
    wb = jnp.zeros((2 * hg, 2 * ic, 3, 3), jnp.float32)
    wb = wb.at[:hg, :ic].set(cb1_b["w"])
    wb = wb.at[hg:, ic:].set(cb2_b["w"])
    b_fused = {
        "w": wb,
        "scale": jnp.concatenate([cb1_b["scale"], cb2_b["scale"]]),
        "bias": jnp.concatenate([cb1_b["bias"], cb2_b["bias"]]),
    }
    return {"a": a_fused, "b": b_fused, "c": cb2_c}


# ----------------------------------------------------------------------------
# PeleeNet construction / forward (mirrors the PyTorch module)
# ----------------------------------------------------------------------------
def init_peleenet(key, num_classes, num_init_features, growth_rate,
                  n_dense_blocks, bottleneck_width):
    keys = iter(jax.random.split(key, 1024))
    half_growth = growth_rate // 2

    params = {}
    nif = num_init_features
    params["stem"] = {
        "stem_1": conv_params(next(keys), IMG_CHANNEL, nif, 3),
        "stem_2a": conv_params(next(keys), nif, nif // 2, 1),
        "stem_2b": conv_params(next(keys), nif // 2, nif, 3),
        "stem_3": conv_params(next(keys), nif * 2, nif, 1),
    }

    inter_channel, total_filter, dense_inp = [], [], []
    stages = []
    for i, b_w in enumerate(bottleneck_width):
        inter_channel.append(int(half_growth * b_w / 4) * 4)
        if i == 0:
            total_filter.append(num_init_features + growth_rate * n_dense_blocks[i])
            dense_inp.append(num_init_features)
        else:
            total_filter.append(total_filter[i - 1] + growth_rate * n_dense_blocks[i])
            dense_inp.append(total_filter[i - 1])

        di = dense_inp[i]
        blocks = []
        for _ in range(n_dense_blocks[i]):
            blocks.append(dense_block_params(keys, di, inter_channel[i], half_growth))
            di += half_growth * 2
        trans = conv_params(next(keys), di, total_filter[i], 1)
        stages.append({"dense": blocks, "trans": trans})
    params["stages"] = stages

    fc_in = total_filter[-1]
    params["fc_w"] = 0.01 * jax.random.normal(next(keys), (num_classes, fc_in), jnp.float32)
    params["fc_b"] = jnp.zeros((num_classes,), jnp.float32)
    return params


def stem_forward(x, p):
    s1 = conv_bn_relu(x, p["stem_1"], stride=2, pad=1)
    s2a = conv_bn_relu(s1, p["stem_2a"], stride=1, pad=0)
    s2b = conv_bn_relu(s2a, p["stem_2b"], stride=2, pad=1)
    s2p = maxpool2(s1)
    cat = jnp.concatenate([s2b, s2p], axis=-1)
    return conv_bn_relu(cat, p["stem_3"], stride=1, pad=0)


def dense_forward(x, p):
    hg = p["c"]["w"].shape[0]                    # half growth rate (static)
    ab = conv_bn_relu(x, p["a"], 1, 0)           # (..., 2*ic): [cb1_a | cb2_a]
    bb = conv_bn_relu(ab, p["b"], 1, 1)          # (..., 2*hg): [cb1_b | cb2_b]
    c1b = bb[..., :hg]
    c2c = conv_bn_relu(bb[..., hg:], p["c"], 1, 1)
    return jnp.concatenate([x, c1b, c2c], axis=-1)


def peleenet_forward(x_nchw, params):
    # NCHW (PyTorch convention) -> NHWC for the kernels.
    x = jnp.transpose(x_nchw, (0, 2, 3, 1)).astype(jnp.float32)
    x = stem_forward(x, params["stem"])
    n_stages = len(params["stages"])
    for si, stage in enumerate(params["stages"]):
        for blk in stage["dense"]:
            x = dense_forward(x, blk)
        x = conv_bn_relu(x, stage["trans"], 1, 0)
        if si != n_stages - 1:                   # TransitionBlock pooling
            x = avgpool2(x)
    x = avgpool_k(x, 3)                          # F.avg_pool2d(x, kernel_size=3)
    # x.view(N, -1) in NCHW order:
    x = jnp.transpose(x, (0, 3, 1, 2)).reshape(x.shape[0], -1)
    # Final Linear: M=2 -> plain jnp.dot (a pallas_call is pure launch
    # overhead at this size; per perf review).
    return x @ params["fc_w"].T + params["fc_b"]


# TODO(synk): MaskedConv2d's learned/pruned mask is not part of the spec; it is
# all-ones at init, so it is treated as a plain bias-free Conv2d here.

if __name__ == "__main__":
    key = jax.random.PRNGKey(0)
    k_param, k_input = jax.random.split(key)

    # Small-but-consistent config: spatial 96 so that the final
    # F.avg_pool2d(kernel_size=3) yields 1x1 and the flatten matches the
    # classifier's in_features (exactly as the PyTorch module assumes).
    num_classes = 16
    num_init_features = 16
    growth_rate = 16
    n_dense_blocks = [1, 1, 1, 1]
    bottleneck_width = [1, 2, 4, 4]

    params = init_peleenet(k_param, num_classes, num_init_features,
                           growth_rate, n_dense_blocks, bottleneck_width)

    x = jax.random.normal(k_input, (2, IMG_CHANNEL, 96, 96), jnp.float32)  # NCHW

    forward = jax.jit(peleenet_forward)
    out = jax.block_until_ready(forward(x, params))

    assert out.shape == (2, num_classes), out.shape
    assert bool(jnp.all(jnp.isfinite(out)))
    print("KERNEL_OK")
</pallas_src>

<mosaic_0001>
module attributes {stable_mosaic.version = 11 : i64} {
  func.func @_mm_bias_relu_kernel(%arg0: i32, %arg1: memref<512x16xbf16, #tpu.memory_space<vmem>>, %arg2: memref<16x128xbf16, #tpu.memory_space<vmem>>, %arg3: memref<1x128xf32, #tpu.memory_space<vmem>>, %arg4: memref<512x128xf32, #tpu.memory_space<vmem>>) attributes {dimension_semantics = [#tpu.dimension_semantics<parallel>], iteration_bounds = array<i64: 9>, scalar_prefetch = 0 : i64, scratch_operands = 0 : i64, tpu.core_type = #tpu.core_type<tc>, window_params = [{transform_indices = @transform_0, window_bounds = array<i64: 512, 16>}, {pipeline_mode = #tpu.pipeline_mode<synchronous>, transform_indices = @transform_1, window_bounds = array<i64: 16, 128>}, {pipeline_mode = #tpu.pipeline_mode<synchronous>, transform_indices = @transform_2, window_bounds = array<i64: 1, 128>}, {transform_indices = @transform_3, window_bounds = array<i64: 512, 128>}]} {
    %c0 = arith.constant 0 : index
    %c0_0 = arith.constant 0 : index
    %0 = vector.load %arg1[%c0, %c0_0] : memref<512x16xbf16, #tpu.memory_space<vmem>>, vector<512x16xbf16>
    %c0_1 = arith.constant 0 : index
    %c0_2 = arith.constant 0 : index
    %1 = vector.load %arg2[%c0_1, %c0_2] : memref<16x128xbf16, #tpu.memory_space<vmem>>, vector<16x128xbf16>
    %cst = arith.constant dense<0.000000e+00> : vector<512x128xf32>
    %2 = tpu.matmul %0, %1, %cst {dimension_numbers = #tpu.dot_dimension_numbers<[1], [0], [0], [1], [0, 0, 1, 1], [], []>} : vector<512x16xbf16>, vector<16x128xbf16>, vector<512x128xf32> -> vector<512x128xf32>
    %c0_3 = arith.constant 0 : index
    %c0_4 = arith.constant 0 : index
    %3 = vector.load %arg3[%c0_3, %c0_4] : memref<1x128xf32, #tpu.memory_space<vmem>>, vector<1x128xf32>
    %4 = vector.broadcast %3 : vector<1x128xf32> to vector<512x128xf32>
    %5 = arith.addf %2, %4 : vector<512x128xf32>
    %cst_5 = arith.constant 0.000000e+00 : f32
    %6 = vector.broadcast %cst_5 : f32 to vector<512x128xf32>
    %7 = arith.maximumf %5, %6 : vector<512x128xf32>
    %c0_6 = arith.constant 0 : index
    %c0_7 = arith.constant 0 : index
    %8 = vector.load %arg4[%c0_6, %c0_7] : memref<512x128xf32, #tpu.memory_space<vmem>>, vector<512x128xf32>
    tpu.vector_store %arg4[%c0_6, %c0_7], %7 {strides = array<i32>} : memref<512x128xf32, #tpu.memory_space<vmem>>, vector<512x128xf32>,
    return
  }
  func.func @transform_0(%arg0: i32) -> (i32, i32) {
    %c0_i32 = arith.constant 0 : i32
    %c0_i32_0 = arith.constant 0 : i32
    return %arg0, %c0_i32 : i32, i32
  }
  func.func @transform_1(%arg0: i32) -> (i32, i32) {
    %c0_i32 = arith.constant 0 : i32
    %c0_i32_0 = arith.constant 0 : i32
    %c0_i32_1 = arith.constant 0 : i32
    return %c0_i32, %c0_i32_0 : i32, i32
  }
  func.func @transform_2(%arg0: i32) -> (i32, i32) {
    %c0_i32 = arith.constant 0 : i32
    %c0_i32_0 = arith.constant 0 : i32
    %c0_i32_1 = arith.constant 0 : i32
    return %c0_i32, %c0_i32_0 : i32, i32
  }
  func.func @transform_3(%arg0: i32) -> (i32, i32) {
    %c0_i32 = arith.constant 0 : i32
    %c0_i32_0 = arith.constant 0 : i32
    return %arg0, %c0_i32 : i32, i32
  }
}

module attributes {stable_mosaic.version = 11 : i64} {
  func.func @_mm_bias_relu_kernel(%arg0: i32, %arg1: memref<384x80xbf16, #tpu.memory_space<vmem>>, %arg2: memref<80x128xbf16, #tpu.memory_space<vmem>>, %arg3: memref<1x128xf32, #tpu.memory_space<vmem>>, %arg4: memref<384x128xf32, #tpu.memory_space<vmem>>) attributes {dimension_semantics = [#tpu.dimension_semantics<parallel>], iteration_bounds = array<i64: 3>, scalar_prefetch = 0 : i64, scratch_operands = 0 : i64, tpu.core_type = #tpu.core_type<tc>, window_params = [{transform_indices = @transform_0, window_bounds = array<i64: 384, 80>}, {pipeline_mode = #tpu.pipeline_mode<synchronous>, transform_indices = @transform_1, window_bounds = array<i64: 80, 128>}, {pipeline_mode = #tpu.pipeline_mode<synchronous>, transform_indices = @transform_2, window_bounds = array<i64: 1, 128>}, {transform_indices = @transform_3, window_bounds = array<i64: 384, 128>}]} {
    %c0 = arith.constant 0 : index
    %c0_0 = arith.constant 0 : index
    %0 = vector.load %arg1[%c0, %c0_0] : memref<384x80xbf16, #tpu.memory_space<vmem>>, vector<384x80xbf16>
    %c0_1 = arith.constant 0 : index
    %c0_2 = arith.constant 0 : index
    %1 = vector.load %arg2[%c0_1, %c0_2] : memref<80x128xbf16, #tpu.memory_space<vmem>>, vector<80x128xbf16>
    %cst = arith.constant dense<0.000000e+00> : vector<384x128xf32>
    %2 = tpu.matmul %0, %1, %cst {dimension_numbers = #tpu.dot_dimension_numbers<[1], [0], [0], [1], [0, 0, 1, 1], [], []>} : vector<384x80xbf16>, vector<80x128xbf16>, vector<384x128xf32> -> vector<384x128xf32>
    %c0_3 = arith.constant 0 : index
    %c0_4 = arith.constant 0 : index
    %3 = vector.load %arg3[%c0_3, %c0_4] : memref<1x128xf32, #tpu.memory_space<vmem>>, vector<1x128xf32>
    %4 = vector.broadcast %3 : vector<1x128xf32> to vector<384x128xf32>
    %5 = arith.addf %2, %4 : vector<384x128xf32>
    %cst_5 = arith.constant 0.000000e+00 : f32
    %6 = vector.broadcast %cst_5 : f32 to vector<384x128xf32>
    %7 = arith.maximumf %5, %6 : vector<384x128xf32>
    %c0_6 = arith.constant 0 : index
    %c0_7 = arith.constant 0 : index
    %8 = vector.load %arg4[%c0_6, %c0_7] : memref<384x128xf32, #tpu.memory_space<vmem>>, vector<384x128xf32>
    tpu.vector_store %arg4[%c0_6, %c0_7], %7 {strides = array<i32>} : memref<384x128xf32, #tpu.memory_space<vmem>>, vector<384x128xf32>,
    return
  }
  func.func @transform_0(%arg0: i32) -> (i32, i32) {
    %c0_i32 = arith.constant 0 : i32
    %c0_i32_0 = arith.constant 0 : i32
    return %arg0, %c0_i32 : i32, i32
  }
  func.func @transform_1(%arg0: i32) -> (i32, i32) {
    %c0_i32 = arith.constant 0 : i32
    %c0_i32_0 = arith.constant 0 : i32
    %c0_i32_1 = arith.constant 0 : i32
    return %c0_i32, %c0_i32_0 : i32, i32
  }
  func.func @transform_2(%arg0: i32) -> (i32, i32) {
    %c0_i32 = arith.constant 0 : i32
    %c0_i32_0 = arith.constant 0 : i32
    %c0_i32_1 = arith.constant 0 : i32
    return %c0_i32, %c0_i32_0 : i32, i32
  }
  func.func @transform_3(%arg0: i32) -> (i32, i32) {
    %c0_i32 = arith.constant 0 : i32
    %c0_i32_0 = arith.constant 0 : i32
    return %arg0, %c0_i32 : i32, i32
  }
}

module attributes {stable_mosaic.version = 11 : i64} {
  func.func @_mm_bias_relu_kernel(%arg0: i32, %arg1: memref<384x32xbf16, #tpu.memory_space<vmem>>, %arg2: memref<32x128xbf16, #tpu.memory_space<vmem>>, %arg3: memref<1x128xf32, #tpu.memory_space<vmem>>, %arg4: memref<384x128xf32, #tpu.memory_space<vmem>>) attributes {dimension_semantics = [#tpu.dimension_semantics<parallel>], iteration_bounds = array<i64: 3>, scalar_prefetch = 0 : i64, scratch_operands = 0 : i64, tpu.core_type = #tpu.core_type<tc>, window_params = [{transform_indices = @transform_0, window_bounds = array<i64: 384, 32>}, {pipeline_mode = #tpu.pipeline_mode<synchronous>, transform_indices = @transform_1, window_bounds = array<i64: 32, 128>}, {pipeline_mode = #tpu.pipeline_mode<synchronous>, transform_indices = @transform_2, window_bounds = array<i64: 1, 128>}, {transform_indices = @transform_3, window_bounds = array<i64: 384, 128>}]} {
    %c0 = arith.constant 0 : index
    %c0_0 = arith.constant 0 : index
    %0 = vector.load %arg1[%c0, %c0_0] : memref<384x32xbf16, #tpu.memory_space<vmem>>, vector<384x32xbf16>
    %c0_1 = arith.constant 0 : index
    %c0_2 = arith.constant 0 : index
    %1 = vector.load %arg2[%c0_1, %c0_2] : memref<32x128xbf16, #tpu.memory_space<vmem>>, vector<32x128xbf16>
    %cst = arith.constant dense<0.000000e+00> : vector<384x128xf32>
    %2 = tpu.matmul %0, %1, %cst {dimension_numbers = #tpu.dot_dimension_numbers<[1], [0], [0], [1], [0, 0, 1, 1], [], []>} : vector<384x32xbf16>, vector<32x128xbf16>, vector<384x128xf32> -> vector<384x128xf32>
    %c0_3 = arith.constant 0 : index
    %c0_4 = arith.constant 0 : index
    %3 = vector.load %arg3[%c0_3, %c0_4] : memref<1x128xf32, #tpu.memory_space<vmem>>, vector<1x128xf32>
    %4 = vector.broadcast %3 : vector<1x128xf32> to vector<384x128xf32>
    %5 = arith.addf %2, %4 : vector<384x128xf32>
    %cst_5 = arith.constant 0.000000e+00 : f32
    %6 = vector.broadcast %cst_5 : f32 to vector<384x128xf32>
    %7 = arith.maximumf %5, %6 : vector<384x128xf32>
    %c0_6 = arith.constant 0 : index
    %c0_7 = arith.constant 0 : index
    %8 = vector.load %arg4[%c0_6, %c0_7] : memref<384x128xf32, #tpu.memory_space<vmem>>, vector<384x128xf32>
    tpu.vector_store %arg4[%c0_6, %c0_7], %7 {strides = array<i32>} : memref<384x128xf32, #tpu.memory_space<vmem>>, vector<384x128xf32>,
    return
  }
  func.func @transform_0(%arg0: i32) -> (i32, i32) {
    %c0_i32 = arith.constant 0 : i32
    %c0_i32_0 = arith.constant 0 : i32
    return %arg0, %c0_i32 : i32, i32
  }
  func.func @transform_1(%arg0: i32) -> (i32, i32) {
    %c0_i32 = arith.constant 0 : i32
    %c0_i32_0 = arith.constant 0 : i32
    %c0_i32_1 = arith.constant 0 : i32
    return %c0_i32, %c0_i32_0 : i32, i32
  }
  func.func @transform_2(%arg0: i32) -> (i32, i32) {
    %c0_i32 = arith.constant 0 : i32
    %c0_i32_0 = arith.constant 0 : i32
    %c0_i32_1 = arith.constant 0 : i32
    return %c0_i32, %c0_i32_0 : i32, i32
  }
  func.func @transform_3(%arg0: i32) -> (i32, i32) {
    %c0_i32 = arith.constant 0 : i32
    %c0_i32_0 = arith.constant 0 : i32
    return %arg0, %c0_i32 : i32, i32
  }
}

module attributes {stable_mosaic.version = 11 : i64} {
  func.func @_mm_bias_relu_kernel(%arg0: i32, %arg1: memref<384x16xbf16, #tpu.memory_space<vmem>>, %arg2: memref<16x128xbf16, #tpu.memory_space<vmem>>, %arg3: memref<1x128xf32, #tpu.memory_space<vmem>>, %arg4: memref<384x128xf32, #tpu.memory_space<vmem>>) attributes {dimension_semantics = [#tpu.dimension_semantics<parallel>], iteration_bounds = array<i64: 3>, scalar_prefetch = 0 : i64, scratch_operands = 0 : i64, tpu.core_type = #tpu.core_type<tc>, window_params = [{transform_indices = @transform_0, window_bounds = array<i64: 384, 16>}, {pipeline_mode = #tpu.pipeline_mode<synchronous>, transform_indices = @transform_1, window_bounds = array<i64: 16, 128>}, {pipeline_mode = #tpu.pipeline_mode<synchronous>, transform_indices = @transform_2, window_bounds = array<i64: 1, 128>}, {transform_indices = @transform_3, window_bounds = array<i64: 384, 128>}]} {
    %c0 = arith.constant 0 : index
    %c0_0 = arith.constant 0 : index
    %0 = vector.load %arg1[%c0, %c0_0] : memref<384x16xbf16, #tpu.memory_space<vmem>>, vector<384x16xbf16>
    %c0_1 = arith.constant 0 : index
    %c0_2 = arith.constant 0 : index
    %1 = vector.load %arg2[%c0_1, %c0_2] : memref<16x128xbf16, #tpu.memory_space<vmem>>, vector<16x128xbf16>
    %cst = arith.constant dense<0.000000e+00> : vector<384x128xf32>
    %2 = tpu.matmul %0, %1, %cst {dimension_numbers = #tpu.dot_dimension_numbers<[1], [0], [0], [1], [0, 0, 1, 1], [], []>} : vector<384x16xbf16>, vector<16x128xbf16>, vector<384x128xf32> -> vector<384x128xf32>
    %c0_3 = arith.constant 0 : index
    %c0_4 = arith.constant 0 : index
    %3 = vector.load %arg3[%c0_3, %c0_4] : memref<1x128xf32, #tpu.memory_space<vmem>>, vector<1x128xf32>
    %4 = vector.broadcast %3 : vector<1x128xf32> to vector<384x128xf32>
    %5 = arith.addf %2, %4 : vector<384x128xf32>
    %cst_5 = arith.constant 0.000000e+00 : f32
    %6 = vector.broadcast %cst_5 : f32 to vector<384x128xf32>
    %7 = arith.maximumf %5, %6 : vector<384x128xf32>
    %c0_6 = arith.constant 0 : index
    %c0_7 = arith.constant 0 : index
    %8 = vector.load %arg4[%c0_6, %c0_7] : memref<384x128xf32, #tpu.memory_space<vmem>>, vector<384x128xf32>
    tpu.vector_store %arg4[%c0_6, %c0_7], %7 {strides = array<i32>} : memref<384x128xf32, #tpu.memory_space<vmem>>, vector<384x128xf32>,
    return
  }
  func.func @transform_0(%arg0: i32) -> (i32, i32) {
    %c0_i32 = arith.constant 0 : i32
    %c0_i32_0 = arith.constant 0 : i32
    return %arg0, %c0_i32 : i32, i32
  }
  func.func @transform_1(%arg0: i32) -> (i32, i32) {
    %c0_i32 = arith.constant 0 : i32
    %c0_i32_0 = arith.constant 0 : i32
    %c0_i32_1 = arith.constant 0 : i32
    return %c0_i32, %c0_i32_0 : i32, i32
  }
  func.func @transform_2(%arg0: i32) -> (i32, i32) {
    %c0_i32 = arith.constant 0 : i32
    %c0_i32_0 = arith.constant 0 : i32
    %c0_i32_1 = arith.constant 0 : i32
    return %c0_i32, %c0_i32_0 : i32, i32
  }
  func.func @transform_3(%arg0: i32) -> (i32, i32) {
    %c0_i32 = arith.constant 0 : i32
    %c0_i32_0 = arith.constant 0 : i32
    return %arg0, %c0_i32 : i32, i32
  }
}

module attributes {stable_mosaic.version = 11 : i64} {
  func.func @_mm_bias_relu_kernel(%arg0: i32, %arg1: memref<384x144xbf16, #tpu.memory_space<vmem>>, %arg2: memref<144x128xbf16, #tpu.memory_space<vmem>>, %arg3: memref<1x128xf32, #tpu.memory_space<vmem>>, %arg4: memref<384x128xf32, #tpu.memory_space<vmem>>) attributes {dimension_semantics = [#tpu.dimension_semantics<parallel>], iteration_bounds = array<i64: 3>, scalar_prefetch = 0 : i64, scratch_operands = 0 : i64, tpu.core_type = #tpu.core_type<tc>, window_params = [{transform_indices = @transform_0, window_bounds = array<i64: 384, 144>}, {pipeline_mode = #tpu.pipeline_mode<synchronous>, transform_indices = @transform_1, window_bounds = array<i64: 144, 128>}, {pipeline_mode = #tpu.pipeline_mode<synchronous>, transform_indices = @transform_2, window_bounds = array<i64: 1, 128>}, {transform_indices = @transform_3, window_bounds = array<i64: 384, 128>}]} {
    %c0 = arith.constant 0 : index
    %c0_0 = arith.constant 0 : index
    %0 = vector.load %arg1[%c0, %c0_0] : memref<384x144xbf16, #tpu.memory_space<vmem>>, vector<384x144xbf16>
    %c0_1 = arith.constant 0 : index
    %c0_2 = arith.constant 0 : index
    %1 = vector.load %arg2[%c0_1, %c0_2] : memref<144x128xbf16, #tpu.memory_space<vmem>>, vector<144x128xbf16>
    %cst = arith.constant dense<0.000000e+00> : vector<384x128xf32>
    %2 = tpu.matmul %0, %1, %cst {dimension_numbers = #tpu.dot_dimension_numbers<[1], [0], [0], [1], [0, 0, 1, 1], [], []>} : vector<384x144xbf16>, vector<144x128xbf16>, vector<384x128xf32> -> vector<384x128xf32>
    %c0_3 = arith.constant 0 : index
    %c0_4 = arith.constant 0 : index
    %3 = vector.load %arg3[%c0_3, %c0_4] : memref<1x128xf32, #tpu.memory_space<vmem>>, vector<1x128xf32>
    %4 = vector.broadcast %3 : vector<1x128xf32> to vector<384x128xf32>
    %5 = arith.addf %2, %4 : vector<384x128xf32>
    %cst_5 = arith.constant 0.000000e+00 : f32
    %6 = vector.broadcast %cst_5 : f32 to vector<384x128xf32>
    %7 = arith.maximumf %5, %6 : vector<384x128xf32>
    %c0_6 = arith.constant 0 : index
    %c0_7 = arith.constant 0 : index
    %8 = vector.load %arg4[%c0_6, %c0_7] : memref<384x128xf32, #tpu.memory_space<vmem>>, vector<384x128xf32>
    tpu.vector_store %arg4[%c0_6, %c0_7], %7 {strides = array<i32>} : memref<384x128xf32, #tpu.memory_space<vmem>>, vector<384x128xf32>,
    return
  }
  func.func @transform_0(%arg0: i32) -> (i32, i32) {
    %c0_i32 = arith.constant 0 : i32
    %c0_i32_0 = arith.constant 0 : i32
    return %arg0, %c0_i32 : i32, i32
  }
  func.func @transform_1(%arg0: i32) -> (i32, i32) {
    %c0_i32 = arith.constant 0 : i32
    %c0_i32_0 = arith.constant 0 : i32
    %c0_i32_1 = arith.constant 0 : i32
    return %c0_i32, %c0_i32_0 : i32, i32
  }
  func.func @transform_2(%arg0: i32) -> (i32, i32) {
    %c0_i32 = arith.constant 0 : i32
    %c0_i32_0 = arith.constant 0 : i32
    %c0_i32_1 = arith.constant 0 : i32
    return %c0_i32, %c0_i32_0 : i32, i32
  }
  func.func @transform_3(%arg0: i32) -> (i32, i32) {
    %c0_i32 = arith.constant 0 : i32
    %c0_i32_0 = arith.constant 0 : i32
    return %arg0, %c0_i32 : i32, i32
  }
}

module attributes {stable_mosaic.version = 11 : i64} {
  func.func @_mm_bias_relu_kernel(%arg0: i32, %arg1: memref<144x32xbf16, #tpu.memory_space<vmem>>, %arg2: memref<32x128xbf16, #tpu.memory_space<vmem>>, %arg3: memref<1x128xf32, #tpu.memory_space<vmem>>, %arg4: memref<144x128xf32, #tpu.memory_space<vmem>>) attributes {dimension_semantics = [#tpu.dimension_semantics<parallel>], iteration_bounds = array<i64: 2>, scalar_prefetch = 0 : i64, scratch_operands = 0 : i64, tpu.core_type = #tpu.core_type<tc>, window_params = [{transform_indices = @transform_0, window_bounds = array<i64: 144, 32>}, {pipeline_mode = #tpu.pipeline_mode<synchronous>, transform_indices = @transform_1, window_bounds = array<i64: 32, 128>}, {pipeline_mode = #tpu.pipeline_mode<synchronous>, transform_indices = @transform_2, window_bounds = array<i64: 1, 128>}, {transform_indices = @transform_3, window_bounds = array<i64: 144, 128>}]} {
    %c0 = arith.constant 0 : index
    %c0_0 = arith.constant 0 : index
    %0 = vector.load %arg1[%c0, %c0_0] : memref<144x32xbf16, #tpu.memory_space<vmem>>, vector<144x32xbf16>
    %c0_1 = arith.constant 0 : index
    %c0_2 = arith.constant 0 : index
    %1 = vector.load %arg2[%c0_1, %c0_2] : memref<32x128xbf16, #tpu.memory_space<vmem>>, vector<32x128xbf16>
    %cst = arith.constant dense<0.000000e+00> : vector<144x128xf32>
    %2 = tpu.matmul %0, %1, %cst {dimension_numbers = #tpu.dot_dimension_numbers<[1], [0], [0], [1], [0, 0, 1, 1], [], []>} : vector<144x32xbf16>, vector<32x128xbf16>, vector<144x128xf32> -> vector<144x128xf32>
    %c0_3 = arith.constant 0 : index
    %c0_4 = arith.constant 0 : index
    %3 = vector.load %arg3[%c0_3, %c0_4] : memref<1x128xf32, #tpu.memory_space<vmem>>, vector<1x128xf32>
    %4 = vector.broadcast %3 : vector<1x128xf32> to vector<144x128xf32>
    %5 = arith.addf %2, %4 : vector<144x128xf32>
    %cst_5 = arith.constant 0.000000e+00 : f32
    %6 = vector.broadcast %cst_5 : f32 to vector<144x128xf32>
    %7 = arith.maximumf %5, %6 : vector<144x128xf32>
    %c0_6 = arith.constant 0 : index
    %c0_7 = arith.constant 0 : index
    %8 = vector.load %arg4[%c0_6, %c0_7] : memref<144x128xf32, #tpu.memory_space<vmem>>, vector<144x128xf32>
    tpu.vector_store %arg4[%c0_6, %c0_7], %7 {strides = array<i32>} : memref<144x128xf32, #tpu.memory_space<vmem>>, vector<144x128xf32>,
    return
  }
  func.func @transform_0(%arg0: i32) -> (i32, i32) {
    %c0_i32 = arith.constant 0 : i32
    %c0_i32_0 = arith.constant 0 : i32
    return %arg0, %c0_i32 : i32, i32
  }
  func.func @transform_1(%arg0: i32) -> (i32, i32) {
    %c0_i32 = arith.constant 0 : i32
    %c0_i32_0 = arith.constant 0 : i32
    %c0_i32_1 = arith.constant 0 : i32
    return %c0_i32, %c0_i32_0 : i32, i32
  }
  func.func @transform_2(%arg0: i32) -> (i32, i32) {
    %c0_i32 = arith.constant 0 : i32
    %c0_i32_0 = arith.constant 0 : i32
    %c0_i32_1 = arith.constant 0 : i32
    return %c0_i32, %c0_i32_0 : i32, i32
  }
  func.func @transform_3(%arg0: i32) -> (i32, i32) {
    %c0_i32 = arith.constant 0 : i32
    %c0_i32_0 = arith.constant 0 : i32
    return %arg0, %c0_i32 : i32, i32
  }
}

module attributes {stable_mosaic.version = 11 : i64} {
  func.func @_mm_bias_relu_kernel(%arg0: i32, %arg1: memref<144x288xbf16, #tpu.memory_space<vmem>>, %arg2: memref<288x128xbf16, #tpu.memory_space<vmem>>, %arg3: memref<1x128xf32, #tpu.memory_space<vmem>>, %arg4: memref<144x128xf32, #tpu.memory_space<vmem>>) attributes {dimension_semantics = [#tpu.dimension_semantics<parallel>], iteration_bounds = array<i64: 2>, scalar_prefetch = 0 : i64, scratch_operands = 0 : i64, tpu.core_type = #tpu.core_type<tc>, window_params = [{transform_indices = @transform_0, window_bounds = array<i64: 144, 288>}, {pipeline_mode = #tpu.pipeline_mode<synchronous>, transform_indices = @transform_1, window_bounds = array<i64: 288, 128>}, {pipeline_mode = #tpu.pipeline_mode<synchronous>, transform_indices = @transform_2, window_bounds = array<i64: 1, 128>}, {transform_indices = @transform_3, window_bounds = array<i64: 144, 128>}]} {
    %c0 = arith.constant 0 : index
    %c0_0 = arith.constant 0 : index
    %0 = vector.load %arg1[%c0, %c0_0] : memref<144x288xbf16, #tpu.memory_space<vmem>>, vector<144x288xbf16>
    %c0_1 = arith.constant 0 : index
    %c0_2 = arith.constant 0 : index
    %1 = vector.load %arg2[%c0_1, %c0_2] : memref<288x128xbf16, #tpu.memory_space<vmem>>, vector<288x128xbf16>
    %cst = arith.constant dense<0.000000e+00> : vector<144x128xf32>
    %2 = tpu.matmul %0, %1, %cst {dimension_numbers = #tpu.dot_dimension_numbers<[1], [0], [0], [1], [0, 0, 1, 1], [], []>} : vector<144x288xbf16>, vector<288x128xbf16>, vector<144x128xf32> -> vector<144x128xf32>
    %c0_3 = arith.constant 0 : index
    %c0_4 = arith.constant 0 : index
    %3 = vector.load %arg3[%c0_3, %c0_4] : memref<1x128xf32, #tpu.memory_space<vmem>>, vector<1x128xf32>
    %4 = vector.broadcast %3 : vector<1x128xf32> to vector<144x128xf32>
    %5 = arith.addf %2, %4 : vector<144x128xf32>
    %cst_5 = arith.constant 0.000000e+00 : f32
    %6 = vector.broadcast %cst_5 : f32 to vector<144x128xf32>
    %7 = arith.maximumf %5, %6 : vector<144x128xf32>
    %c0_6 = arith.constant 0 : index
    %c0_7 = arith.constant 0 : index
    %8 = vector.load %arg4[%c0_6, %c0_7] : memref<144x128xf32, #tpu.memory_space<vmem>>, vector<144x128xf32>
    tpu.vector_store %arg4[%c0_6, %c0_7], %7 {strides = array<i32>} : memref<144x128xf32, #tpu.memory_space<vmem>>, vector<144x128xf32>,
    return
  }
  func.func @transform_0(%arg0: i32) -> (i32, i32) {
    %c0_i32 = arith.constant 0 : i32
    %c0_i32_0 = arith.constant 0 : i32
    return %arg0, %c0_i32 : i32, i32
  }
  func.func @transform_1(%arg0: i32) -> (i32, i32) {
    %c0_i32 = arith.constant 0 : i32
    %c0_i32_0 = arith.constant 0 : i32
    %c0_i32_1 = arith.constant 0 : i32
    return %c0_i32, %c0_i32_0 : i32, i32
  }
  func.func @transform_2(%arg0: i32) -> (i32, i32) {
    %c0_i32 = arith.constant 0 : i32
    %c0_i32_0 = arith.constant 0 : i32
    %c0_i32_1 = arith.constant 0 : i32
    return %c0_i32, %c0_i32_0 : i32, i32
  }
  func.func @transform_3(%arg0: i32) -> (i32, i32) {
    %c0_i32 = arith.constant 0 : i32
    %c0_i32_0 = arith.constant 0 : i32
    return %arg0, %c0_i32 : i32, i32
  }
}

module attributes {stable_mosaic.version = 11 : i64} {
  func.func @_mm_bias_relu_kernel(%arg0: i32, %arg1: memref<144x80xbf16, #tpu.memory_space<vmem>>, %arg2: memref<80x128xbf16, #tpu.memory_space<vmem>>, %arg3: memref<1x128xf32, #tpu.memory_space<vmem>>, %arg4: memref<144x128xf32, #tpu.memory_space<vmem>>) attributes {dimension_semantics = [#tpu.dimension_semantics<parallel>], iteration_bounds = array<i64: 2>, scalar_prefetch = 0 : i64, scratch_operands = 0 : i64, tpu.core_type = #tpu.core_type<tc>, window_params = [{transform_indices = @transform_0, window_bounds = array<i64: 144, 80>}, {pipeline_mode = #tpu.pipeline_mode<synchronous>, transform_indices = @transform_1, window_bounds = array<i64: 80, 128>}, {pipeline_mode = #tpu.pipeline_mode<synchronous>, transform_indices = @transform_2, window_bounds = array<i64: 1, 128>}, {transform_indices = @transform_3, window_bounds = array<i64: 144, 128>}]} {
    %c0 = arith.constant 0 : index
    %c0_0 = arith.constant 0 : index
    %0 = vector.load %arg1[%c0, %c0_0] : memref<144x80xbf16, #tpu.memory_space<vmem>>, vector<144x80xbf16>
    %c0_1 = arith.constant 0 : index
    %c0_2 = arith.constant 0 : index
    %1 = vector.load %arg2[%c0_1, %c0_2] : memref<80x128xbf16, #tpu.memory_space<vmem>>, vector<80x128xbf16>
    %cst = arith.constant dense<0.000000e+00> : vector<144x128xf32>
    %2 = tpu.matmul %0, %1, %cst {dimension_numbers = #tpu.dot_dimension_numbers<[1], [0], [0], [1], [0, 0, 1, 1], [], []>} : vector<144x80xbf16>, vector<80x128xbf16>, vector<144x128xf32> -> vector<144x128xf32>
    %c0_3 = arith.constant 0 : index
    %c0_4 = arith.constant 0 : index
    %3 = vector.load %arg3[%c0_3, %c0_4] : memref<1x128xf32, #tpu.memory_space<vmem>>, vector<1x128xf32>
    %4 = vector.broadcast %3 : vector<1x128xf32> to vector<144x128xf32>
    %5 = arith.addf %2, %4 : vector<144x128xf32>
    %cst_5 = arith.constant 0.000000e+00 : f32
    %6 = vector.broadcast %cst_5 : f32 to vector<144x128xf32>
    %7 = arith.maximumf %5, %6 : vector<144x128xf32>
    %c0_6 = arith.constant 0 : index
    %c0_7 = arith.constant 0 : index
    %8 = vector.load %arg4[%c0_6, %c0_7] : memref<144x128xf32, #tpu.memory_space<vmem>>, vector<144x128xf32>
    tpu.vector_store %arg4[%c0_6, %c0_7], %7 {strides = array<i32>} : memref<144x128xf32, #tpu.memory_space<vmem>>, vector<144x128xf32>,
    return
  }
  func.func @transform_0(%arg0: i32) -> (i32, i32) {
    %c0_i32 = arith.constant 0 : i32
    %c0_i32_0 = arith.constant 0 : i32
    return %arg0, %c0_i32 : i32, i32
  }
  func.func @transform_1(%arg0: i32) -> (i32, i32) {
    %c0_i32 = arith.constant 0 : i32
    %c0_i32_0 = arith.constant 0 : i32
    %c0_i32_1 = arith.constant 0 : i32
    return %c0_i32, %c0_i32_0 : i32, i32
  }
  func.func @transform_2(%arg0: i32) -> (i32, i32) {
    %c0_i32 = arith.constant 0 : i32
    %c0_i32_0 = arith.constant 0 : i32
    %c0_i32_1 = arith.constant 0 : i32
    return %c0_i32, %c0_i32_0 : i32, i32
  }
  func.func @transform_3(%arg0: i32) -> (i32, i32) {
    %c0_i32 = arith.constant 0 : i32
    %c0_i32_0 = arith.constant 0 : i32
    return %arg0, %c0_i32 : i32, i32
  }
}

module attributes {stable_mosaic.version = 11 : i64} {
  func.func @_mm_bias_relu_kernel(%arg0: i32, %arg1: memref<144x48xbf16, #tpu.memory_space<vmem>>, %arg2: memref<48x128xbf16, #tpu.memory_space<vmem>>, %arg3: memref<1x128xf32, #tpu.memory_space<vmem>>, %arg4: memref<144x128xf32, #tpu.memory_space<vmem>>) attributes {dimension_semantics = [#tpu.dimension_semantics<parallel>], iteration_bounds = array<i64: 2>, scalar_prefetch = 0 : i64, scratch_operands = 0 : i64, tpu.core_type = #tpu.core_type<tc>, window_params = [{transform_indices = @transform_0, window_bounds = array<i64: 144, 48>}, {pipeline_mode = #tpu.pipeline_mode<synchronous>, transform_indices = @transform_1, window_bounds = array<i64: 48, 128>}, {pipeline_mode = #tpu.pipeline_mode<synchronous>, transform_indices = @transform_2, window_bounds = array<i64: 1, 128>}, {transform_indices = @transform_3, window_bounds = array<i64: 144, 128>}]} {
    %c0 = arith.constant 0 : index
    %c0_0 = arith.constant 0 : index
    %0 = vector.load %arg1[%c0, %c0_0] : memref<144x48xbf16, #tpu.memory_space<vmem>>, vector<144x48xbf16>
    %c0_1 = arith.constant 0 : index
    %c0_2 = arith.constant 0 : index
    %1 = vector.load %arg2[%c0_1, %c0_2] : memref<48x128xbf16, #tpu.memory_space<vmem>>, vector<48x128xbf16>
    %cst = arith.constant dense<0.000000e+00> : vector<144x128xf32>
    %2 = tpu.matmul %0, %1, %cst {dimension_numbers = #tpu.dot_dimension_numbers<[1], [0], [0], [1], [0, 0, 1, 1], [], []>} : vector<144x48xbf16>, vector<48x128xbf16>, vector<144x128xf32> -> vector<144x128xf32>
    %c0_3 = arith.constant 0 : index
    %c0_4 = arith.constant 0 : index
    %3 = vector.load %arg3[%c0_3, %c0_4] : memref<1x128xf32, #tpu.memory_space<vmem>>, vector<1x128xf32>
    %4 = vector.broadcast %3 : vector<1x128xf32> to vector<144x128xf32>
    %5 = arith.addf %2, %4 : vector<144x128xf32>
    %cst_5 = arith.constant 0.000000e+00 : f32
    %6 = vector.broadcast %cst_5 : f32 to vector<144x128xf32>
    %7 = arith.maximumf %5, %6 : vector<144x128xf32>
    %c0_6 = arith.constant 0 : index
    %c0_7 = arith.constant 0 : index
    %8 = vector.load %arg4[%c0_6, %c0_7] : memref<144x128xf32, #tpu.memory_space<vmem>>, vector<144x128xf32>
    tpu.vector_store %arg4[%c0_6, %c0_7], %7 {strides = array<i32>} : memref<144x128xf32, #tpu.memory_space<vmem>>, vector<144x128xf32>,
    return
  }
  func.func @transform_0(%arg0: i32) -> (i32, i32) {
    %c0_i32 = arith.constant 0 : i32
    %c0_i32_0 = arith.constant 0 : i32
    return %arg0, %c0_i32 : i32, i32
  }
  func.func @transform_1(%arg0: i32) -> (i32, i32) {
    %c0_i32 = arith.constant 0 : i32
    %c0_i32_0 = arith.constant 0 : i32
    %c0_i32_1 = arith.constant 0 : i32
    return %c0_i32, %c0_i32_0 : i32, i32
  }
  func.func @transform_2(%arg0: i32) -> (i32, i32) {
    %c0_i32 = arith.constant 0 : i32
    %c0_i32_0 = arith.constant 0 : i32
    %c0_i32_1 = arith.constant 0 : i32
    return %c0_i32, %c0_i32_0 : i32, i32
  }
  func.func @transform_3(%arg0: i32) -> (i32, i32) {
    %c0_i32 = arith.constant 0 : i32
    %c0_i32_0 = arith.constant 0 : i32
    return %arg0, %c0_i32 : i32, i32
  }
}

module attributes {stable_mosaic.version = 11 : i64} {
  func.func @_mm_bias_relu_kernel(%arg0: i32, %arg1: memref<48x48xbf16, #tpu.memory_space<vmem>>, %arg2: memref<48x128xbf16, #tpu.memory_space<vmem>>, %arg3: memref<1x128xf32, #tpu.memory_space<vmem>>, %arg4: memref<48x128xf32, #tpu.memory_space<vmem>>) attributes {dimension_semantics = [#tpu.dimension_semantics<parallel>], iteration_bounds = array<i64: 2>, scalar_prefetch = 0 : i64, scratch_operands = 0 : i64, tpu.core_type = #tpu.core_type<tc>, window_params = [{transform_indices = @transform_0, window_bounds = array<i64: 48, 48>}, {pipeline_mode = #tpu.pipeline_mode<synchronous>, transform_indices = @transform_1, window_bounds = array<i64: 48, 128>}, {pipeline_mode = #tpu.pipeline_mode<synchronous>, transform_indices = @transform_2, window_bounds = array<i64: 1, 128>}, {transform_indices = @transform_3, window_bounds = array<i64: 48, 128>}]} {
    %c0 = arith.constant 0 : index
    %c0_0 = arith.constant 0 : index
    %0 = vector.load %arg1[%c0, %c0_0] : memref<48x48xbf16, #tpu.memory_space<vmem>>, vector<48x48xbf16>
    %c0_1 = arith.constant 0 : index
    %c0_2 = arith.constant 0 : index
    %1 = vector.load %arg2[%c0_1, %c0_2] : memref<48x128xbf16, #tpu.memory_space<vmem>>, vector<48x128xbf16>
    %cst = arith.constant dense<0.000000e+00> : vector<48x128xf32>
    %2 = tpu.matmul %0, %1, %cst {dimension_numbers = #tpu.dot_dimension_numbers<[1], [0], [0], [1], [0, 0, 1, 1], [], []>} : vector<48x48xbf16>, vector<48x128xbf16>, vector<48x128xf32> -> vector<48x128xf32>
    %c0_3 = arith.constant 0 : index
    %c0_4 = arith.constant 0 : index
    %3 = vector.load %arg3[%c0_3, %c0_4] : memref<1x128xf32, #tpu.memory_space<vmem>>, vector<1x128xf32>
    %4 = vector.broadcast %3 : vector<1x128xf32> to vector<48x128xf32>
    %5 = arith.addf %2, %4 : vector<48x128xf32>
    %cst_5 = arith.constant 0.000000e+00 : f32
    %6 = vector.broadcast %cst_5 : f32 to vector<48x128xf32>
    %7 = arith.maximumf %5, %6 : vector<48x128xf32>
    %c0_6 = arith.constant 0 : index
    %c0_7 = arith.constant 0 : index
    %8 = vector.load %arg4[%c0_6, %c0_7] : memref<48x128xf32, #tpu.memory_space<vmem>>, vector<48x128xf32>
    tpu.vector_store %arg4[%c0_6, %c0_7], %7 {strides = array<i32>} : memref<48x128xf32, #tpu.memory_space<vmem>>, vector<48x128xf32>,
    return
  }
  func.func @transform_0(%arg0: i32) -> (i32, i32) {
    %c0_i32 = arith.constant 0 : i32
    %c0_i32_0 = arith.constant 0 : i32
    return %arg0, %c0_i32 : i32, i32
  }
  func.func @transform_1(%arg0: i32) -> (i32, i32) {
    %c0_i32 = arith.constant 0 : i32
    %c0_i32_0 = arith.constant 0 : i32
    %c0_i32_1 = arith.constant 0 : i32
    return %c0_i32, %c0_i32_0 : i32, i32
  }
  func.func @transform_2(%arg0: i32) -> (i32, i32) {
    %c0_i32 = arith.constant 0 : i32
    %c0_i32_0 = arith.constant 0 : i32
    %c0_i32_1 = arith.constant 0 : i32
    return %c0_i32, %c0_i32_0 : i32, i32
  }
  func.func @transform_3(%arg0: i32) -> (i32, i32) {
    %c0_i32 = arith.constant 0 : i32
    %c0_i32_0 = arith.constant 0 : i32
    return %arg0, %c0_i32 : i32, i32
  }
}

module attributes {stable_mosaic.version = 11 : i64} {
  func.func @_mm_bias_relu_kernel(%arg0: i32, %arg1: memref<48x576xbf16, #tpu.memory_space<vmem>>, %arg2: memref<576x128xbf16, #tpu.memory_space<vmem>>, %arg3: memref<1x128xf32, #tpu.memory_space<vmem>>, %arg4: memref<48x128xf32, #tpu.memory_space<vmem>>) attributes {dimension_semantics = [#tpu.dimension_semantics<parallel>], iteration_bounds = array<i64: 2>, scalar_prefetch = 0 : i64, scratch_operands = 0 : i64, tpu.core_type = #tpu.core_type<tc>, window_params = [{transform_indices = @transform_0, window_bounds = array<i64: 48, 576>}, {pipeline_mode = #tpu.pipeline_mode<synchronous>, transform_indices = @transform_1, window_bounds = array<i64: 576, 128>}, {pipeline_mode = #tpu.pipeline_mode<synchronous>, transform_indices = @transform_2, window_bounds = array<i64: 1, 128>}, {transform_indices = @transform_3, window_bounds = array<i64: 48, 128>}]} {
    %c0 = arith.constant 0 : index
    %c0_0 = arith.constant 0 : index
    %0 = vector.load %arg1[%c0, %c0_0] : memref<48x576xbf16, #tpu.memory_space<vmem>>, vector<48x576xbf16>
    %c0_1 = arith.constant 0 : index
    %c0_2 = arith.constant 0 : index
    %1 = vector.load %arg2[%c0_1, %c0_2] : memref<576x128xbf16, #tpu.memory_space<vmem>>, vector<576x128xbf16>
    %cst = arith.constant dense<0.000000e+00> : vector<48x128xf32>
    %2 = tpu.matmul %0, %1, %cst {dimension_numbers = #tpu.dot_dimension_numbers<[1], [0], [0], [1], [0, 0, 1, 1], [], []>} : vector<48x576xbf16>, vector<576x128xbf16>, vector<48x128xf32> -> vector<48x128xf32>
    %c0_3 = arith.constant 0 : index
    %c0_4 = arith.constant 0 : index
    %3 = vector.load %arg3[%c0_3, %c0_4] : memref<1x128xf32, #tpu.memory_space<vmem>>, vector<1x128xf32>
    %4 = vector.broadcast %3 : vector<1x128xf32> to vector<48x128xf32>
    %5 = arith.addf %2, %4 : vector<48x128xf32>
    %cst_5 = arith.constant 0.000000e+00 : f32
    %6 = vector.broadcast %cst_5 : f32 to vector<48x128xf32>
    %7 = arith.maximumf %5, %6 : vector<48x128xf32>
    %c0_6 = arith.constant 0 : index
    %c0_7 = arith.constant 0 : index
    %8 = vector.load %arg4[%c0_6, %c0_7] : memref<48x128xf32, #tpu.memory_space<vmem>>, vector<48x128xf32>
    tpu.vector_store %arg4[%c0_6, %c0_7], %7 {strides = array<i32>} : memref<48x128xf32, #tpu.memory_space<vmem>>, vector<48x128xf32>,
    return
  }
  func.func @transform_0(%arg0: i32) -> (i32, i32) {
    %c0_i32 = arith.constant 0 : i32
    %c0_i32_0 = arith.constant 0 : i32
    return %arg0, %c0_i32 : i32, i32
  }
  func.func @transform_1(%arg0: i32) -> (i32, i32) {
    %c0_i32 = arith.constant 0 : i32
    %c0_i32_0 = arith.constant 0 : i32
    %c0_i32_1 = arith.constant 0 : i32
    return %c0_i32, %c0_i32_0 : i32, i32
  }
  func.func @transform_2(%arg0: i32) -> (i32, i32) {
    %c0_i32 = arith.constant 0 : i32
    %c0_i32_0 = arith.constant 0 : i32
    %c0_i32_1 = arith.constant 0 : i32
    return %c0_i32, %c0_i32_0 : i32, i32
  }
  func.func @transform_3(%arg0: i32) -> (i32, i32) {
    %c0_i32 = arith.constant 0 : i32
    %c0_i32_0 = arith.constant 0 : i32
    return %arg0, %c0_i32 : i32, i32
  }
}

module attributes {stable_mosaic.version = 11 : i64} {
  func.func @_mm_bias_relu_kernel(%arg0: i32, %arg1: memref<48x80xbf16, #tpu.memory_space<vmem>>, %arg2: memref<80x128xbf16, #tpu.memory_space<vmem>>, %arg3: memref<1x128xf32, #tpu.memory_space<vmem>>, %arg4: memref<48x128xf32, #tpu.memory_space<vmem>>) attributes {dimension_semantics = [#tpu.dimension_semantics<parallel>], iteration_bounds = array<i64: 2>, scalar_prefetch = 0 : i64, scratch_operands = 0 : i64, tpu.core_type = #tpu.core_type<tc>, window_params = [{transform_indices = @transform_0, window_bounds = array<i64: 48, 80>}, {pipeline_mode = #tpu.pipeline_mode<synchronous>, transform_indices = @transform_1, window_bounds = array<i64: 80, 128>}, {pipeline_mode = #tpu.pipeline_mode<synchronous>, transform_indices = @transform_2, window_bounds = array<i64: 1, 128>}, {transform_indices = @transform_3, window_bounds = array<i64: 48, 128>}]} {
    %c0 = arith.constant 0 : index
    %c0_0 = arith.constant 0 : index
    %0 = vector.load %arg1[%c0, %c0_0] : memref<48x80xbf16, #tpu.memory_space<vmem>>, vector<48x80xbf16>
    %c0_1 = arith.constant 0 : index
    %c0_2 = arith.constant 0 : index
    %1 = vector.load %arg2[%c0_1, %c0_2] : memref<80x128xbf16, #tpu.memory_space<vmem>>, vector<80x128xbf16>
    %cst = arith.constant dense<0.000000e+00> : vector<48x128xf32>
    %2 = tpu.matmul %0, %1, %cst {dimension_numbers = #tpu.dot_dimension_numbers<[1], [0], [0], [1], [0, 0, 1, 1], [], []>} : vector<48x80xbf16>, vector<80x128xbf16>, vector<48x128xf32> -> vector<48x128xf32>
    %c0_3 = arith.constant 0 : index
    %c0_4 = arith.constant 0 : index
    %3 = vector.load %arg3[%c0_3, %c0_4] : memref<1x128xf32, #tpu.memory_space<vmem>>, vector<1x128xf32>
    %4 = vector.broadcast %3 : vector<1x128xf32> to vector<48x128xf32>
    %5 = arith.addf %2, %4 : vector<48x128xf32>
    %cst_5 = arith.constant 0.000000e+00 : f32
    %6 = vector.broadcast %cst_5 : f32 to vector<48x128xf32>
    %7 = arith.maximumf %5, %6 : vector<48x128xf32>
    %c0_6 = arith.constant 0 : index
    %c0_7 = arith.constant 0 : index
    %8 = vector.load %arg4[%c0_6, %c0_7] : memref<48x128xf32, #tpu.memory_space<vmem>>, vector<48x128xf32>
    tpu.vector_store %arg4[%c0_6, %c0_7], %7 {strides = array<i32>} : memref<48x128xf32, #tpu.memory_space<vmem>>, vector<48x128xf32>,
    return
  }
  func.func @transform_0(%arg0: i32) -> (i32, i32) {
    %c0_i32 = arith.constant 0 : i32
    %c0_i32_0 = arith.constant 0 : i32
    return %arg0, %c0_i32 : i32, i32
  }
  func.func @transform_1(%arg0: i32) -> (i32, i32) {
    %c0_i32 = arith.constant 0 : i32
    %c0_i32_0 = arith.constant 0 : i32
    %c0_i32_1 = arith.constant 0 : i32
    return %c0_i32, %c0_i32_0 : i32, i32
  }
  func.func @transform_2(%arg0: i32) -> (i32, i32) {
    %c0_i32 = arith.constant 0 : i32
    %c0_i32_0 = arith.constant 0 : i32
    %c0_i32_1 = arith.constant 0 : i32
    return %c0_i32, %c0_i32_0 : i32, i32
  }
  func.func @transform_3(%arg0: i32) -> (i32, i32) {
    %c0_i32 = arith.constant 0 : i32
    %c0_i32_0 = arith.constant 0 : i32
    return %arg0, %c0_i32 : i32, i32
  }
}

module attributes {stable_mosaic.version = 11 : i64} {
  func.func @_mm_bias_relu_kernel(%arg0: i32, %arg1: memref<48x64xbf16, #tpu.memory_space<vmem>>, %arg2: memref<64x128xbf16, #tpu.memory_space<vmem>>, %arg3: memref<1x128xf32, #tpu.memory_space<vmem>>, %arg4: memref<48x128xf32, #tpu.memory_space<vmem>>) attributes {dimension_semantics = [#tpu.dimension_semantics<parallel>], iteration_bounds = array<i64: 2>, scalar_prefetch = 0 : i64, scratch_operands = 0 : i64, tpu.core_type = #tpu.core_type<tc>, window_params = [{transform_indices = @transform_0, window_bounds = array<i64: 48, 64>}, {pipeline_mode = #tpu.pipeline_mode<synchronous>, transform_indices = @transform_1, window_bounds = array<i64: 64, 128>}, {pipeline_mode = #tpu.pipeline_mode<synchronous>, transform_indices = @transform_2, window_bounds = array<i64: 1, 128>}, {transform_indices = @transform_3, window_bounds = array<i64: 48, 128>}]} {
    %c0 = arith.constant 0 : index
    %c0_0 = arith.constant 0 : index
    %0 = vector.load %arg1[%c0, %c0_0] : memref<48x64xbf16, #tpu.memory_space<vmem>>, vector<48x64xbf16>
    %c0_1 = arith.constant 0 : index
    %c0_2 = arith.constant 0 : index
    %1 = vector.load %arg2[%c0_1, %c0_2] : memref<64x128xbf16, #tpu.memory_space<vmem>>, vector<64x128xbf16>
    %cst = arith.constant dense<0.000000e+00> : vector<48x128xf32>
    %2 = tpu.matmul %0, %1, %cst {dimension_numbers = #tpu.dot_dimension_numbers<[1], [0], [0], [1], [0, 0, 1, 1], [], []>} : vector<48x64xbf16>, vector<64x128xbf16>, vector<48x128xf32> -> vector<48x128xf32>
    %c0_3 = arith.constant 0 : index
    %c0_4 = arith.constant 0 : index
    %3 = vector.load %arg3[%c0_3, %c0_4] : memref<1x128xf32, #tpu.memory_space<vmem>>, vector<1x128xf32>
    %4 = vector.broadcast %3 : vector<1x128xf32> to vector<48x128xf32>
    %5 = arith.addf %2, %4 : vector<48x128xf32>
    %cst_5 = arith.constant 0.000000e+00 : f32
    %6 = vector.broadcast %cst_5 : f32 to vector<48x128xf32>
    %7 = arith.maximumf %5, %6 : vector<48x128xf32>
    %c0_6 = arith.constant 0 : index
    %c0_7 = arith.constant 0 : index
    %8 = vector.load %arg4[%c0_6, %c0_7] : memref<48x128xf32, #tpu.memory_space<vmem>>, vector<48x128xf32>
    tpu.vector_store %arg4[%c0_6, %c0_7], %7 {strides = array<i32>} : memref<48x128xf32, #tpu.memory_space<vmem>>, vector<48x128xf32>,
    return
  }
  func.func @transform_0(%arg0: i32) -> (i32, i32) {
    %c0_i32 = arith.constant 0 : i32
    %c0_i32_0 = arith.constant 0 : i32
    return %arg0, %c0_i32 : i32, i32
  }
  func.func @transform_1(%arg0: i32) -> (i32, i32) {
    %c0_i32 = arith.constant 0 : i32
    %c0_i32_0 = arith.constant 0 : i32
    %c0_i32_1 = arith.constant 0 : i32
    return %c0_i32, %c0_i32_0 : i32, i32
  }
  func.func @transform_2(%arg0: i32) -> (i32, i32) {
    %c0_i32 = arith.constant 0 : i32
    %c0_i32_0 = arith.constant 0 : i32
    %c0_i32_1 = arith.constant 0 : i32
    return %c0_i32, %c0_i32_0 : i32, i32
  }
  func.func @transform_3(%arg0: i32) -> (i32, i32) {
    %c0_i32 = arith.constant 0 : i32
    %c0_i32_0 = arith.constant 0 : i32
    return %arg0, %c0_i32 : i32, i32
  }
}

module attributes {stable_mosaic.version = 11 : i64} {
  func.func @_mm_bias_relu_kernel(%arg0: i32, %arg1: memref<16x64xbf16, #tpu.memory_space<vmem>>, %arg2: memref<64x128xbf16, #tpu.memory_space<vmem>>, %arg3: memref<1x128xf32, #tpu.memory_space<vmem>>, %arg4: memref<16x128xf32, #tpu.memory_space<vmem>>) attributes {dimension_semantics = [#tpu.dimension_semantics<parallel>], iteration_bounds = array<i64: 2>, scalar_prefetch = 0 : i64, scratch_operands = 0 : i64, tpu.core_type = #tpu.core_type<tc>, window_params = [{transform_indices = @transform_0, window_bounds = array<i64: 16, 64>}, {pipeline_mode = #tpu.pipeline_mode<synchronous>, transform_indices = @transform_1, window_bounds = array<i64: 64, 128>}, {pipeline_mode = #tpu.pipeline_mode<synchronous>, transform_indices = @transform_2, window_bounds = array<i64: 1, 128>}, {transform_indices = @transform_3, window_bounds = array<i64: 16, 128>}]} {
    %c0 = arith.constant 0 : index
    %c0_0 = arith.constant 0 : index
    %0 = vector.load %arg1[%c0, %c0_0] : memref<16x64xbf16, #tpu.memory_space<vmem>>, vector<16x64xbf16>
    %c0_1 = arith.constant 0 : index
    %c0_2 = arith.constant 0 : index
    %1 = vector.load %arg2[%c0_1, %c0_2] : memref<64x128xbf16, #tpu.memory_space<vmem>>, vector<64x128xbf16>
    %cst = arith.constant dense<0.000000e+00> : vector<16x128xf32>
    %2 = tpu.matmul %0, %1, %cst {dimension_numbers = #tpu.dot_dimension_numbers<[1], [0], [0], [1], [0, 0, 1, 1], [], []>} : vector<16x64xbf16>, vector<64x128xbf16>, vector<16x128xf32> -> vector<16x128xf32>
    %c0_3 = arith.constant 0 : index
    %c0_4 = arith.constant 0 : index
    %3 = vector.load %arg3[%c0_3, %c0_4] : memref<1x128xf32, #tpu.memory_space<vmem>>, vector<1x128xf32>
    %4 = vector.broadcast %3 : vector<1x128xf32> to vector<16x128xf32>
    %5 = arith.addf %2, %4 : vector<16x128xf32>
    %cst_5 = arith.constant 0.000000e+00 : f32
    %6 = vector.broadcast %cst_5 : f32 to vector<16x128xf32>
    %7 = arith.maximumf %5, %6 : vector<16x128xf32>
    %c0_6 = arith.constant 0 : index
    %c0_7 = arith.constant 0 : index
    %8 = vector.load %arg4[%c0_6, %c0_7] : memref<16x128xf32, #tpu.memory_space<vmem>>, vector<16x128xf32>
    tpu.vector_store %arg4[%c0_6, %c0_7], %7 {strides = array<i32>} : memref<16x128xf32, #tpu.memory_space<vmem>>, vector<16x128xf32>,
    return
  }
  func.func @transform_0(%arg0: i32) -> (i32, i32) {
    %c0_i32 = arith.constant 0 : i32
    %c0_i32_0 = arith.constant 0 : i32
    return %arg0, %c0_i32 : i32, i32
  }
  func.func @transform_1(%arg0: i32) -> (i32, i32) {
    %c0_i32 = arith.constant 0 : i32
    %c0_i32_0 = arith.constant 0 : i32
    %c0_i32_1 = arith.constant 0 : i32
    return %c0_i32, %c0_i32_0 : i32, i32
  }
  func.func @transform_2(%arg0: i32) -> (i32, i32) {
    %c0_i32 = arith.constant 0 : i32
    %c0_i32_0 = arith.constant 0 : i32
    %c0_i32_1 = arith.constant 0 : i32
    return %c0_i32, %c0_i32_0 : i32, i32
  }
  func.func @transform_3(%arg0: i32) -> (i32, i32) {
    %c0_i32 = arith.constant 0 : i32
    %c0_i32_0 = arith.constant 0 : i32
    return %arg0, %c0_i32 : i32, i32
  }
}

module attributes {stable_mosaic.version = 11 : i64} {
  func.func @_mm_bias_relu_kernel(%arg0: i32, %arg1: memref<16x576xbf16, #tpu.memory_space<vmem>>, %arg2: memref<576x128xbf16, #tpu.memory_space<vmem>>, %arg3: memref<1x128xf32, #tpu.memory_space<vmem>>, %arg4: memref<16x128xf32, #tpu.memory_space<vmem>>) attributes {dimension_semantics = [#tpu.dimension_semantics<parallel>], iteration_bounds = array<i64: 2>, scalar_prefetch = 0 : i64, scratch_operands = 0 : i64, tpu.core_type = #tpu.core_type<tc>, window_params = [{transform_indices = @transform_0, window_bounds = array<i64: 16, 576>}, {pipeline_mode = #tpu.pipeline_mode<synchronous>, transform_indices = @transform_1, window_bounds = array<i64: 576, 128>}, {pipeline_mode = #tpu.pipeline_mode<synchronous>, transform_indices = @transform_2, window_bounds = array<i64: 1, 128>}, {transform_indices = @transform_3, window_bounds = array<i64: 16, 128>}]} {
    %c0 = arith.constant 0 : index
    %c0_0 = arith.constant 0 : index
    %0 = vector.load %arg1[%c0, %c0_0] : memref<16x576xbf16, #tpu.memory_space<vmem>>, vector<16x576xbf16>
    %c0_1 = arith.constant 0 : index
    %c0_2 = arith.constant 0 : index
    %1 = vector.load %arg2[%c0_1, %c0_2] : memref<576x128xbf16, #tpu.memory_space<vmem>>, vector<576x128xbf16>
    %cst = arith.constant dense<0.000000e+00> : vector<16x128xf32>
    %2 = tpu.matmul %0, %1, %cst {dimension_numbers = #tpu.dot_dimension_numbers<[1], [0], [0], [1], [0, 0, 1, 1], [], []>} : vector<16x576xbf16>, vector<576x128xbf16>, vector<16x128xf32> -> vector<16x128xf32>
    %c0_3 = arith.constant 0 : index
    %c0_4 = arith.constant 0 : index
    %3 = vector.load %arg3[%c0_3, %c0_4] : memref<1x128xf32, #tpu.memory_space<vmem>>, vector<1x128xf32>
    %4 = vector.broadcast %3 : vector<1x128xf32> to vector<16x128xf32>
    %5 = arith.addf %2, %4 : vector<16x128xf32>
    %cst_5 = arith.constant 0.000000e+00 : f32
    %6 = vector.broadcast %cst_5 : f32 to vector<16x128xf32>
    %7 = arith.maximumf %5, %6 : vector<16x128xf32>
    %c0_6 = arith.constant 0 : index
    %c0_7 = arith.constant 0 : index
    %8 = vector.load %arg4[%c0_6, %c0_7] : memref<16x128xf32, #tpu.memory_space<vmem>>, vector<16x128xf32>
    tpu.vector_store %arg4[%c0_6, %c0_7], %7 {strides = array<i32>} : memref<16x128xf32, #tpu.memory_space<vmem>>, vector<16x128xf32>,
    return
  }
  func.func @transform_0(%arg0: i32) -> (i32, i32) {
    %c0_i32 = arith.constant 0 : i32
    %c0_i32_0 = arith.constant 0 : i32
    return %arg0, %c0_i32 : i32, i32
  }
  func.func @transform_1(%arg0: i32) -> (i32, i32) {
    %c0_i32 = arith.constant 0 : i32
    %c0_i32_0 = arith.constant 0 : i32
    %c0_i32_1 = arith.constant 0 : i32
    return %c0_i32, %c0_i32_0 : i32, i32
  }
  func.func @transform_2(%arg0: i32) -> (i32, i32) {
    %c0_i32 = arith.constant 0 : i32
    %c0_i32_0 = arith.constant 0 : i32
    %c0_i32_1 = arith.constant 0 : i32
    return %c0_i32, %c0_i32_0 : i32, i32
  }
  func.func @transform_3(%arg0: i32) -> (i32, i32) {
    %c0_i32 = arith.constant 0 : i32
    %c0_i32_0 = arith.constant 0 : i32
    return %arg0, %c0_i32 : i32, i32
  }
}

module attributes {stable_mosaic.version = 11 : i64} {
  func.func @_mm_bias_relu_kernel(%arg0: i32, %arg1: memref<16x80xbf16, #tpu.memory_space<vmem>>, %arg2: memref<80x128xbf16, #tpu.memory_space<vmem>>, %arg3: memref<1x128xf32, #tpu.memory_space<vmem>>, %arg4: memref<16x128xf32, #tpu.memory_space<vmem>>) attributes {dimension_semantics = [#tpu.dimension_semantics<parallel>], iteration_bounds = array<i64: 2>, scalar_prefetch = 0 : i64, scratch_operands = 0 : i64, tpu.core_type = #tpu.core_type<tc>, window_params = [{transform_indices = @transform_0, window_bounds = array<i64: 16, 80>}, {pipeline_mode = #tpu.pipeline_mode<synchronous>, transform_indices = @transform_1, window_bounds = array<i64: 80, 128>}, {pipeline_mode = #tpu.pipeline_mode<synchronous>, transform_indices = @transform_2, window_bounds = array<i64: 1, 128>}, {transform_indices = @transform_3, window_bounds = array<i64: 16, 128>}]} {
    %c0 = arith.constant 0 : index
    %c0_0 = arith.constant 0 : index
    %0 = vector.load %arg1[%c0, %c0_0] : memref<16x80xbf16, #tpu.memory_space<vmem>>, vector<16x80xbf16>
    %c0_1 = arith.constant 0 : index
    %c0_2 = arith.constant 0 : index
    %1 = vector.load %arg2[%c0_1, %c0_2] : memref<80x128xbf16, #tpu.memory_space<vmem>>, vector<80x128xbf16>
    %cst = arith.constant dense<0.000000e+00> : vector<16x128xf32>
    %2 = tpu.matmul %0, %1, %cst {dimension_numbers = #tpu.dot_dimension_numbers<[1], [0], [0], [1], [0, 0, 1, 1], [], []>} : vector<16x80xbf16>, vector<80x128xbf16>, vector<16x128xf32> -> vector<16x128xf32>
    %c0_3 = arith.constant 0 : index
    %c0_4 = arith.constant 0 : index
    %3 = vector.load %arg3[%c0_3, %c0_4] : memref<1x128xf32, #tpu.memory_space<vmem>>, vector<1x128xf32>
    %4 = vector.broadcast %3 : vector<1x128xf32> to vector<16x128xf32>
    %5 = arith.addf %2, %4 : vector<16x128xf32>
    %cst_5 = arith.constant 0.000000e+00 : f32
    %6 = vector.broadcast %cst_5 : f32 to vector<16x128xf32>
    %7 = arith.maximumf %5, %6 : vector<16x128xf32>
    %c0_6 = arith.constant 0 : index
    %c0_7 = arith.constant 0 : index
    %8 = vector.load %arg4[%c0_6, %c0_7] : memref<16x128xf32, #tpu.memory_space<vmem>>, vector<16x128xf32>
    tpu.vector_store %arg4[%c0_6, %c0_7], %7 {strides = array<i32>} : memref<16x128xf32, #tpu.memory_space<vmem>>, vector<16x128xf32>,
    return
  }
  func.func @transform_0(%arg0: i32) -> (i32, i32) {
    %c0_i32 = arith.constant 0 : i32
    %c0_i32_0 = arith.constant 0 : i32
    return %arg0, %c0_i32 : i32, i32
  }
  func.func @transform_1(%arg0: i32) -> (i32, i32) {
    %c0_i32 = arith.constant 0 : i32
    %c0_i32_0 = arith.constant 0 : i32
    %c0_i32_1 = arith.constant 0 : i32
    return %c0_i32, %c0_i32_0 : i32, i32
  }
  func.func @transform_2(%arg0: i32) -> (i32, i32) {
    %c0_i32 = arith.constant 0 : i32
    %c0_i32_0 = arith.constant 0 : i32
    %c0_i32_1 = arith.constant 0 : i32
    return %c0_i32, %c0_i32_0 : i32, i32
  }
  func.func @transform_3(%arg0: i32) -> (i32, i32) {
    %c0_i32 = arith.constant 0 : i32
    %c0_i32_0 = arith.constant 0 : i32
    return %arg0, %c0_i32 : i32, i32
  }
}

</mosaic_0001>

<bundles_post_ra>
// kernel: peleenet_forward.20
= control target key start
LH: loop header
LB: loop body
LE: loop exit
PB: predicated region body
PF: predicated region fallthrough
CT: control target
= control target key end

     0   :  { %s1109_s12 = smov 0   ;;  %s1334_s0 = inlined_call_operand.vmem [shape: bf16[4608,16], index: 0, kind: input, shape index: {}]   ;;  %s1335_s1 = inlined_call_operand.vmem [shape: bf16[16,128], index: 1, kind: input, shape index: {}]   ;;  %s1336_s2 = inlined_call_operand.vmem [shape: f32[1,128], index: 2, kind: input, shape index: {}]   ;;  %s1337_s3 = inlined_call_operand.vmem [shape: f32[4608,128], index: 3, kind: output, shape index: {}]  }
   0x1 LB: > { %s861_s13 = sadd.s32 4294967295, %s1087_s12   ;;  %p865_p0 = scmp.ge.s32.totalorder %s1087_s12, 1  ;;  %s1087_s12 = sphi %s1109_s12, %s13_s12  }
   0x2   : > { %p138_p1 = scmp.lt.s32.totalorder %s1087_s12, 10 }
   0x4   : > { %p139_p2 = pnand %p865_p0, %p138_p1 }
   0x5   : > { %s866_s16 = sshll.u32 (!%p139_p2), %s861_s13, 6 }
   0x6   : > { %142 = sbr.rel (%p139_p2) target bundleno = 275 (0x113), region = 32  ;;  %p163_p3 = scmp.lt.s32.totalorder (!%p139_p2), %s866_s16, 575 }
   0xb   : > { %v1068_v0 = vld [vmem:[%s1335_s1] sm:$0xff]  ;;  %s1339_s16 = smov (!%p163_p3, %s866_s16), 575  ;;  %vm411_vm0 = vcmask 130048  }
   0xc   : > { %515 = vmatpush.bf16.msra.mxu0 %v1068_v0  ;;  %1069 = vmatpush.bf16.msra.mxu1 %v1068_v0  ;;  %s867_s17 = sshll.u32 %s1339_s16, 2  ;;  %v1195_v33 = vld [vmem:[%s1336_s2] ss:$0 sm:$0xff]  ;;  %s869_s23 = sshll.u32 %s1339_s16, 3 }
   0xd   : > { %1070 = vmatpush.bf16.msra.mxu2 %v1068_v0  ;;  %1071 = vmatpush.bf16.msra.mxu3 %v1068_v0  ;;  %s1126_s20 = scalar_lea.vmem %s1334_s0, %s867_s17  ;;  %s1203_s26 = scalar_lea.vmem %s1337_s3, %s869_s23 }
   0xe   : > { %v1036_v1 = vld [vmem:[%s1126_s20] sm:$0xff]  ;;  %v1037_v5 = vld [vmem:[%s1126_s20 + $0x8] sm:$0xff]  ;;  %v1038_v9 = vld [vmem:[%s1126_s20 + $0x10] sm:$0xff] }
   0xf   : > { %v1044_v2 = vld [vmem:[%s1126_s20 + $0x40] sm:$0xff]  ;;  %1002 = vmatmul.msk.bf16.vlgmr.msra.gmra.mxu0 %vm411_vm0, %v1036_v1  ;;  %v1045_v6 = vld [vmem:[%s1126_s20 + $0x48] sm:$0xff]  ;;  %v1046_v10 = vld [vmem:[%s1126_s20 + $0x50] sm:$0xff] }
  0x10   : > { %v1052_v3 = vld [vmem:[%s1126_s20 + $0x80] sm:$0xff]  ;;  %1010 = vmatmul.msk.bf16.vlgmr.msra.gmra.mxu1 %vm411_vm0, %v1044_v2  ;;  %v1053_v7 = vld [vmem:[%s1126_s20 + $0x88] sm:$0xff]  ;;  %v1054_v11 = vld [vmem:[%s1126_s20 + $0x90] sm:$0xff] }
  0x11   : > { %v1060_v4 = vld [vmem:[%s1126_s20 + $0xc0] sm:$0xff]  ;;  %1018 = vmatmul.msk.bf16.vlgmr.msra.gmra.mxu2 %vm411_vm0, %v1052_v3  ;;  %v1061_v8 = vld [vmem:[%s1126_s20 + $0xc8] sm:$0xff]  ;;  %v1062_v12 = vld [vmem:[%s1126_s20 + $0xd0] sm:$0xff] }
  0x12   : > { %1026 = vmatmul.msk.bf16.vlgmr.msra.gmra.mxu3 %vm411_vm0, %v1060_v4  ;;  %v1039_v13 = vld [vmem:[%s1126_s20 + $0x18] sm:$0xff]  ;;  %v1040_v17 = vld [vmem:[%s1126_s20 + $0x20] sm:$0xff]  ;;  %v1041_v21 = vld [vmem:[%s1126_s20 + $0x28] sm:$0xff] }
  0x13   : > { %v1047_v14 = vld [vmem:[%s1126_s20 + $0x58] sm:$0xff]  ;;  %v1048_v18 = vld [vmem:[%s1126_s20 + $0x60] sm:$0xff]  ;;  %v1049_v22 = vld [vmem:[%s1126_s20 + $0x68] sm:$0xff] }
  0x14   : > { %v1055_v15 = vld [vmem:[%s1126_s20 + $0x98] sm:$0xff]  ;;  %v1056_v19 = vld [vmem:[%s1126_s20 + $0xa0] sm:$0xff]  ;;  %v1057_v23 = vld [vmem:[%s1126_s20 + $0xa8] sm:$0xff] }
  0x15   : > { %v1063_v16 = vld [vmem:[%s1126_s20 + $0xd8] sm:$0xff]  ;;  %v1064_v20 = vld [vmem:[%s1126_s20 + $0xe0] sm:$0xff]  ;;  %v1065_v24 = vld [vmem:[%s1126_s20 + $0xe8] sm:$0xff] }
  0x16   : > { %v1042_v25 = vld [vmem:[%s1126_s20 + $0x30] sm:$0xff]  ;;  %v1043_v29 = vld [vmem:[%s1126_s20 + $0x38] sm:$0xff] }
  0x17   : > { %v1050_v26 = vld [vmem:[%s1126_s20 + $0x70] sm:$0xff]  ;;  %v1051_v30 = vld [vmem:[%s1126_s20 + $0x78] sm:$0xff] }
  0x18   : > { %v1058_v27 = vld [vmem:[%s1126_s20 + $0xb0] sm:$0xff]  ;;  %v1059_v31 = vld [vmem:[%s1126_s20 + $0xb8] sm:$0xff] }
  0x19   : > { %v1066_v28 = vld [vmem:[%s1126_s20 + $0xf0] sm:$0xff]  ;;  %v1067_v32 = vld [vmem:[%s1126_s20 + $0xf8] sm:$0xff] }
  0x1f   : > { %1003 = vmatmul.msk.bf16.gmra.mxu0 %vm411_vm0, %v1037_v5 }
  0x20   : > { %1011 = vmatmul.msk.bf16.gmra.mxu1 %vm411_vm0, %v1045_v6 }
  0x21   : > { %1019 = vmatmul.msk.bf16.gmra.mxu2 %vm411_vm0, %v1053_v7 }
  0x22   : > { %1027 = vmatmul.msk.bf16.gmra.mxu3 %vm411_vm0, %v1061_v8 }
  0x2f   : > { %1004 = vmatmul.msk.bf16.gmra.mxu0 %vm411_vm0, %v1038_v9 }
  0x30   : > { %1012 = vmatmul.msk.bf16.gmra.mxu1 %vm411_vm0, %v1046_v10 }
  0x31   : > { %1020 = vmatmul.msk.bf16.gmra.mxu2 %vm411_vm0, %v1054_v11 }
  0x32   : > { %1028 = vmatmul.msk.bf16.gmra.mxu3 %vm411_vm0, %v1062_v12 }
  0x3f   : > { %1005 = vmatmul.msk.bf16.gmra.mxu0 %vm411_vm0, %v1039_v13 }
  0x40   : > { %1013 = vmatmul.msk.bf16.gmra.mxu1 %vm411_vm0, %v1047_v14 }
  0x41   : > { %1021 = vmatmul.msk.bf16.gmra.mxu2 %vm411_vm0, %v1055_v15 }
  0x42   : > { %1029 = vmatmul.msk.bf16.gmra.mxu3 %vm411_vm0, %v1063_v16 }
  0x4f   : > { %1006 = vmatmul.msk.bf16.gmra.mxu0 %vm411_vm0, %v1040_v17 }
  0x50   : > { %1014 = vmatmul.msk.bf16.gmra.mxu1 %vm411_vm0, %v1048_v18 }
  0x51   : > { %1022 = vmatmul.msk.bf16.gmra.mxu2 %vm411_vm0, %v1056_v19 }
  0x52   : > { %1030 = vmatmul.msk.bf16.gmra.mxu3 %vm411_vm0, %v1064_v20 }
  0x5f   : > { %1007 = vmatmul.msk.bf16.gmra.mxu0 %vm411_vm0, %v1041_v21 }
  0x60   : > { %1015 = vmatmul.msk.bf16.gmra.mxu1 %vm411_vm0, %v1049_v22 }
  0x61   : > { %1023 = vmatmul.msk.bf16.gmra.mxu2 %vm411_vm0, %v1057_v23 }
  0x62   : > { %1031 = vmatmul.msk.bf16.gmra.mxu3 %vm411_vm0, %v1065_v24 }
  0x6f   : > { %1008 = vmatmul.msk.bf16.gmra.mxu0 %vm411_vm0, %v1042_v25 }
  0x70   : > { %1016 = vmatmul.msk.bf16.gmra.mxu1 %vm411_vm0, %v1050_v26 }
  0x71   : > { %1024 = vmatmul.msk.bf16.gmra.mxu2 %vm411_vm0, %v1058_v27 }
  0x72   : > { %1032 = vmatmul.msk.bf16.gmra.mxu3 %vm411_vm0, %v1066_v28 }
  0x7f   : > { %1009 = vmatmul.msk.bf16.gmra.mxu0 %vm411_vm0, %v1043_v29 }
  0x80   : > { %1017 = vmatmul.msk.bf16.gmra.mxu1 %vm411_vm0, %v1051_v30 }
  0x81   : > { %1025 = vmatmul.msk.bf16.gmra.mxu2 %vm411_vm0, %v1059_v31 }
  0x82   : > { %1033 = vmatmul.msk.bf16.gmra.mxu3 %vm411_vm0, %v1067_v32 }
  0x8c   : > { %v517_v34 = vpop.f32.mrf.mxu0 }
  0x8d   : > { %v557_v35 = vpop.f32.mrf.mxu1  ;;  %v518_v36 = vadd.f32 %v1195_v33, %v517_v34 }
  0x8e   : > { %v558_v37 = vadd.f32 %v1195_v33, %v557_v35 }
  0x8f   : > { %v677_v38 = vmax.f32 %v518_v36, 0.0 }
  0x90   : > { %v693_v39 = vmax.f32 %v558_v37, 0.0 }
  0x91   : > { %741 = vst [vmem:[%s1203_s26] sm:$0xff] %v677_v38 }
  0x92   : > { %757 = vst [vmem:[%s1203_s26 + $0x80] sm:$0xff] %v693_v39 }
  0x94   : > { %v597_v40 = vpop.f32.mrf.mxu2  ;;  %v519_v44 = vpop.f32.mrf.mxu0 }
  0x95   : > { %v637_v41 = vpop.f32.mrf.mxu3  ;;  %v598_v42 = vadd.f32 %v1195_v33, %v597_v40  ;;  %v559_v45 = vpop.f32.mrf.mxu1  ;;  %v520_v46 = vadd.f32 %v1195_v33, %v519_v44 }
  0x96   : > { %v638_v43 = vadd.f32 %v1195_v33, %v637_v41  ;;  %v560_v47 = vadd.f32 %v1195_v33, %v559_v45 }
  0x97   : > { %v709_v48 = vmax.f32 %v598_v42, 0.0  ;;  %v678_v50 = vmax.f32 %v520_v46, 0.0 }
  0x98   : > { %v725_v49 = vmax.f32 %v638_v43, 0.0  ;;  %v694_v51 = vmax.f32 %v560_v47, 0.0 }
  0x99   : > { %773 = vst [vmem:[%s1203_s26 + $0x100] sm:$0xff] %v709_v48 }
  0x9a   : > { %789 = vst [vmem:[%s1203_s26 + $0x180] sm:$0xff] %v725_v49 }
  0x9b   : > { %742 = vst [vmem:[%s1203_s26 + $0x8] sm:$0xff] %v678_v50 }
  0x9c   : > { %758 = vst [vmem:[%s1203_s26 + $0x88] sm:$0xff] %v694_v51  ;;  %v599_v52 = vpop.f32.mrf.mxu2  ;;  %v522_v56 = vpop.f32.mrf.mxu0 }
  0x9d   : > { %v639_v53 = vpop.f32.mrf.mxu3  ;;  %v600_v54 = vadd.f32 %v1195_v33, %v599_v52  ;;  %v562_v57 = vpop.f32.mrf.mxu1  ;;  %v523_v58 = vadd.f32 %v1195_v33, %v522_v56 }
  0x9e   : > { %v640_v55 = vadd.f32 %v1195_v33, %v639_v53  ;;  %v563_v59 = vadd.f32 %v1195_v33, %v562_v57 }
  0x9f   : > { %v710_v60 = vmax.f32 %v600_v54, 0.0  ;;  %v679_v62 = vmax.f32 %v523_v58, 0.0 }
  0xa0   : > { %v726_v61 = vmax.f32 %v640_v55, 0.0  ;;  %v695_v63 = vmax.f32 %v563_v59, 0.0 }
  0xa1   : > { %774 = vst [vmem:[%s1203_s26 + $0x108] sm:$0xff] %v710_v60 }
  0xa2   : > { %790 = vst [vmem:[%s1203_s26 + $0x188] sm:$0xff] %v726_v61 }
  0xa3   : > { %743 = vst [vmem:[%s1203_s26 + $0x10] sm:$0xff] %v679_v62 }
  0xa4   : > { %759 = vst [vmem:[%s1203_s26 + $0x90] sm:$0xff] %v695_v63  ;;  %v602_v0 = vpop.f32.mrf.mxu2  ;;  %v524_v4 = vpop.f32.mrf.mxu0 }
  0xa5   : > { %v642_v1 = vpop.f32.mrf.mxu3  ;;  %v603_v2 = vadd.f32 %v1195_v33, %v602_v0  ;;  %v564_v5 = vpop.f32.mrf.mxu1  ;;  %v525_v6 = vadd.f32 %v1195_v33, %v524_v4 }
  0xa6   : > { %v643_v3 = vadd.f32 %v1195_v33, %v642_v1  ;;  %v565_v7 = vadd.f32 %v1195_v33, %v564_v5 }
  0xa7   : > { %v711_v8 = vmax.f32 %v603_v2, 0.0  ;;  %v680_v10 = vmax.f32 %v525_v6, 0.0 }
  0xa8   : > { %v727_v9 = vmax.f32 %v643_v3, 0.0  ;;  %v696_v11 = vmax.f32 %v565_v7, 0.0 }
  0xa9   : > { %775 = vst [vmem:[%s1203_s26 + $0x110] sm:$0xff] %v711_v8 }
  0xaa   : > { %791 = vst [vmem:[%s1203_s26 + $0x190] sm:$0xff] %v727_v9 }
  0xab   : > { %744 = vst [vmem:[%s1203_s26 + $0x18] sm:$0xff] %v680_v10 }
  0xac   : > { %760 = vst [vmem:[%s1203_s26 + $0x98] sm:$0xff] %v696_v11  ;;  %v604_v12 = vpop.f32.mrf.mxu2  ;;  %v527_v16 = vpop.f32.mrf.mxu0 }
  0xad   : > { %v644_v13 = vpop.f32.mrf.mxu3  ;;  %v605_v14 = vadd.f32 %v1195_v33, %v604_v12  ;;  %v567_v17 = vpop.f32.mrf.mxu1  ;;  %v528_v18 = vadd.f32 %v1195_v33, %v527_v16 }
  0xae   : > { %v645_v15 = vadd.f32 %v1195_v33, %v644_v13  ;;  %v568_v19 = vadd.f32 %v1195_v33, %v567_v17 }
  0xaf   : > { %v712_v20 = vmax.f32 %v605_v14, 0.0  ;;  %v681_v22 = vmax.f32 %v528_v18, 0.0 }
  0xb0   : > { %v728_v21 = vmax.f32 %v645_v15, 0.0  ;;  %v697_v23 = vmax.f32 %v568_v19, 0.0 }
  0xb1   : > { %776 = vst [vmem:[%s1203_s26 + $0x118] sm:$0xff] %v712_v20 }
  0xb2   : > { %792 = vst [vmem:[%s1203_s26 + $0x198] sm:$0xff] %v728_v21 }
  0xb3   : > { %745 = vst [vmem:[%s1203_s26 + $0x20] sm:$0xff] %v681_v22 }
  0xb4   : > { %761 = vst [vmem:[%s1203_s26 + $0xa0] sm:$0xff] %v697_v23  ;;  %v607_v24 = vpop.f32.mrf.mxu2  ;;  %v529_v28 = vpop.f32.mrf.mxu0 }
  0xb5   : > { %v647_v25 = vpop.f32.mrf.mxu3  ;;  %v608_v26 = vadd.f32 %v1195_v33, %v607_v24  ;;  %v569_v29 = vpop.f32.mrf.mxu1  ;;  %v530_v30 = vadd.f32 %v1195_v33, %v529_v28 }
  0xb6   : > { %v648_v27 = vadd.f32 %v1195_v33, %v647_v25  ;;  %v570_v31 = vadd.f32 %v1195_v33, %v569_v29 }
  0xb7   : > { %v713_v32 = vmax.f32 %v608_v26, 0.0  ;;  %v682_v35 = vmax.f32 %v530_v30, 0.0 }
  0xb8   : > { %v729_v34 = vmax.f32 %v648_v27, 0.0  ;;  %v698_v36 = vmax.f32 %v570_v31, 0.0 }
  0xb9   : > { %777 = vst [vmem:[%s1203_s26 + $0x120] sm:$0xff] %v713_v32 }
  0xba   : > { %793 = vst [vmem:[%s1203_s26 + $0x1a0] sm:$0xff] %v729_v34 }
  0xbb   : > { %746 = vst [vmem:[%s1203_s26 + $0x28] sm:$0xff] %v682_v35 }
  0xbc   : > { %762 = vst [vmem:[%s1203_s26 + $0xa8] sm:$0xff] %v698_v36  ;;  %v609_v37 = vpop.f32.mrf.mxu2  ;;  %v532_v41 = vpop.f32.mrf.mxu0 }
  0xbd   : > { %v649_v38 = vpop.f32.mrf.mxu3  ;;  %v610_v39 = vadd.f32 %v1195_v33, %v609_v37  ;;  %v572_v42 = vpop.f32.mrf.mxu1  ;;  %v533_v43 = vadd.f32 %v1195_v33, %v532_v41 }
  0xbe   : > { %v650_v40 = vadd.f32 %v1195_v33, %v649_v38  ;;  %v573_v44 = vadd.f32 %v1195_v33, %v572_v42 }
  0xbf   : > { %v714_v45 = vmax.f32 %v610_v39, 0.0  ;;  %v683_v47 = vmax.f32 %v533_v43, 0.0 }
  0xc0   : > { %v730_v46 = vmax.f32 %v650_v40, 0.0  ;;  %v699_v48 = vmax.f32 %v573_v44, 0.0 }
  0xc1   : > { %778 = vst [vmem:[%s1203_s26 + $0x128] sm:$0xff] %v714_v45 }
  0xc2   : > { %794 = vst [vmem:[%s1203_s26 + $0x1a8] sm:$0xff] %v730_v46 }
  0xc3   : > { %747 = vst [vmem:[%s1203_s26 + $0x30] sm:$0xff] %v683_v47 }
  0xc4   : > { %763 = vst [vmem:[%s1203_s26 + $0xb0] sm:$0xff] %v699_v48  ;;  %v612_v49 = vpop.f32.mrf.mxu2  ;;  %v534_v53 = vpop.f32.mrf.mxu0 }
  0xc5   : > { %v652_v50 = vpop.f32.mrf.mxu3  ;;  %v613_v51 = vadd.f32 %v1195_v33, %v612_v49  ;;  %v574_v54 = vpop.f32.mrf.mxu1  ;;  %v535_v55 = vadd.f32 %v1195_v33, %v534_v53 }
  0xc6   : > { %v653_v52 = vadd.f32 %v1195_v33, %v652_v50  ;;  %v575_v56 = vadd.f32 %v1195_v33, %v574_v54 }
  0xc7   : > { %v715_v57 = vmax.f32 %v613_v51, 0.0  ;;  %v684_v59 = vmax.f32 %v535_v55, 0.0 }
  0xc8   : > { %v731_v58 = vmax.f32 %v653_v52, 0.0  ;;  %v700_v60 = vmax.f32 %v575_v56, 0.0 }
  0xc9   : > { %779 = vst [vmem:[%s1203_s26 + $0x130] sm:$0xff] %v715_v57 }
  0xca   : > { %795 = vst [vmem:[%s1203_s26 + $0x1b0] sm:$0xff] %v731_v58 }
  0xcb   : > { %748 = vst [vmem:[%s1203_s26 + $0x38] sm:$0xff] %v684_v59 }
  0xcc   : > { %764 = vst [vmem:[%s1203_s26 + $0xb8] sm:$0xff] %v700_v60  ;;  %v614_v61 = vpop.f32.mrf.mxu2  ;;  %v537_v1 = vpop.f32.mrf.mxu0 }
  0xcd   : > { %v654_v62 = vpop.f32.mrf.mxu3  ;;  %v615_v63 = vadd.f32 %v1195_v33, %v614_v61  ;;  %v577_v2 = vpop.f32.mrf.mxu1  ;;  %v538_v3 = vadd.f32 %v1195_v33, %v537_v1 }
  0xce   : > { %v655_v0 = vadd.f32 %v1195_v33, %v654_v62  ;;  %v578_v4 = vadd.f32 %v1195_v33, %v577_v2 }
  0xcf   : > { %v716_v5 = vmax.f32 %v615_v63, 0.0  ;;  %v685_v7 = vmax.f32 %v538_v3, 0.0 }
  0xd0   : > { %v732_v6 = vmax.f32 %v655_v0, 0.0  ;;  %v701_v8 = vmax.f32 %v578_v4, 0.0 }
  0xd1   : > { %780 = vst [vmem:[%s1203_s26 + $0x138] sm:$0xff] %v716_v5 }
  0xd2   : > { %796 = vst [vmem:[%s1203_s26 + $0x1b8] sm:$0xff] %v732_v6 }
  0xd3   : > { %749 = vst [vmem:[%s1203_s26 + $0x40] sm:$0xff] %v685_v7 }
  0xd4   : > { %765 = vst [vmem:[%s1203_s26 + $0xc0] sm:$0xff] %v701_v8  ;;  %v617_v9 = vpop.f32.mrf.mxu2  ;;  %v539_v13 = vpop.f32.mrf.mxu0 }
  0xd5   : > { %v657_v10 = vpop.f32.mrf.mxu3  ;;  %v618_v11 = vadd.f32 %v1195_v33, %v617_v9  ;;  %v579_v14 = vpop.f32.mrf.mxu1  ;;  %v540_v15 = vadd.f32 %v1195_v33, %v539_v13 }
  0xd6   : > { %v658_v12 = vadd.f32 %v1195_v33, %v657_v10  ;;  %v580_v16 = vadd.f32 %v1195_v33, %v579_v14 }
  0xd7   : > { %v717_v17 = vmax.f32 %v618_v11, 0.0  ;;  %v686_v19 = vmax.f32 %v540_v15, 0.0 }
  0xd8   : > { %v733_v18 = vmax.f32 %v658_v12, 0.0  ;;  %v702_v20 = vmax.f32 %v580_v16, 0.0 }
  0xd9   : > { %781 = vst [vmem:[%s1203_s26 + $0x140] sm:$0xff] %v717_v17 }
  0xda   : > { %797 = vst [vmem:[%s1203_s26 + $0x1c0] sm:$0xff] %v733_v18 }
  0xdb   : > { %750 = vst [vmem:[%s1203_s26 + $0x48] sm:$0xff] %v686_v19 }
  0xdc   : > { %766 = vst [vmem:[%s1203_s26 + $0xc8] sm:$0xff] %v702_v20  ;;  %v619_v21 = vpop.f32.mrf.mxu2  ;;  %v542_v25 = vpop.f32.mrf.mxu0 }
  0xdd   : > { %v659_v22 = vpop.f32.mrf.mxu3  ;;  %v620_v23 = vadd.f32 %v1195_v33, %v619_v21  ;;  %v582_v26 = vpop.f32.mrf.mxu1  ;;  %v543_v27 = vadd.f32 %v1195_v33, %v542_v25 }
  0xde   : > { %v660_v24 = vadd.f32 %v1195_v33, %v659_v22  ;;  %v583_v28 = vadd.f32 %v1195_v33, %v582_v26 }
  0xdf   : > { %v718_v29 = vmax.f32 %v620_v23, 0.0  ;;  %v687_v31 = vmax.f32 %v543_v27, 0.0 }
  0xe0   : > { %v734_v30 = vmax.f32 %v660_v24, 0.0  ;;  %v703_v32 = vmax.f32 %v583_v28, 0.0 }
  0xe1   : > { %782 = vst [vmem:[%s1203_s26 + $0x148] sm:$0xff] %v718_v29 }
  0xe2   : > { %798 = vst [vmem:[%s1203_s26 + $0x1c8] sm:$0xff] %v734_v30 }
  0xe3   : > { %751 = vst [vmem:[%s1203_s26 + $0x50] sm:$0xff] %v687_v31 }
  0xe4   : > { %767 = vst [vmem:[%s1203_s26 + $0xd0] sm:$0xff] %v703_v32  ;;  %v622_v34 = vpop.f32.mrf.mxu2  ;;  %v544_v38 = vpop.f32.mrf.mxu0 }
  0xe5   : > { %v662_v35 = vpop.f32.mrf.mxu3  ;;  %v623_v36 = vadd.f32 %v1195_v33, %v622_v34  ;;  %v584_v39 = vpop.f32.mrf.mxu1  ;;  %v545_v40 = vadd.f32 %v1195_v33, %v544_v38 }
  0xe6   : > { %v663_v37 = vadd.f32 %v1195_v33, %v662_v35  ;;  %v585_v41 = vadd.f32 %v1195_v33, %v584_v39 }
  0xe7   : > { %v719_v42 = vmax.f32 %v623_v36, 0.0  ;;  %v688_v44 = vmax.f32 %v545_v40, 0.0 }
  0xe8   : > { %v735_v43 = vmax.f32 %v663_v37, 0.0  ;;  %v704_v45 = vmax.f32 %v585_v41, 0.0 }
  0xe9   : > { %783 = vst [vmem:[%s1203_s26 + $0x150] sm:$0xff] %v719_v42 }
  0xea   : > { %799 = vst [vmem:[%s1203_s26 + $0x1d0] sm:$0xff] %v735_v43 }
  0xeb   : > { %752 = vst [vmem:[%s1203_s26 + $0x58] sm:$0xff] %v688_v44 }
  0xec   : > { %768 = vst [vmem:[%s1203_s26 + $0xd8] sm:$0xff] %v704_v45  ;;  %v624_v46 = vpop.f32.mrf.mxu2  ;;  %v547_v50 = vpop.f32.mrf.mxu0 }
  0xed   : > { %v664_v47 = vpop.f32.mrf.mxu3  ;;  %v625_v48 = vadd.f32 %v1195_v33, %v624_v46  ;;  %v587_v51 = vpop.f32.mrf.mxu1  ;;  %v548_v52 = vadd.f32 %v1195_v33, %v547_v50 }
  0xee   : > { %v665_v49 = vadd.f32 %v1195_v33, %v664_v47  ;;  %v588_v53 = vadd.f32 %v1195_v33, %v587_v51 }
  0xef   : > { %v720_v54 = vmax.f32 %v625_v48, 0.0  ;;  %v689_v56 = vmax.f32 %v548_v52, 0.0 }
  0xf0   : > { %v736_v55 = vmax.f32 %v665_v49, 0.0  ;;  %v705_v57 = vmax.f32 %v588_v53, 0.0 }
  0xf1   : > { %784 = vst [vmem:[%s1203_s26 + $0x158] sm:$0xff] %v720_v54 }
  0xf2   : > { %800 = vst [vmem:[%s1203_s26 + $0x1d8] sm:$0xff] %v736_v55 }
  0xf3   : > { %753 = vst [vmem:[%s1203_s26 + $0x60] sm:$0xff] %v689_v56 }
  0xf4   : > { %769 = vst [vmem:[%s1203_s26 + $0xe0] sm:$0xff] %v705_v57  ;;  %v627_v58 = vpop.f32.mrf.mxu2  ;;  %v549_v62 = vpop.f32.mrf.mxu0 }
  0xf5   : > { %v667_v59 = vpop.f32.mrf.mxu3  ;;  %v628_v60 = vadd.f32 %v1195_v33, %v627_v58  ;;  %v589_v63 = vpop.f32.mrf.mxu1  ;;  %v550_v0 = vadd.f32 %v1195_v33, %v549_v62 }
  0xf6   : > { %v668_v61 = vadd.f32 %v1195_v33, %v667_v59  ;;  %v590_v1 = vadd.f32 %v1195_v33, %v589_v63 }
  0xf7   : > { %v721_v2 = vmax.f32 %v628_v60, 0.0  ;;  %v690_v4 = vmax.f32 %v550_v0, 0.0 }
  0xf8   : > { %v737_v3 = vmax.f32 %v668_v61, 0.0  ;;  %v706_v5 = vmax.f32 %v590_v1, 0.0 }
  0xf9   : > { %785 = vst [vmem:[%s1203_s26 + $0x160] sm:$0xff] %v721_v2 }
  0xfa   : > { %801 = vst [vmem:[%s1203_s26 + $0x1e0] sm:$0xff] %v737_v3 }
  0xfb   : > { %754 = vst [vmem:[%s1203_s26 + $0x68] sm:$0xff] %v690_v4 }
  0xfc   : > { %770 = vst [vmem:[%s1203_s26 + $0xe8] sm:$0xff] %v706_v5  ;;  %v629_v6 = vpop.f32.mrf.mxu2  ;;  %v552_v10 = vpop.f32.mrf.mxu0 }
  0xfd   : > { %v669_v7 = vpop.f32.mrf.mxu3  ;;  %v630_v8 = vadd.f32 %v1195_v33, %v629_v6  ;;  %v592_v11 = vpop.f32.mrf.mxu1  ;;  %v553_v12 = vadd.f32 %v1195_v33, %v552_v10 }
  0xfe   : > { %v670_v9 = vadd.f32 %v1195_v33, %v669_v7  ;;  %v593_v13 = vadd.f32 %v1195_v33, %v592_v11 }
  0xff   : > { %v722_v14 = vmax.f32 %v630_v8, 0.0  ;;  %v691_v16 = vmax.f32 %v553_v12, 0.0 }
 0x100   : > { %v738_v15 = vmax.f32 %v670_v9, 0.0  ;;  %v707_v17 = vmax.f32 %v593_v13, 0.0 }
 0x101   : > { %786 = vst [vmem:[%s1203_s26 + $0x168] sm:$0xff] %v722_v14 }
 0x102   : > { %802 = vst [vmem:[%s1203_s26 + $0x1e8] sm:$0xff] %v738_v15 }
 0x103   : > { %755 = vst [vmem:[%s1203_s26 + $0x70] sm:$0xff] %v691_v16 }
 0x104   : > { %771 = vst [vmem:[%s1203_s26 + $0xf0] sm:$0xff] %v707_v17  ;;  %v632_v18 = vpop.f32.mrf.mxu2  ;;  %v554_v22 = vpop.f32.mrf.mxu0 }
 0x105   : > { %v672_v19 = vpop.f32.mrf.mxu3  ;;  %v633_v20 = vadd.f32 %v1195_v33, %v632_v18  ;;  %v594_v23 = vpop.f32.mrf.mxu1  ;;  %v555_v24 = vadd.f32 %v1195_v33, %v554_v22 }
 0x106   : > { %v673_v21 = vadd.f32 %v1195_v33, %v672_v19  ;;  %v595_v25 = vadd.f32 %v1195_v33, %v594_v23 }
 0x107   : > { %v723_v26 = vmax.f32 %v633_v20, 0.0  ;;  %v692_v28 = vmax.f32 %v555_v24, 0.0 }
 0x108   : > { %v739_v27 = vmax.f32 %v673_v21, 0.0  ;;  %v708_v29 = vmax.f32 %v595_v25, 0.0 }
 0x109   : > { %787 = vst [vmem:[%s1203_s26 + $0x170] sm:$0xff] %v723_v26 }
 0x10a   : > { %803 = vst [vmem:[%s1203_s26 + $0x1f0] sm:$0xff] %v739_v27 }
 0x10b   : > { %756 = vst [vmem:[%s1203_s26 + $0x78] sm:$0xff] %v692_v28 }
 0x10c   : > { %772 = vst [vmem:[%s1203_s26 + $0xf8] sm:$0xff] %v708_v29  ;;  %v634_v30 = vpop.f32.mrf.mxu2 }
 0x10d   : > { %v674_v31 = vpop.f32.mrf.mxu3  ;;  %v635_v32 = vadd.f32 %v1195_v33, %v634_v30 }
 0x10e   : > { %v675_v34 = vadd.f32 %v1195_v33, %v674_v31 }
 0x10f   : > { %v724_v35 = vmax.f32 %v635_v32, 0.0 }
 0x110   : > { %v740_v36 = vmax.f32 %v675_v34, 0.0 }
 0x111   : > { %788 = vst [vmem:[%s1203_s26 + $0x178] sm:$0xff] %v724_v35 }
 0x112   : > { %804 = vst [vmem:[%s1203_s26 + $0x1f8] sm:$0xff] %v740_v36 }
 0x113 PF: > { %s13_s12 = sadd.s32 1, %s1087_s12  }
 0x114   : > { %p10_p4 = scmp.ge.s32.totalorder %s13_s12, 11  }
 0x116   :  { %12 = sbr.rel (!%p10_p4) target bundleno = 1 (0x1), region = 62 }

// kernel: peleenet_forward.22
= control target key start
LH: loop header
LB: loop body
LE: loop exit
PB: predicated region body
PF: predicated region fallthrough
CT: control target
= control target key end

     0   :  { %s971_s12 = smov 0   ;;  %s1160_s0 = inlined_call_operand.vmem [shape: bf16[1152,80], index: 0, kind: input, shape index: {}]   ;;  %s1161_s1 = inlined_call_operand.vmem [shape: bf16[80,128], index: 1, kind: input, shape index: {}]   ;;  %s1162_s2 = inlined_call_operand.vmem [shape: f32[1,128], index: 2, kind: input, shape index: {}]   ;;  %s1163_s3 = inlined_call_operand.vmem [shape: f32[1152,128], index: 3, kind: output, shape index: {}]  }
   0x1 LB: > { %s741_s13 = sadd.s32 4294967295, %s949_s12   ;;  %p745_p0 = scmp.ge.s32.totalorder %s949_s12, 1  ;;  %s949_s12 = sphi %s971_s12, %s13_s12  }
   0x2   : > { %p138_p1 = scmp.lt.s32.totalorder %s949_s12, 4 }
   0x4   : > { %p139_p2 = pnand %p745_p0, %p138_p1 }
   0x5   : > { %s162_s16 = smul.u32 (!%p139_p2), 48, %s741_s13 }
   0x6   : > { %142 = sbr.rel (%p139_p2) target bundleno = 258 (0x102), region = 32 }
   0x7   : > { %p163_p3 = scmp.lt.s32.totalorder (!%p139_p2), %s162_s16, 143 }
   0xb   : > { %v918_v0 = vld [vmem:[%s1161_s1 + $0x20] sm:$0xff]  ;;  %v917_v1 = vld [vmem:[%s1161_s1 + $0x18] sm:$0xff]  ;;  %v916_v2 = vld [vmem:[%s1161_s1 + $0x10] sm:$0xff]  ;;  %s1165_s16 = smov (!%p163_p3, %s162_s16), 143  ;;  %vm387_vm0 = vcmask 654336  }
   0xc   : > { %463 = vmatpush.bf16.msra.mxu0 %v918_v0  ;;  %919 = vmatpush.bf16.msra.mxu1 %v918_v0  ;;  %v915_v3 = vld [vmem:[%s1161_s1 + $0x8] sm:$0xff]  ;;  %s746_s23 = sshll.u32 %s1165_s16, 2  ;;  %v914_v4 = vld [vmem:[%s1161_s1] sm:$0xff]  ;;  %s747_s4 = sshll.u32 %s1165_s16, 3 }
   0xd   : > { %920 = vmatpush.bf16.msra.mxu2 %v918_v0  ;;  %921 = vmatpush.bf16.msra.mxu3 %v918_v0  ;;  %s1000_s28 = scalar_lea.vmem %s1160_s0, %s746_s23  ;;  %v1053_v29 = vld [vmem:[%s1162_s2] ss:$0 sm:$0xff]  ;;  %s1061_s7 = scalar_lea.vmem %s1163_s3, %s747_s4 }
   0xe   : > { %v890_v5 = vld [vmem:[%s1000_s28] sm:$0xff]  ;;  %v896_v6 = vld [vmem:[%s1000_s28 + $0x30] sm:$0xff]  ;;  %v891_v9 = vld [vmem:[%s1000_s28 + $0x8] sm:$0xff] }
   0xf   : > { %v902_v7 = vld [vmem:[%s1000_s28 + $0x60] sm:$0xff]  ;;  %v908_v8 = vld [vmem:[%s1000_s28 + $0x90] sm:$0xff]  ;;  %v897_v10 = vld [vmem:[%s1000_s28 + $0x38] sm:$0xff] }
  0x10   : > { %464 = vmatpush.bf16.msra.mxu0 %v917_v1  ;;  %922 = vmatpush.bf16.msra.mxu1 %v917_v1  ;;  %v903_v11 = vld [vmem:[%s1000_s28 + $0x68] sm:$0xff]  ;;  %v909_v12 = vld [vmem:[%s1000_s28 + $0x98] sm:$0xff]  ;;  %v892_v13 = vld [vmem:[%s1000_s28 + $0x10] sm:$0xff] }
  0x11   : > { %923 = vmatpush.bf16.msra.mxu2 %v917_v1  ;;  %924 = vmatpush.bf16.msra.mxu3 %v917_v1  ;;  %v898_v14 = vld [vmem:[%s1000_s28 + $0x40] sm:$0xff]  ;;  %v904_v15 = vld [vmem:[%s1000_s28 + $0x70] sm:$0xff]  ;;  %v893_v17 = vld [vmem:[%s1000_s28 + $0x18] sm:$0xff] }
  0x12   : > { %v910_v16 = vld [vmem:[%s1000_s28 + $0xa0] sm:$0xff]  ;;  %v899_v18 = vld [vmem:[%s1000_s28 + $0x48] sm:$0xff]  ;;  %v905_v19 = vld [vmem:[%s1000_s28 + $0x78] sm:$0xff] }
  0x13   : > { %v911_v20 = vld [vmem:[%s1000_s28 + $0xa8] sm:$0xff]  ;;  %v894_v21 = vld [vmem:[%s1000_s28 + $0x20] sm:$0xff]  ;;  %v900_v22 = vld [vmem:[%s1000_s28 + $0x50] sm:$0xff] }
  0x14   : > { %465 = vmatpush.bf16.msra.mxu0 %v916_v2  ;;  %925 = vmatpush.bf16.msra.mxu1 %v916_v2  ;;  %v906_v23 = vld [vmem:[%s1000_s28 + $0x80] sm:$0xff]  ;;  %v912_v24 = vld [vmem:[%s1000_s28 + $0xb0] sm:$0xff]  ;;  %v895_v25 = vld [vmem:[%s1000_s28 + $0x28] sm:$0xff] }
  0x15   : > { %926 = vmatpush.bf16.msra.mxu2 %v916_v2  ;;  %927 = vmatpush.bf16.msra.mxu3 %v916_v2  ;;  %v901_v26 = vld [vmem:[%s1000_s28 + $0x58] sm:$0xff]  ;;  %v907_v27 = vld [vmem:[%s1000_s28 + $0x88] sm:$0xff] }
  0x16   : > { %v913_v28 = vld [vmem:[%s1000_s28 + $0xb8] sm:$0xff] }
  0x18   : > { %466 = vmatpush.bf16.msra.mxu0 %v915_v3  ;;  %928 = vmatpush.bf16.msra.mxu1 %v915_v3 }
  0x19   : > { %929 = vmatpush.bf16.msra.mxu2 %v915_v3  ;;  %930 = vmatpush.bf16.msra.mxu3 %v915_v3 }
  0x1c   : > { %467 = vmatpush.bf16.msra.mxu0 %v914_v4  ;;  %931 = vmatpush.bf16.msra.mxu1 %v914_v4 }
  0x1d   : > { %932 = vmatpush.bf16.msra.mxu2 %v914_v4  ;;  %933 = vmatpush.bf16.msra.mxu3 %v914_v4 }
  0x1f   : > { %864 = vmatmul.msk.bf16.vlgmr.msra.gmra.mxu0 %vm387_vm0, %v890_v5  ;;  %870 = vmatmul.msk.bf16.vlgmr.msra.gmra.mxu1 %vm387_vm0, %v896_v6 }
  0x20   : > { %876 = vmatmul.msk.bf16.vlgmr.msra.gmra.mxu2 %vm387_vm0, %v902_v7  ;;  %882 = vmatmul.msk.bf16.vlgmr.msra.gmra.mxu3 %vm387_vm0, %v908_v8 }
  0x2f   : > { %865 = vmatmul.msk.bf16.gmra.mxu0 %vm387_vm0, %v891_v9  ;;  %871 = vmatmul.msk.bf16.gmra.mxu1 %vm387_vm0, %v897_v10 }
  0x30   : > { %877 = vmatmul.msk.bf16.gmra.mxu2 %vm387_vm0, %v903_v11  ;;  %883 = vmatmul.msk.bf16.gmra.mxu3 %vm387_vm0, %v909_v12 }
  0x3f   : > { %866 = vmatmul.msk.bf16.gmra.mxu0 %vm387_vm0, %v892_v13  ;;  %872 = vmatmul.msk.bf16.gmra.mxu1 %vm387_vm0, %v898_v14 }
  0x40   : > { %878 = vmatmul.msk.bf16.gmra.mxu2 %vm387_vm0, %v904_v15  ;;  %884 = vmatmul.msk.bf16.gmra.mxu3 %vm387_vm0, %v910_v16 }
  0x4f   : > { %867 = vmatmul.msk.bf16.gmra.mxu0 %vm387_vm0, %v893_v17  ;;  %873 = vmatmul.msk.bf16.gmra.mxu1 %vm387_vm0, %v899_v18 }
  0x50   : > { %879 = vmatmul.msk.bf16.gmra.mxu2 %vm387_vm0, %v905_v19  ;;  %885 = vmatmul.msk.bf16.gmra.mxu3 %vm387_vm0, %v911_v20 }
  0x5f   : > { %868 = vmatmul.msk.bf16.gmra.mxu0 %vm387_vm0, %v894_v21  ;;  %874 = vmatmul.msk.bf16.gmra.mxu1 %vm387_vm0, %v900_v22 }
  0x60   : > { %880 = vmatmul.msk.bf16.gmra.mxu2 %vm387_vm0, %v906_v23  ;;  %886 = vmatmul.msk.bf16.gmra.mxu3 %vm387_vm0, %v912_v24 }
  0x6f   : > { %869 = vmatmul.msk.bf16.gmra.mxu0 %vm387_vm0, %v895_v25  ;;  %875 = vmatmul.msk.bf16.gmra.mxu1 %vm387_vm0, %v901_v26 }
  0x70   : > { %881 = vmatmul.msk.bf16.gmra.mxu2 %vm387_vm0, %v907_v27  ;;  %887 = vmatmul.msk.bf16.gmra.mxu3 %vm387_vm0, %v913_v28 }
  0x9c   : > { %v469_v30 = vpop.f32.mrf.mxu0  ;;  %v499_v31 = vpop.f32.mrf.mxu1 }
  0x9d   : > { %v470_v32 = vadd.f32 %v1053_v29, %v469_v30  ;;  %v500_v33 = vadd.f32 %v1053_v29, %v499_v31 }
  0x9f   : > { %v589_v34 = vmax.f32 %v470_v32, 0.0  ;;  %v601_v35 = vmax.f32 %v500_v33, 0.0 }
  0xa1   : > { %637 = vst [vmem:[%s1061_s7] sm:$0xff] %v589_v34 }
  0xa2   : > { %649 = vst [vmem:[%s1061_s7 + $0x60] sm:$0xff] %v601_v35 }
  0xa3   : > { %v529_v36 = vpop.f32.mrf.mxu2  ;;  %v559_v37 = vpop.f32.mrf.mxu3 }
  0xa4   : > { %v530_v38 = vadd.f32 %v1053_v29, %v529_v36  ;;  %v560_v39 = vadd.f32 %v1053_v29, %v559_v37  ;;  %v471_v40 = vpop.f32.mrf.mxu0  ;;  %v501_v41 = vpop.f32.mrf.mxu1 }
  0xa5   : > { %v472_v42 = vadd.f32 %v1053_v29, %v471_v40  ;;  %v502_v43 = vadd.f32 %v1053_v29, %v501_v41 }
  0xa6   : > { %v613_v44 = vmax.f32 %v530_v38, 0.0  ;;  %v625_v45 = vmax.f32 %v560_v39, 0.0 }
  0xa7   : > { %v590_v46 = vmax.f32 %v472_v42, 0.0  ;;  %v602_v47 = vmax.f32 %v502_v43, 0.0 }
  0xa8   : > { %661 = vst [vmem:[%s1061_s7 + $0xc0] sm:$0xff] %v613_v44 }
  0xa9   : > { %673 = vst [vmem:[%s1061_s7 + $0x120] sm:$0xff] %v625_v45 }
  0xaa   : > { %638 = vst [vmem:[%s1061_s7 + $0x8] sm:$0xff] %v590_v46 }
  0xab   : > { %650 = vst [vmem:[%s1061_s7 + $0x68] sm:$0xff] %v602_v47  ;;  %v531_v48 = vpop.f32.mrf.mxu2  ;;  %v561_v49 = vpop.f32.mrf.mxu3 }
  0xac   : > { %v532_v50 = vadd.f32 %v1053_v29, %v531_v48  ;;  %v562_v51 = vadd.f32 %v1053_v29, %v561_v49  ;;  %v474_v52 = vpop.f32.mrf.mxu0  ;;  %v504_v53 = vpop.f32.mrf.mxu1 }
  0xad   : > { %v475_v54 = vadd.f32 %v1053_v29, %v474_v52  ;;  %v505_v55 = vadd.f32 %v1053_v29, %v504_v53 }
  0xae   : > { %v614_v56 = vmax.f32 %v532_v50, 0.0  ;;  %v626_v57 = vmax.f32 %v562_v51, 0.0 }
  0xaf   : > { %v591_v58 = vmax.f32 %v475_v54, 0.0  ;;  %v603_v59 = vmax.f32 %v505_v55, 0.0 }
  0xb0   : > { %662 = vst [vmem:[%s1061_s7 + $0xc8] sm:$0xff] %v614_v56 }
  0xb1   : > { %674 = vst [vmem:[%s1061_s7 + $0x128] sm:$0xff] %v626_v57 }
  0xb2   : > { %639 = vst [vmem:[%s1061_s7 + $0x10] sm:$0xff] %v591_v58 }
  0xb3   : > { %651 = vst [vmem:[%s1061_s7 + $0x70] sm:$0xff] %v603_v59  ;;  %v534_v60 = vpop.f32.mrf.mxu2  ;;  %v564_v61 = vpop.f32.mrf.mxu3 }
  0xb4   : > { %v535_v62 = vadd.f32 %v1053_v29, %v534_v60  ;;  %v565_v63 = vadd.f32 %v1053_v29, %v564_v61  ;;  %v476_v0 = vpop.f32.mrf.mxu0  ;;  %v506_v1 = vpop.f32.mrf.mxu1 }
  0xb5   : > { %v477_v2 = vadd.f32 %v1053_v29, %v476_v0  ;;  %v507_v3 = vadd.f32 %v1053_v29, %v506_v1 }
  0xb6   : > { %v615_v4 = vmax.f32 %v535_v62, 0.0  ;;  %v627_v5 = vmax.f32 %v565_v63, 0.0 }
  0xb7   : > { %v592_v6 = vmax.f32 %v477_v2, 0.0  ;;  %v604_v7 = vmax.f32 %v507_v3, 0.0 }
  0xb8   : > { %663 = vst [vmem:[%s1061_s7 + $0xd0] sm:$0xff] %v615_v4 }
  0xb9   : > { %675 = vst [vmem:[%s1061_s7 + $0x130] sm:$0xff] %v627_v5 }
  0xba   : > { %640 = vst [vmem:[%s1061_s7 + $0x18] sm:$0xff] %v592_v6 }
  0xbb   : > { %652 = vst [vmem:[%s1061_s7 + $0x78] sm:$0xff] %v604_v7  ;;  %v536_v8 = vpop.f32.mrf.mxu2  ;;  %v566_v9 = vpop.f32.mrf.mxu3 }
  0xbc   : > { %v537_v10 = vadd.f32 %v1053_v29, %v536_v8  ;;  %v567_v11 = vadd.f32 %v1053_v29, %v566_v9  ;;  %v479_v12 = vpop.f32.mrf.mxu0  ;;  %v509_v13 = vpop.f32.mrf.mxu1 }
  0xbd   : > { %v480_v14 = vadd.f32 %v1053_v29, %v479_v12  ;;  %v510_v15 = vadd.f32 %v1053_v29, %v509_v13 }
  0xbe   : > { %v616_v16 = vmax.f32 %v537_v10, 0.0  ;;  %v628_v17 = vmax.f32 %v567_v11, 0.0 }
  0xbf   : > { %v593_v18 = vmax.f32 %v480_v14, 0.0  ;;  %v605_v19 = vmax.f32 %v510_v15, 0.0 }
  0xc0   : > { %664 = vst [vmem:[%s1061_s7 + $0xd8] sm:$0xff] %v616_v16 }
  0xc1   : > { %676 = vst [vmem:[%s1061_s7 + $0x138] sm:$0xff] %v628_v17 }
  0xc2   : > { %641 = vst [vmem:[%s1061_s7 + $0x20] sm:$0xff] %v593_v18 }
  0xc3   : > { %653 = vst [vmem:[%s1061_s7 + $0x80] sm:$0xff] %v605_v19  ;;  %v539_v20 = vpop.f32.mrf.mxu2  ;;  %v569_v21 = vpop.f32.mrf.mxu3 }
  0xc4   : > { %v540_v22 = vadd.f32 %v1053_v29, %v539_v20  ;;  %v570_v23 = vadd.f32 %v1053_v29, %v569_v21  ;;  %v481_v24 = vpop.f32.mrf.mxu0  ;;  %v511_v25 = vpop.f32.mrf.mxu1 }
  0xc5   : > { %v482_v26 = vadd.f32 %v1053_v29, %v481_v24  ;;  %v512_v27 = vadd.f32 %v1053_v29, %v511_v25 }
  0xc6   : > { %v617_v28 = vmax.f32 %v540_v22, 0.0  ;;  %v629_v30 = vmax.f32 %v570_v23, 0.0 }
  0xc7   : > { %v594_v31 = vmax.f32 %v482_v26, 0.0  ;;  %v606_v32 = vmax.f32 %v512_v27, 0.0 }
  0xc8   : > { %665 = vst [vmem:[%s1061_s7 + $0xe0] sm:$0xff] %v617_v28 }
  0xc9   : > { %677 = vst [vmem:[%s1061_s7 + $0x140] sm:$0xff] %v629_v30 }
  0xca   : > { %642 = vst [vmem:[%s1061_s7 + $0x28] sm:$0xff] %v594_v31 }
  0xcb   : > { %654 = vst [vmem:[%s1061_s7 + $0x88] sm:$0xff] %v606_v32  ;;  %v541_v33 = vpop.f32.mrf.mxu2  ;;  %v571_v34 = vpop.f32.mrf.mxu3 }
  0xcc   : > { %v542_v35 = vadd.f32 %v1053_v29, %v541_v33  ;;  %v572_v36 = vadd.f32 %v1053_v29, %v571_v34  ;;  %v484_v37 = vpop.f32.mrf.mxu0  ;;  %v514_v38 = vpop.f32.mrf.mxu1 }
  0xcd   : > { %v485_v39 = vadd.f32 %v1053_v29, %v484_v37  ;;  %v515_v40 = vadd.f32 %v1053_v29, %v514_v38 }
  0xce   : > { %v618_v41 = vmax.f32 %v542_v35, 0.0  ;;  %v630_v42 = vmax.f32 %v572_v36, 0.0 }
  0xcf   : > { %v595_v43 = vmax.f32 %v485_v39, 0.0  ;;  %v607_v44 = vmax.f32 %v515_v40, 0.0 }
  0xd0   : > { %666 = vst [vmem:[%s1061_s7 + $0xe8] sm:$0xff] %v618_v41 }
  0xd1   : > { %678 = vst [vmem:[%s1061_s7 + $0x148] sm:$0xff] %v630_v42 }
  0xd2   : > { %643 = vst [vmem:[%s1061_s7 + $0x30] sm:$0xff] %v595_v43 }
  0xd3   : > { %655 = vst [vmem:[%s1061_s7 + $0x90] sm:$0xff] %v607_v44  ;;  %v544_v45 = vpop.f32.mrf.mxu2  ;;  %v574_v46 = vpop.f32.mrf.mxu3 }
  0xd4   : > { %v545_v47 = vadd.f32 %v1053_v29, %v544_v45  ;;  %v575_v48 = vadd.f32 %v1053_v29, %v574_v46  ;;  %v486_v49 = vpop.f32.mrf.mxu0  ;;  %v516_v50 = vpop.f32.mrf.mxu1 }
  0xd5   : > { %v487_v51 = vadd.f32 %v1053_v29, %v486_v49  ;;  %v517_v52 = vadd.f32 %v1053_v29, %v516_v50 }
  0xd6   : > { %v619_v53 = vmax.f32 %v545_v47, 0.0  ;;  %v631_v54 = vmax.f32 %v575_v48, 0.0 }
  0xd7   : > { %v596_v55 = vmax.f32 %v487_v51, 0.0  ;;  %v608_v56 = vmax.f32 %v517_v52, 0.0 }
  0xd8   : > { %667 = vst [vmem:[%s1061_s7 + $0xf0] sm:$0xff] %v619_v53 }
  0xd9   : > { %679 = vst [vmem:[%s1061_s7 + $0x150] sm:$0xff] %v631_v54 }
  0xda   : > { %644 = vst [vmem:[%s1061_s7 + $0x38] sm:$0xff] %v596_v55 }
  0xdb   : > { %656 = vst [vmem:[%s1061_s7 + $0x98] sm:$0xff] %v608_v56  ;;  %v546_v57 = vpop.f32.mrf.mxu2  ;;  %v576_v58 = vpop.f32.mrf.mxu3 }
  0xdc   : > { %v547_v59 = vadd.f32 %v1053_v29, %v546_v57  ;;  %v577_v60 = vadd.f32 %v1053_v29, %v576_v58  ;;  %v489_v61 = vpop.f32.mrf.mxu0  ;;  %v519_v62 = vpop.f32.mrf.mxu1 }
  0xdd   : > { %v490_v63 = vadd.f32 %v1053_v29, %v489_v61  ;;  %v520_v0 = vadd.f32 %v1053_v29, %v519_v62 }
  0xde   : > { %v620_v1 = vmax.f32 %v547_v59, 0.0  ;;  %v632_v2 = vmax.f32 %v577_v60, 0.0 }
  0xdf   : > { %v597_v3 = vmax.f32 %v490_v63, 0.0  ;;  %v609_v4 = vmax.f32 %v520_v0, 0.0 }
  0xe0   : > { %668 = vst [vmem:[%s1061_s7 + $0xf8] sm:$0xff] %v620_v1 }
  0xe1   : > { %680 = vst [vmem:[%s1061_s7 + $0x158] sm:$0xff] %v632_v2 }
  0xe2   : > { %645 = vst [vmem:[%s1061_s7 + $0x40] sm:$0xff] %v597_v3 }
  0xe3   : > { %657 = vst [vmem:[%s1061_s7 + $0xa0] sm:$0xff] %v609_v4  ;;  %v549_v5 = vpop.f32.mrf.mxu2  ;;  %v579_v6 = vpop.f32.mrf.mxu3 }
  0xe4   : > { %v550_v7 = vadd.f32 %v1053_v29, %v549_v5  ;;  %v580_v8 = vadd.f32 %v1053_v29, %v579_v6  ;;  %v491_v9 = vpop.f32.mrf.mxu0  ;;  %v521_v10 = vpop.f32.mrf.mxu1 }
  0xe5   : > { %v492_v11 = vadd.f32 %v1053_v29, %v491_v9  ;;  %v522_v12 = vadd.f32 %v1053_v29, %v521_v10 }
  0xe6   : > { %v621_v13 = vmax.f32 %v550_v7, 0.0  ;;  %v633_v14 = vmax.f32 %v580_v8, 0.0 }
  0xe7   : > { %v598_v15 = vmax.f32 %v492_v11, 0.0  ;;  %v610_v16 = vmax.f32 %v522_v12, 0.0 }
  0xe8   : > { %669 = vst [vmem:[%s1061_s7 + $0x100] sm:$0xff] %v621_v13 }
  0xe9   : > { %681 = vst [vmem:[%s1061_s7 + $0x160] sm:$0xff] %v633_v14 }
  0xea   : > { %646 = vst [vmem:[%s1061_s7 + $0x48] sm:$0xff] %v598_v15 }
  0xeb   : > { %658 = vst [vmem:[%s1061_s7 + $0xa8] sm:$0xff] %v610_v16  ;;  %v551_v17 = vpop.f32.mrf.mxu2  ;;  %v581_v18 = vpop.f32.mrf.mxu3 }
  0xec   : > { %v552_v19 = vadd.f32 %v1053_v29, %v551_v17  ;;  %v582_v20 = vadd.f32 %v1053_v29, %v581_v18  ;;  %v494_v21 = vpop.f32.mrf.mxu0  ;;  %v524_v22 = vpop.f32.mrf.mxu1 }
  0xed   : > { %v495_v23 = vadd.f32 %v1053_v29, %v494_v21  ;;  %v525_v24 = vadd.f32 %v1053_v29, %v524_v22 }
  0xee   : > { %v622_v25 = vmax.f32 %v552_v19, 0.0  ;;  %v634_v26 = vmax.f32 %v582_v20, 0.0 }
  0xef   : > { %v599_v27 = vmax.f32 %v495_v23, 0.0  ;;  %v611_v28 = vmax.f32 %v525_v24, 0.0 }
  0xf0   : > { %670 = vst [vmem:[%s1061_s7 + $0x108] sm:$0xff] %v622_v25 }
  0xf1   : > { %682 = vst [vmem:[%s1061_s7 + $0x168] sm:$0xff] %v634_v26 }
  0xf2   : > { %647 = vst [vmem:[%s1061_s7 + $0x50] sm:$0xff] %v599_v27 }
  0xf3   : > { %659 = vst [vmem:[%s1061_s7 + $0xb0] sm:$0xff] %v611_v28  ;;  %v554_v30 = vpop.f32.mrf.mxu2  ;;  %v584_v31 = vpop.f32.mrf.mxu3 }
  0xf4   : > { %v555_v32 = vadd.f32 %v1053_v29, %v554_v30  ;;  %v585_v33 = vadd.f32 %v1053_v29, %v584_v31  ;;  %v496_v34 = vpop.f32.mrf.mxu0  ;;  %v526_v35 = vpop.f32.mrf.mxu1 }
  0xf5   : > { %v497_v36 = vadd.f32 %v1053_v29, %v496_v34  ;;  %v527_v37 = vadd.f32 %v1053_v29, %v526_v35 }
  0xf6   : > { %v623_v38 = vmax.f32 %v555_v32, 0.0  ;;  %v635_v39 = vmax.f32 %v585_v33, 0.0 }
  0xf7   : > { %v600_v40 = vmax.f32 %v497_v36, 0.0  ;;  %v612_v41 = vmax.f32 %v527_v37, 0.0 }
  0xf8   : > { %671 = vst [vmem:[%s1061_s7 + $0x110] sm:$0xff] %v623_v38 }
  0xf9   : > { %683 = vst [vmem:[%s1061_s7 + $0x170] sm:$0xff] %v635_v39 }
  0xfa   : > { %648 = vst [vmem:[%s1061_s7 + $0x58] sm:$0xff] %v600_v40 }
  0xfb   : > { %660 = vst [vmem:[%s1061_s7 + $0xb8] sm:$0xff] %v612_v41  ;;  %v556_v42 = vpop.f32.mrf.mxu2  ;;  %v586_v43 = vpop.f32.mrf.mxu3 }
  0xfc   : > { %v557_v44 = vadd.f32 %v1053_v29, %v556_v42  ;;  %v587_v45 = vadd.f32 %v1053_v29, %v586_v43 }
  0xfe   : > { %v624_v46 = vmax.f32 %v557_v44, 0.0  ;;  %v636_v47 = vmax.f32 %v587_v45, 0.0 }
 0x100   : > { %672 = vst [vmem:[%s1061_s7 + $0x118] sm:$0xff] %v624_v46 }
 0x101   : > { %684 = vst [vmem:[%s1061_s7 + $0x178] sm:$0xff] %v636_v47 }
 0x102 PF: > { %s13_s12 = sadd.s32 1, %s949_s12  }
 0x103   : > { %p10_p4 = scmp.ge.s32.totalorder %s13_s12, 5  }
 0x105   :  { %12 = sbr.rel (!%p10_p4) target bundleno = 1 (0x1), region = 62 }

// kernel: peleenet_forward.23
= control target key start
LH: loop header
LB: loop body
LE: loop exit
PB: predicated region body
PF: predicated region fallthrough
CT: control target
= control target key end

     0   :  { %s923_s12 = smov 0   ;;  %s1103_s0 = inlined_call_operand.vmem [shape: bf16[1152,32], index: 0, kind: input, shape index: {}]   ;;  %s1104_s1 = inlined_call_operand.vmem [shape: bf16[32,128], index: 1, kind: input, shape index: {}]   ;;  %s1105_s2 = inlined_call_operand.vmem [shape: f32[1,128], index: 2, kind: input, shape index: {}]   ;;  %s1106_s3 = inlined_call_operand.vmem [shape: f32[1152,128], index: 3, kind: output, shape index: {}]  }
   0x1 LB: > { %s717_s13 = sadd.s32 4294967295, %s901_s12   ;;  %p721_p0 = scmp.ge.s32.totalorder %s901_s12, 1  ;;  %s901_s12 = sphi %s923_s12, %s13_s12  }
   0x2   : > { %p138_p1 = scmp.lt.s32.totalorder %s901_s12, 4 }
   0x4   : > { %p139_p2 = pnand %p721_p0, %p138_p1 }
   0x5   : > { %s162_s16 = smul.u32 (!%p139_p2), 48, %s717_s13 }
   0x6   : > { %142 = sbr.rel (%p139_p2) target bundleno = 246 (0xf6), region = 32 }
   0x7   : > { %p163_p3 = scmp.lt.s32.totalorder (!%p139_p2), %s162_s16, 143 }
   0xb   : > { %v879_v0 = vld [vmem:[%s1104_s1 + $0x8] sm:$0xff]  ;;  %v878_v1 = vld [vmem:[%s1104_s1] sm:$0xff]  ;;  %s1108_s16 = smov (!%p163_p3, %s162_s16), 143  ;;  %vm363_vm0 = vcmask 261120  }
   0xc   : > { %442 = vmatpush.bf16.msra.mxu0 %v879_v0  ;;  %880 = vmatpush.bf16.msra.mxu1 %v879_v0  ;;  %s722_s19 = sshll.u32 %s1108_s16, 2  ;;  %v996_v26 = vld [vmem:[%s1105_s2] ss:$0 sm:$0xff]  ;;  %s723_s25 = sshll.u32 %s1108_s16, 3 }
   0xd   : > { %881 = vmatpush.bf16.msra.mxu2 %v879_v0  ;;  %882 = vmatpush.bf16.msra.mxu3 %v879_v0  ;;  %s943_s22 = scalar_lea.vmem %s1103_s0, %s722_s19  ;;  %s1004_s28 = scalar_lea.vmem %s1106_s3, %s723_s25 }
   0xe   : > { %v854_v2 = vld [vmem:[%s943_s22] sm:$0xff]  ;;  %v860_v3 = vld [vmem:[%s943_s22 + $0x30] sm:$0xff]  ;;  %v855_v6 = vld [vmem:[%s943_s22 + $0x8] sm:$0xff] }
   0xf   : > { %v866_v4 = vld [vmem:[%s943_s22 + $0x60] sm:$0xff]  ;;  %v872_v5 = vld [vmem:[%s943_s22 + $0x90] sm:$0xff]  ;;  %v861_v7 = vld [vmem:[%s943_s22 + $0x38] sm:$0xff] }
  0x10   : > { %443 = vmatpush.bf16.msra.mxu0 %v878_v1  ;;  %883 = vmatpush.bf16.msra.mxu1 %v878_v1  ;;  %v867_v8 = vld [vmem:[%s943_s22 + $0x68] sm:$0xff]  ;;  %v873_v9 = vld [vmem:[%s943_s22 + $0x98] sm:$0xff]  ;;  %v856_v10 = vld [vmem:[%s943_s22 + $0x10] sm:$0xff] }
  0x11   : > { %884 = vmatpush.bf16.msra.mxu2 %v878_v1  ;;  %885 = vmatpush.bf16.msra.mxu3 %v878_v1  ;;  %v862_v11 = vld [vmem:[%s943_s22 + $0x40] sm:$0xff]  ;;  %v868_v12 = vld [vmem:[%s943_s22 + $0x70] sm:$0xff]  ;;  %v857_v14 = vld [vmem:[%s943_s22 + $0x18] sm:$0xff] }
  0x12   : > { %v874_v13 = vld [vmem:[%s943_s22 + $0xa0] sm:$0xff]  ;;  %v863_v15 = vld [vmem:[%s943_s22 + $0x48] sm:$0xff]  ;;  %v869_v16 = vld [vmem:[%s943_s22 + $0x78] sm:$0xff] }
  0x13   : > { %828 = vmatmul.msk.bf16.vlgmr.msra.gmra.mxu0 %vm363_vm0, %v854_v2  ;;  %834 = vmatmul.msk.bf16.vlgmr.msra.gmra.mxu1 %vm363_vm0, %v860_v3  ;;  %v875_v17 = vld [vmem:[%s943_s22 + $0xa8] sm:$0xff]  ;;  %v858_v18 = vld [vmem:[%s943_s22 + $0x20] sm:$0xff]  ;;  %v864_v19 = vld [vmem:[%s943_s22 + $0x50] sm:$0xff] }
  0x14   : > { %840 = vmatmul.msk.bf16.vlgmr.msra.gmra.mxu2 %vm363_vm0, %v866_v4  ;;  %846 = vmatmul.msk.bf16.vlgmr.msra.gmra.mxu3 %vm363_vm0, %v872_v5  ;;  %v870_v20 = vld [vmem:[%s943_s22 + $0x80] sm:$0xff]  ;;  %v876_v21 = vld [vmem:[%s943_s22 + $0xb0] sm:$0xff]  ;;  %v859_v22 = vld [vmem:[%s943_s22 + $0x28] sm:$0xff] }
  0x15   : > { %v865_v23 = vld [vmem:[%s943_s22 + $0x58] sm:$0xff]  ;;  %v871_v24 = vld [vmem:[%s943_s22 + $0x88] sm:$0xff] }
  0x16   : > { %v877_v25 = vld [vmem:[%s943_s22 + $0xb8] sm:$0xff] }
  0x23   : > { %829 = vmatmul.msk.bf16.gmra.mxu0 %vm363_vm0, %v855_v6  ;;  %835 = vmatmul.msk.bf16.gmra.mxu1 %vm363_vm0, %v861_v7 }
  0x24   : > { %841 = vmatmul.msk.bf16.gmra.mxu2 %vm363_vm0, %v867_v8  ;;  %847 = vmatmul.msk.bf16.gmra.mxu3 %vm363_vm0, %v873_v9 }
  0x33   : > { %830 = vmatmul.msk.bf16.gmra.mxu0 %vm363_vm0, %v856_v10  ;;  %836 = vmatmul.msk.bf16.gmra.mxu1 %vm363_vm0, %v862_v11 }
  0x34   : > { %842 = vmatmul.msk.bf16.gmra.mxu2 %vm363_vm0, %v868_v12  ;;  %848 = vmatmul.msk.bf16.gmra.mxu3 %vm363_vm0, %v874_v13 }
  0x43   : > { %831 = vmatmul.msk.bf16.gmra.mxu0 %vm363_vm0, %v857_v14  ;;  %837 = vmatmul.msk.bf16.gmra.mxu1 %vm363_vm0, %v863_v15 }
  0x44   : > { %843 = vmatmul.msk.bf16.gmra.mxu2 %vm363_vm0, %v869_v16  ;;  %849 = vmatmul.msk.bf16.gmra.mxu3 %vm363_vm0, %v875_v17 }
  0x53   : > { %832 = vmatmul.msk.bf16.gmra.mxu0 %vm363_vm0, %v858_v18  ;;  %838 = vmatmul.msk.bf16.gmra.mxu1 %vm363_vm0, %v864_v19 }
  0x54   : > { %844 = vmatmul.msk.bf16.gmra.mxu2 %vm363_vm0, %v870_v20  ;;  %850 = vmatmul.msk.bf16.gmra.mxu3 %vm363_vm0, %v876_v21 }
  0x63   : > { %833 = vmatmul.msk.bf16.gmra.mxu0 %vm363_vm0, %v859_v22  ;;  %839 = vmatmul.msk.bf16.gmra.mxu1 %vm363_vm0, %v865_v23 }
  0x64   : > { %845 = vmatmul.msk.bf16.gmra.mxu2 %vm363_vm0, %v871_v24  ;;  %851 = vmatmul.msk.bf16.gmra.mxu3 %vm363_vm0, %v877_v25 }
  0x90   : > { %v445_v27 = vpop.f32.mrf.mxu0  ;;  %v475_v28 = vpop.f32.mrf.mxu1 }
  0x91   : > { %v446_v29 = vadd.f32 %v996_v26, %v445_v27  ;;  %v476_v30 = vadd.f32 %v996_v26, %v475_v28 }
  0x93   : > { %v565_v31 = vmax.f32 %v446_v29, 0.0  ;;  %v577_v32 = vmax.f32 %v476_v30, 0.0 }
  0x95   : > { %613 = vst [vmem:[%s1004_s28] sm:$0xff] %v565_v31 }
  0x96   : > { %625 = vst [vmem:[%s1004_s28 + $0x60] sm:$0xff] %v577_v32 }
  0x97   : > { %v505_v33 = vpop.f32.mrf.mxu2  ;;  %v535_v34 = vpop.f32.mrf.mxu3 }
  0x98   : > { %v506_v35 = vadd.f32 %v996_v26, %v505_v33  ;;  %v536_v36 = vadd.f32 %v996_v26, %v535_v34  ;;  %v447_v37 = vpop.f32.mrf.mxu0  ;;  %v477_v38 = vpop.f32.mrf.mxu1 }
  0x99   : > { %v448_v39 = vadd.f32 %v996_v26, %v447_v37  ;;  %v478_v40 = vadd.f32 %v996_v26, %v477_v38 }
  0x9a   : > { %v589_v41 = vmax.f32 %v506_v35, 0.0  ;;  %v601_v42 = vmax.f32 %v536_v36, 0.0 }
  0x9b   : > { %v566_v43 = vmax.f32 %v448_v39, 0.0  ;;  %v578_v44 = vmax.f32 %v478_v40, 0.0 }
  0x9c   : > { %637 = vst [vmem:[%s1004_s28 + $0xc0] sm:$0xff] %v589_v41 }
  0x9d   : > { %649 = vst [vmem:[%s1004_s28 + $0x120] sm:$0xff] %v601_v42 }
  0x9e   : > { %614 = vst [vmem:[%s1004_s28 + $0x8] sm:$0xff] %v566_v43 }
  0x9f   : > { %626 = vst [vmem:[%s1004_s28 + $0x68] sm:$0xff] %v578_v44  ;;  %v507_v45 = vpop.f32.mrf.mxu2  ;;  %v537_v46 = vpop.f32.mrf.mxu3 }
  0xa0   : > { %v508_v47 = vadd.f32 %v996_v26, %v507_v45  ;;  %v538_v48 = vadd.f32 %v996_v26, %v537_v46  ;;  %v450_v49 = vpop.f32.mrf.mxu0  ;;  %v480_v50 = vpop.f32.mrf.mxu1 }
  0xa1   : > { %v451_v51 = vadd.f32 %v996_v26, %v450_v49  ;;  %v481_v52 = vadd.f32 %v996_v26, %v480_v50 }
  0xa2   : > { %v590_v53 = vmax.f32 %v508_v47, 0.0  ;;  %v602_v54 = vmax.f32 %v538_v48, 0.0 }
  0xa3   : > { %v567_v55 = vmax.f32 %v451_v51, 0.0  ;;  %v579_v56 = vmax.f32 %v481_v52, 0.0 }
  0xa4   : > { %638 = vst [vmem:[%s1004_s28 + $0xc8] sm:$0xff] %v590_v53 }
  0xa5   : > { %650 = vst [vmem:[%s1004_s28 + $0x128] sm:$0xff] %v602_v54 }
  0xa6   : > { %615 = vst [vmem:[%s1004_s28 + $0x10] sm:$0xff] %v567_v55 }
  0xa7   : > { %627 = vst [vmem:[%s1004_s28 + $0x70] sm:$0xff] %v579_v56  ;;  %v510_v57 = vpop.f32.mrf.mxu2  ;;  %v540_v58 = vpop.f32.mrf.mxu3 }
  0xa8   : > { %v511_v59 = vadd.f32 %v996_v26, %v510_v57  ;;  %v541_v60 = vadd.f32 %v996_v26, %v540_v58  ;;  %v452_v61 = vpop.f32.mrf.mxu0  ;;  %v482_v62 = vpop.f32.mrf.mxu1 }
  0xa9   : > { %v453_v63 = vadd.f32 %v996_v26, %v452_v61  ;;  %v483_v0 = vadd.f32 %v996_v26, %v482_v62 }
  0xaa   : > { %v591_v1 = vmax.f32 %v511_v59, 0.0  ;;  %v603_v2 = vmax.f32 %v541_v60, 0.0 }
  0xab   : > { %v568_v3 = vmax.f32 %v453_v63, 0.0  ;;  %v580_v4 = vmax.f32 %v483_v0, 0.0 }
  0xac   : > { %639 = vst [vmem:[%s1004_s28 + $0xd0] sm:$0xff] %v591_v1 }
  0xad   : > { %651 = vst [vmem:[%s1004_s28 + $0x130] sm:$0xff] %v603_v2 }
  0xae   : > { %616 = vst [vmem:[%s1004_s28 + $0x18] sm:$0xff] %v568_v3 }
  0xaf   : > { %628 = vst [vmem:[%s1004_s28 + $0x78] sm:$0xff] %v580_v4  ;;  %v512_v5 = vpop.f32.mrf.mxu2  ;;  %v542_v6 = vpop.f32.mrf.mxu3 }
  0xb0   : > { %v513_v7 = vadd.f32 %v996_v26, %v512_v5  ;;  %v543_v8 = vadd.f32 %v996_v26, %v542_v6  ;;  %v455_v9 = vpop.f32.mrf.mxu0  ;;  %v485_v10 = vpop.f32.mrf.mxu1 }
  0xb1   : > { %v456_v11 = vadd.f32 %v996_v26, %v455_v9  ;;  %v486_v12 = vadd.f32 %v996_v26, %v485_v10 }
  0xb2   : > { %v592_v13 = vmax.f32 %v513_v7, 0.0  ;;  %v604_v14 = vmax.f32 %v543_v8, 0.0 }
  0xb3   : > { %v569_v15 = vmax.f32 %v456_v11, 0.0  ;;  %v581_v16 = vmax.f32 %v486_v12, 0.0 }
  0xb4   : > { %640 = vst [vmem:[%s1004_s28 + $0xd8] sm:$0xff] %v592_v13 }
  0xb5   : > { %652 = vst [vmem:[%s1004_s28 + $0x138] sm:$0xff] %v604_v14 }
  0xb6   : > { %617 = vst [vmem:[%s1004_s28 + $0x20] sm:$0xff] %v569_v15 }
  0xb7   : > { %629 = vst [vmem:[%s1004_s28 + $0x80] sm:$0xff] %v581_v16  ;;  %v515_v17 = vpop.f32.mrf.mxu2  ;;  %v545_v18 = vpop.f32.mrf.mxu3 }
  0xb8   : > { %v516_v19 = vadd.f32 %v996_v26, %v515_v17  ;;  %v546_v20 = vadd.f32 %v996_v26, %v545_v18  ;;  %v457_v21 = vpop.f32.mrf.mxu0  ;;  %v487_v22 = vpop.f32.mrf.mxu1 }
  0xb9   : > { %v458_v23 = vadd.f32 %v996_v26, %v457_v21  ;;  %v488_v24 = vadd.f32 %v996_v26, %v487_v22 }
  0xba   : > { %v593_v25 = vmax.f32 %v516_v19, 0.0  ;;  %v605_v27 = vmax.f32 %v546_v20, 0.0 }
  0xbb   : > { %v570_v28 = vmax.f32 %v458_v23, 0.0  ;;  %v582_v29 = vmax.f32 %v488_v24, 0.0 }
  0xbc   : > { %641 = vst [vmem:[%s1004_s28 + $0xe0] sm:$0xff] %v593_v25 }
  0xbd   : > { %653 = vst [vmem:[%s1004_s28 + $0x140] sm:$0xff] %v605_v27 }
  0xbe   : > { %618 = vst [vmem:[%s1004_s28 + $0x28] sm:$0xff] %v570_v28 }
  0xbf   : > { %630 = vst [vmem:[%s1004_s28 + $0x88] sm:$0xff] %v582_v29  ;;  %v517_v30 = vpop.f32.mrf.mxu2  ;;  %v547_v31 = vpop.f32.mrf.mxu3 }
  0xc0   : > { %v518_v32 = vadd.f32 %v996_v26, %v517_v30  ;;  %v548_v33 = vadd.f32 %v996_v26, %v547_v31  ;;  %v460_v34 = vpop.f32.mrf.mxu0  ;;  %v490_v35 = vpop.f32.mrf.mxu1 }
  0xc1   : > { %v461_v36 = vadd.f32 %v996_v26, %v460_v34  ;;  %v491_v37 = vadd.f32 %v996_v26, %v490_v35 }
  0xc2   : > { %v594_v38 = vmax.f32 %v518_v32, 0.0  ;;  %v606_v39 = vmax.f32 %v548_v33, 0.0 }
  0xc3   : > { %v571_v40 = vmax.f32 %v461_v36, 0.0  ;;  %v583_v41 = vmax.f32 %v491_v37, 0.0 }
  0xc4   : > { %642 = vst [vmem:[%s1004_s28 + $0xe8] sm:$0xff] %v594_v38 }
  0xc5   : > { %654 = vst [vmem:[%s1004_s28 + $0x148] sm:$0xff] %v606_v39 }
  0xc6   : > { %619 = vst [vmem:[%s1004_s28 + $0x30] sm:$0xff] %v571_v40 }
  0xc7   : > { %631 = vst [vmem:[%s1004_s28 + $0x90] sm:$0xff] %v583_v41  ;;  %v520_v42 = vpop.f32.mrf.mxu2  ;;  %v550_v43 = vpop.f32.mrf.mxu3 }
  0xc8   : > { %v521_v44 = vadd.f32 %v996_v26, %v520_v42  ;;  %v551_v45 = vadd.f32 %v996_v26, %v550_v43  ;;  %v462_v46 = vpop.f32.mrf.mxu0  ;;  %v492_v47 = vpop.f32.mrf.mxu1 }
  0xc9   : > { %v463_v48 = vadd.f32 %v996_v26, %v462_v46  ;;  %v493_v49 = vadd.f32 %v996_v26, %v492_v47 }
  0xca   : > { %v595_v50 = vmax.f32 %v521_v44, 0.0  ;;  %v607_v51 = vmax.f32 %v551_v45, 0.0 }
  0xcb   : > { %v572_v52 = vmax.f32 %v463_v48, 0.0  ;;  %v584_v53 = vmax.f32 %v493_v49, 0.0 }
  0xcc   : > { %643 = vst [vmem:[%s1004_s28 + $0xf0] sm:$0xff] %v595_v50 }
  0xcd   : > { %655 = vst [vmem:[%s1004_s28 + $0x150] sm:$0xff] %v607_v51 }
  0xce   : > { %620 = vst [vmem:[%s1004_s28 + $0x38] sm:$0xff] %v572_v52 }
  0xcf   : > { %632 = vst [vmem:[%s1004_s28 + $0x98] sm:$0xff] %v584_v53  ;;  %v522_v54 = vpop.f32.mrf.mxu2  ;;  %v552_v55 = vpop.f32.mrf.mxu3 }
  0xd0   : > { %v523_v56 = vadd.f32 %v996_v26, %v522_v54  ;;  %v553_v57 = vadd.f32 %v996_v26, %v552_v55  ;;  %v465_v58 = vpop.f32.mrf.mxu0  ;;  %v495_v59 = vpop.f32.mrf.mxu1 }
  0xd1   : > { %v466_v60 = vadd.f32 %v996_v26, %v465_v58  ;;  %v496_v61 = vadd.f32 %v996_v26, %v495_v59 }
  0xd2   : > { %v596_v62 = vmax.f32 %v523_v56, 0.0  ;;  %v608_v63 = vmax.f32 %v553_v57, 0.0 }
  0xd3   : > { %v573_v0 = vmax.f32 %v466_v60, 0.0  ;;  %v585_v1 = vmax.f32 %v496_v61, 0.0 }
  0xd4   : > { %644 = vst [vmem:[%s1004_s28 + $0xf8] sm:$0xff] %v596_v62 }
  0xd5   : > { %656 = vst [vmem:[%s1004_s28 + $0x158] sm:$0xff] %v608_v63 }
  0xd6   : > { %621 = vst [vmem:[%s1004_s28 + $0x40] sm:$0xff] %v573_v0 }
  0xd7   : > { %633 = vst [vmem:[%s1004_s28 + $0xa0] sm:$0xff] %v585_v1  ;;  %v525_v2 = vpop.f32.mrf.mxu2  ;;  %v555_v3 = vpop.f32.mrf.mxu3 }
  0xd8   : > { %v526_v4 = vadd.f32 %v996_v26, %v525_v2  ;;  %v556_v5 = vadd.f32 %v996_v26, %v555_v3  ;;  %v467_v6 = vpop.f32.mrf.mxu0  ;;  %v497_v7 = vpop.f32.mrf.mxu1 }
  0xd9   : > { %v468_v8 = vadd.f32 %v996_v26, %v467_v6  ;;  %v498_v9 = vadd.f32 %v996_v26, %v497_v7 }
  0xda   : > { %v597_v10 = vmax.f32 %v526_v4, 0.0  ;;  %v609_v11 = vmax.f32 %v556_v5, 0.0 }
  0xdb   : > { %v574_v12 = vmax.f32 %v468_v8, 0.0  ;;  %v586_v13 = vmax.f32 %v498_v9, 0.0 }
  0xdc   : > { %645 = vst [vmem:[%s1004_s28 + $0x100] sm:$0xff] %v597_v10 }
  0xdd   : > { %657 = vst [vmem:[%s1004_s28 + $0x160] sm:$0xff] %v609_v11 }
  0xde   : > { %622 = vst [vmem:[%s1004_s28 + $0x48] sm:$0xff] %v574_v12 }
  0xdf   : > { %634 = vst [vmem:[%s1004_s28 + $0xa8] sm:$0xff] %v586_v13  ;;  %v527_v14 = vpop.f32.mrf.mxu2  ;;  %v557_v15 = vpop.f32.mrf.mxu3 }
  0xe0   : > { %v528_v16 = vadd.f32 %v996_v26, %v527_v14  ;;  %v558_v17 = vadd.f32 %v996_v26, %v557_v15  ;;  %v470_v18 = vpop.f32.mrf.mxu0  ;;  %v500_v19 = vpop.f32.mrf.mxu1 }
  0xe1   : > { %v471_v20 = vadd.f32 %v996_v26, %v470_v18  ;;  %v501_v21 = vadd.f32 %v996_v26, %v500_v19 }
  0xe2   : > { %v598_v22 = vmax.f32 %v528_v16, 0.0  ;;  %v610_v23 = vmax.f32 %v558_v17, 0.0 }
  0xe3   : > { %v575_v24 = vmax.f32 %v471_v20, 0.0  ;;  %v587_v25 = vmax.f32 %v501_v21, 0.0 }
  0xe4   : > { %646 = vst [vmem:[%s1004_s28 + $0x108] sm:$0xff] %v598_v22 }
  0xe5   : > { %658 = vst [vmem:[%s1004_s28 + $0x168] sm:$0xff] %v610_v23 }
  0xe6   : > { %623 = vst [vmem:[%s1004_s28 + $0x50] sm:$0xff] %v575_v24 }
  0xe7   : > { %635 = vst [vmem:[%s1004_s28 + $0xb0] sm:$0xff] %v587_v25  ;;  %v530_v27 = vpop.f32.mrf.mxu2  ;;  %v560_v28 = vpop.f32.mrf.mxu3 }
  0xe8   : > { %v531_v29 = vadd.f32 %v996_v26, %v530_v27  ;;  %v561_v30 = vadd.f32 %v996_v26, %v560_v28  ;;  %v472_v31 = vpop.f32.mrf.mxu0  ;;  %v502_v32 = vpop.f32.mrf.mxu1 }
  0xe9   : > { %v473_v33 = vadd.f32 %v996_v26, %v472_v31  ;;  %v503_v34 = vadd.f32 %v996_v26, %v502_v32 }
  0xea   : > { %v599_v35 = vmax.f32 %v531_v29, 0.0  ;;  %v611_v36 = vmax.f32 %v561_v30, 0.0 }
  0xeb   : > { %v576_v37 = vmax.f32 %v473_v33, 0.0  ;;  %v588_v38 = vmax.f32 %v503_v34, 0.0 }
  0xec   : > { %647 = vst [vmem:[%s1004_s28 + $0x110] sm:$0xff] %v599_v35 }
  0xed   : > { %659 = vst [vmem:[%s1004_s28 + $0x170] sm:$0xff] %v611_v36 }
  0xee   : > { %624 = vst [vmem:[%s1004_s28 + $0x58] sm:$0xff] %v576_v37 }
  0xef   : > { %636 = vst [vmem:[%s1004_s28 + $0xb8] sm:$0xff] %v588_v38  ;;  %v532_v39 = vpop.f32.mrf.mxu2  ;;  %v562_v40 = vpop.f32.mrf.mxu3 }
  0xf0   : > { %v533_v41 = vadd.f32 %v996_v26, %v532_v39  ;;  %v563_v42 = vadd.f32 %v996_v26, %v562_v40 }
  0xf2   : > { %v600_v43 = vmax.f32 %v533_v41, 0.0  ;;  %v612_v44 = vmax.f32 %v563_v42, 0.0 }
  0xf4   : > { %648 = vst [vmem:[%s1004_s28 + $0x118] sm:$0xff] %v600_v43 }
  0xf5   : > { %660 = vst [vmem:[%s1004_s28 + $0x178] sm:$0xff] %v612_v44 }
  0xf6 PF: > { %s13_s12 = sadd.s32 1, %s901_s12  }
  0xf7   : > { %p10_p4 = scmp.ge.s32.totalorder %s13_s12, 5  }
  0xf9   :  { %12 = sbr.rel (!%p10_p4) target bundleno = 1 (0x1), region = 62 }

// kernel: peleenet_forward.24
= control target key start
LH: loop header
LB: loop body
LE: loop exit
PB: predicated region body
PF: predicated region fallthrough
CT: control target
= control target key end

     0   :  { %s907_s12 = smov 0   ;;  %s1084_s0 = inlined_call_operand.vmem [shape: bf16[1152,16], index: 0, kind: input, shape index: {}]   ;;  %s1085_s1 = inlined_call_operand.vmem [shape: bf16[16,128], index: 1, kind: input, shape index: {}]   ;;  %s1086_s2 = inlined_call_operand.vmem [shape: f32[1,128], index: 2, kind: input, shape index: {}]   ;;  %s1087_s3 = inlined_call_operand.vmem [shape: f32[1152,128], index: 3, kind: output, shape index: {}]  }
   0x1 LB: > { %s709_s13 = sadd.s32 4294967295, %s885_s12   ;;  %p713_p0 = scmp.ge.s32.totalorder %s885_s12, 1  ;;  %s885_s12 = sphi %s907_s12, %s13_s12  }
   0x2   : > { %p138_p1 = scmp.lt.s32.totalorder %s885_s12, 4 }
   0x4   : > { %p139_p2 = pnand %p713_p0, %p138_p1 }
   0x5   : > { %s162_s16 = smul.u32 (!%p139_p2), 48, %s709_s13 }
   0x6   : > { %142 = sbr.rel (%p139_p2) target bundleno = 242 (0xf2), region = 32 }
   0x7   : > { %p163_p3 = scmp.lt.s32.totalorder (!%p139_p2), %s162_s16, 143 }
   0xb   : > { %v866_v0 = vld [vmem:[%s1085_s1] sm:$0xff]  ;;  %s1089_s16 = smov (!%p163_p3, %s162_s16), 143  ;;  %vm355_vm0 = vcmask 130048  }
   0xc   : > { %435 = vmatpush.bf16.msra.mxu0 %v866_v0  ;;  %867 = vmatpush.bf16.msra.mxu1 %v866_v0  ;;  %s714_s17 = sshll.u32 %s1089_s16, 2  ;;  %v977_v25 = vld [vmem:[%s1086_s2] ss:$0 sm:$0xff]  ;;  %s715_s23 = sshll.u32 %s1089_s16, 3 }
   0xd   : > { %868 = vmatpush.bf16.msra.mxu2 %v866_v0  ;;  %869 = vmatpush.bf16.msra.mxu3 %v866_v0  ;;  %s924_s20 = scalar_lea.vmem %s1084_s0, %s714_s17  ;;  %s985_s26 = scalar_lea.vmem %s1087_s3, %s715_s23 }
   0xe   : > { %v842_v1 = vld [vmem:[%s924_s20] sm:$0xff]  ;;  %v848_v2 = vld [vmem:[%s924_s20 + $0x30] sm:$0xff]  ;;  %v843_v5 = vld [vmem:[%s924_s20 + $0x8] sm:$0xff] }
   0xf   : > { %v854_v3 = vld [vmem:[%s924_s20 + $0x60] sm:$0xff]  ;;  %v860_v4 = vld [vmem:[%s924_s20 + $0x90] sm:$0xff]  ;;  %816 = vmatmul.msk.bf16.vlgmr.msra.gmra.mxu0 %vm355_vm0, %v842_v1  ;;  %822 = vmatmul.msk.bf16.vlgmr.msra.gmra.mxu1 %vm355_vm0, %v848_v2  ;;  %v849_v6 = vld [vmem:[%s924_s20 + $0x38] sm:$0xff] }
  0x10   : > { %828 = vmatmul.msk.bf16.vlgmr.msra.gmra.mxu2 %vm355_vm0, %v854_v3  ;;  %834 = vmatmul.msk.bf16.vlgmr.msra.gmra.mxu3 %vm355_vm0, %v860_v4  ;;  %v855_v7 = vld [vmem:[%s924_s20 + $0x68] sm:$0xff]  ;;  %v861_v8 = vld [vmem:[%s924_s20 + $0x98] sm:$0xff]  ;;  %v844_v9 = vld [vmem:[%s924_s20 + $0x10] sm:$0xff] }
  0x11   : > { %v850_v10 = vld [vmem:[%s924_s20 + $0x40] sm:$0xff]  ;;  %v856_v11 = vld [vmem:[%s924_s20 + $0x70] sm:$0xff]  ;;  %v845_v13 = vld [vmem:[%s924_s20 + $0x18] sm:$0xff] }
  0x12   : > { %v862_v12 = vld [vmem:[%s924_s20 + $0xa0] sm:$0xff]  ;;  %v851_v14 = vld [vmem:[%s924_s20 + $0x48] sm:$0xff]  ;;  %v857_v15 = vld [vmem:[%s924_s20 + $0x78] sm:$0xff] }
  0x13   : > { %v863_v16 = vld [vmem:[%s924_s20 + $0xa8] sm:$0xff]  ;;  %v846_v17 = vld [vmem:[%s924_s20 + $0x20] sm:$0xff]  ;;  %v852_v18 = vld [vmem:[%s924_s20 + $0x50] sm:$0xff] }
  0x14   : > { %v858_v19 = vld [vmem:[%s924_s20 + $0x80] sm:$0xff]  ;;  %v864_v20 = vld [vmem:[%s924_s20 + $0xb0] sm:$0xff]  ;;  %v847_v21 = vld [vmem:[%s924_s20 + $0x28] sm:$0xff] }
  0x15   : > { %v853_v22 = vld [vmem:[%s924_s20 + $0x58] sm:$0xff]  ;;  %v859_v23 = vld [vmem:[%s924_s20 + $0x88] sm:$0xff] }
  0x16   : > { %v865_v24 = vld [vmem:[%s924_s20 + $0xb8] sm:$0xff] }
  0x1f   : > { %817 = vmatmul.msk.bf16.gmra.mxu0 %vm355_vm0, %v843_v5  ;;  %823 = vmatmul.msk.bf16.gmra.mxu1 %vm355_vm0, %v849_v6 }
  0x20   : > { %829 = vmatmul.msk.bf16.gmra.mxu2 %vm355_vm0, %v855_v7  ;;  %835 = vmatmul.msk.bf16.gmra.mxu3 %vm355_vm0, %v861_v8 }
  0x2f   : > { %818 = vmatmul.msk.bf16.gmra.mxu0 %vm355_vm0, %v844_v9  ;;  %824 = vmatmul.msk.bf16.gmra.mxu1 %vm355_vm0, %v850_v10 }
  0x30   : > { %830 = vmatmul.msk.bf16.gmra.mxu2 %vm355_vm0, %v856_v11  ;;  %836 = vmatmul.msk.bf16.gmra.mxu3 %vm355_vm0, %v862_v12 }
  0x3f   : > { %819 = vmatmul.msk.bf16.gmra.mxu0 %vm355_vm0, %v845_v13  ;;  %825 = vmatmul.msk.bf16.gmra.mxu1 %vm355_vm0, %v851_v14 }
  0x40   : > { %831 = vmatmul.msk.bf16.gmra.mxu2 %vm355_vm0, %v857_v15  ;;  %837 = vmatmul.msk.bf16.gmra.mxu3 %vm355_vm0, %v863_v16 }
  0x4f   : > { %820 = vmatmul.msk.bf16.gmra.mxu0 %vm355_vm0, %v846_v17  ;;  %826 = vmatmul.msk.bf16.gmra.mxu1 %vm355_vm0, %v852_v18 }
  0x50   : > { %832 = vmatmul.msk.bf16.gmra.mxu2 %vm355_vm0, %v858_v19  ;;  %838 = vmatmul.msk.bf16.gmra.mxu3 %vm355_vm0, %v864_v20 }
  0x5f   : > { %821 = vmatmul.msk.bf16.gmra.mxu0 %vm355_vm0, %v847_v21  ;;  %827 = vmatmul.msk.bf16.gmra.mxu1 %vm355_vm0, %v853_v22 }
  0x60   : > { %833 = vmatmul.msk.bf16.gmra.mxu2 %vm355_vm0, %v859_v23  ;;  %839 = vmatmul.msk.bf16.gmra.mxu3 %vm355_vm0, %v865_v24 }
  0x8c   : > { %v437_v26 = vpop.f32.mrf.mxu0  ;;  %v467_v27 = vpop.f32.mrf.mxu1 }
  0x8d   : > { %v438_v28 = vadd.f32 %v977_v25, %v437_v26  ;;  %v468_v29 = vadd.f32 %v977_v25, %v467_v27 }
  0x8f   : > { %v557_v30 = vmax.f32 %v438_v28, 0.0  ;;  %v569_v31 = vmax.f32 %v468_v29, 0.0 }
  0x91   : > { %605 = vst [vmem:[%s985_s26] sm:$0xff] %v557_v30 }
  0x92   : > { %617 = vst [vmem:[%s985_s26 + $0x60] sm:$0xff] %v569_v31 }
  0x93   : > { %v497_v32 = vpop.f32.mrf.mxu2  ;;  %v527_v33 = vpop.f32.mrf.mxu3 }
  0x94   : > { %v498_v34 = vadd.f32 %v977_v25, %v497_v32  ;;  %v528_v35 = vadd.f32 %v977_v25, %v527_v33  ;;  %v439_v36 = vpop.f32.mrf.mxu0  ;;  %v469_v37 = vpop.f32.mrf.mxu1 }
  0x95   : > { %v440_v38 = vadd.f32 %v977_v25, %v439_v36  ;;  %v470_v39 = vadd.f32 %v977_v25, %v469_v37 }
  0x96   : > { %v581_v40 = vmax.f32 %v498_v34, 0.0  ;;  %v593_v41 = vmax.f32 %v528_v35, 0.0 }
  0x97   : > { %v558_v42 = vmax.f32 %v440_v38, 0.0  ;;  %v570_v43 = vmax.f32 %v470_v39, 0.0 }
  0x98   : > { %629 = vst [vmem:[%s985_s26 + $0xc0] sm:$0xff] %v581_v40 }
  0x99   : > { %641 = vst [vmem:[%s985_s26 + $0x120] sm:$0xff] %v593_v41 }
  0x9a   : > { %606 = vst [vmem:[%s985_s26 + $0x8] sm:$0xff] %v558_v42 }
  0x9b   : > { %618 = vst [vmem:[%s985_s26 + $0x68] sm:$0xff] %v570_v43  ;;  %v499_v44 = vpop.f32.mrf.mxu2  ;;  %v529_v45 = vpop.f32.mrf.mxu3 }
  0x9c   : > { %v500_v46 = vadd.f32 %v977_v25, %v499_v44  ;;  %v530_v47 = vadd.f32 %v977_v25, %v529_v45  ;;  %v442_v48 = vpop.f32.mrf.mxu0  ;;  %v472_v49 = vpop.f32.mrf.mxu1 }
  0x9d   : > { %v443_v50 = vadd.f32 %v977_v25, %v442_v48  ;;  %v473_v51 = vadd.f32 %v977_v25, %v472_v49 }
  0x9e   : > { %v582_v52 = vmax.f32 %v500_v46, 0.0  ;;  %v594_v53 = vmax.f32 %v530_v47, 0.0 }
  0x9f   : > { %v559_v54 = vmax.f32 %v443_v50, 0.0  ;;  %v571_v55 = vmax.f32 %v473_v51, 0.0 }
  0xa0   : > { %630 = vst [vmem:[%s985_s26 + $0xc8] sm:$0xff] %v582_v52 }
  0xa1   : > { %642 = vst [vmem:[%s985_s26 + $0x128] sm:$0xff] %v594_v53 }
  0xa2   : > { %607 = vst [vmem:[%s985_s26 + $0x10] sm:$0xff] %v559_v54 }
  0xa3   : > { %619 = vst [vmem:[%s985_s26 + $0x70] sm:$0xff] %v571_v55  ;;  %v502_v56 = vpop.f32.mrf.mxu2  ;;  %v532_v57 = vpop.f32.mrf.mxu3 }
  0xa4   : > { %v503_v58 = vadd.f32 %v977_v25, %v502_v56  ;;  %v533_v59 = vadd.f32 %v977_v25, %v532_v57  ;;  %v444_v60 = vpop.f32.mrf.mxu0  ;;  %v474_v61 = vpop.f32.mrf.mxu1 }
  0xa5   : > { %v445_v62 = vadd.f32 %v977_v25, %v444_v60  ;;  %v475_v63 = vadd.f32 %v977_v25, %v474_v61 }
  0xa6   : > { %v583_v0 = vmax.f32 %v503_v58, 0.0  ;;  %v595_v1 = vmax.f32 %v533_v59, 0.0 }
  0xa7   : > { %v560_v2 = vmax.f32 %v445_v62, 0.0  ;;  %v572_v3 = vmax.f32 %v475_v63, 0.0 }
  0xa8   : > { %631 = vst [vmem:[%s985_s26 + $0xd0] sm:$0xff] %v583_v0 }
  0xa9   : > { %643 = vst [vmem:[%s985_s26 + $0x130] sm:$0xff] %v595_v1 }
  0xaa   : > { %608 = vst [vmem:[%s985_s26 + $0x18] sm:$0xff] %v560_v2 }
  0xab   : > { %620 = vst [vmem:[%s985_s26 + $0x78] sm:$0xff] %v572_v3  ;;  %v504_v4 = vpop.f32.mrf.mxu2  ;;  %v534_v5 = vpop.f32.mrf.mxu3 }
  0xac   : > { %v505_v6 = vadd.f32 %v977_v25, %v504_v4  ;;  %v535_v7 = vadd.f32 %v977_v25, %v534_v5  ;;  %v447_v8 = vpop.f32.mrf.mxu0  ;;  %v477_v9 = vpop.f32.mrf.mxu1 }
  0xad   : > { %v448_v10 = vadd.f32 %v977_v25, %v447_v8  ;;  %v478_v11 = vadd.f32 %v977_v25, %v477_v9 }
  0xae   : > { %v584_v12 = vmax.f32 %v505_v6, 0.0  ;;  %v596_v13 = vmax.f32 %v535_v7, 0.0 }
  0xaf   : > { %v561_v14 = vmax.f32 %v448_v10, 0.0  ;;  %v573_v15 = vmax.f32 %v478_v11, 0.0 }
  0xb0   : > { %632 = vst [vmem:[%s985_s26 + $0xd8] sm:$0xff] %v584_v12 }
  0xb1   : > { %644 = vst [vmem:[%s985_s26 + $0x138] sm:$0xff] %v596_v13 }
  0xb2   : > { %609 = vst [vmem:[%s985_s26 + $0x20] sm:$0xff] %v561_v14 }
  0xb3   : > { %621 = vst [vmem:[%s985_s26 + $0x80] sm:$0xff] %v573_v15  ;;  %v507_v16 = vpop.f32.mrf.mxu2  ;;  %v537_v17 = vpop.f32.mrf.mxu3 }
  0xb4   : > { %v508_v18 = vadd.f32 %v977_v25, %v507_v16  ;;  %v538_v19 = vadd.f32 %v977_v25, %v537_v17  ;;  %v449_v20 = vpop.f32.mrf.mxu0  ;;  %v479_v21 = vpop.f32.mrf.mxu1 }
  0xb5   : > { %v450_v22 = vadd.f32 %v977_v25, %v449_v20  ;;  %v480_v23 = vadd.f32 %v977_v25, %v479_v21 }
  0xb6   : > { %v585_v24 = vmax.f32 %v508_v18, 0.0  ;;  %v597_v26 = vmax.f32 %v538_v19, 0.0 }
  0xb7   : > { %v562_v27 = vmax.f32 %v450_v22, 0.0  ;;  %v574_v28 = vmax.f32 %v480_v23, 0.0 }
  0xb8   : > { %633 = vst [vmem:[%s985_s26 + $0xe0] sm:$0xff] %v585_v24 }
  0xb9   : > { %645 = vst [vmem:[%s985_s26 + $0x140] sm:$0xff] %v597_v26 }
  0xba   : > { %610 = vst [vmem:[%s985_s26 + $0x28] sm:$0xff] %v562_v27 }
  0xbb   : > { %622 = vst [vmem:[%s985_s26 + $0x88] sm:$0xff] %v574_v28  ;;  %v509_v29 = vpop.f32.mrf.mxu2  ;;  %v539_v30 = vpop.f32.mrf.mxu3 }
  0xbc   : > { %v510_v31 = vadd.f32 %v977_v25, %v509_v29  ;;  %v540_v32 = vadd.f32 %v977_v25, %v539_v30  ;;  %v452_v33 = vpop.f32.mrf.mxu0  ;;  %v482_v34 = vpop.f32.mrf.mxu1 }
  0xbd   : > { %v453_v35 = vadd.f32 %v977_v25, %v452_v33  ;;  %v483_v36 = vadd.f32 %v977_v25, %v482_v34 }
  0xbe   : > { %v586_v37 = vmax.f32 %v510_v31, 0.0  ;;  %v598_v38 = vmax.f32 %v540_v32, 0.0 }
  0xbf   : > { %v563_v39 = vmax.f32 %v453_v35, 0.0  ;;  %v575_v40 = vmax.f32 %v483_v36, 0.0 }
  0xc0   : > { %634 = vst [vmem:[%s985_s26 + $0xe8] sm:$0xff] %v586_v37 }
  0xc1   : > { %646 = vst [vmem:[%s985_s26 + $0x148] sm:$0xff] %v598_v38 }
  0xc2   : > { %611 = vst [vmem:[%s985_s26 + $0x30] sm:$0xff] %v563_v39 }
  0xc3   : > { %623 = vst [vmem:[%s985_s26 + $0x90] sm:$0xff] %v575_v40  ;;  %v512_v41 = vpop.f32.mrf.mxu2  ;;  %v542_v42 = vpop.f32.mrf.mxu3 }
  0xc4   : > { %v513_v43 = vadd.f32 %v977_v25, %v512_v41  ;;  %v543_v44 = vadd.f32 %v977_v25, %v542_v42  ;;  %v454_v45 = vpop.f32.mrf.mxu0  ;;  %v484_v46 = vpop.f32.mrf.mxu1 }
  0xc5   : > { %v455_v47 = vadd.f32 %v977_v25, %v454_v45  ;;  %v485_v48 = vadd.f32 %v977_v25, %v484_v46 }
  0xc6   : > { %v587_v49 = vmax.f32 %v513_v43, 0.0  ;;  %v599_v50 = vmax.f32 %v543_v44, 0.0 }
  0xc7   : > { %v564_v51 = vmax.f32 %v455_v47, 0.0  ;;  %v576_v52 = vmax.f32 %v485_v48, 0.0 }
  0xc8   : > { %635 = vst [vmem:[%s985_s26 + $0xf0] sm:$0xff] %v587_v49 }
  0xc9   : > { %647 = vst [vmem:[%s985_s26 + $0x150] sm:$0xff] %v599_v50 }
  0xca   : > { %612 = vst [vmem:[%s985_s26 + $0x38] sm:$0xff] %v564_v51 }
  0xcb   : > { %624 = vst [vmem:[%s985_s26 + $0x98] sm:$0xff] %v576_v52  ;;  %v514_v53 = vpop.f32.mrf.mxu2  ;;  %v544_v54 = vpop.f32.mrf.mxu3 }
  0xcc   : > { %v515_v55 = vadd.f32 %v977_v25, %v514_v53  ;;  %v545_v56 = vadd.f32 %v977_v25, %v544_v54  ;;  %v457_v57 = vpop.f32.mrf.mxu0  ;;  %v487_v58 = vpop.f32.mrf.mxu1 }
  0xcd   : > { %v458_v59 = vadd.f32 %v977_v25, %v457_v57  ;;  %v488_v60 = vadd.f32 %v977_v25, %v487_v58 }
  0xce   : > { %v588_v61 = vmax.f32 %v515_v55, 0.0  ;;  %v600_v62 = vmax.f32 %v545_v56, 0.0 }
  0xcf   : > { %v565_v63 = vmax.f32 %v458_v59, 0.0  ;;  %v577_v0 = vmax.f32 %v488_v60, 0.0 }
  0xd0   : > { %636 = vst [vmem:[%s985_s26 + $0xf8] sm:$0xff] %v588_v61 }
  0xd1   : > { %648 = vst [vmem:[%s985_s26 + $0x158] sm:$0xff] %v600_v62 }
  0xd2   : > { %613 = vst [vmem:[%s985_s26 + $0x40] sm:$0xff] %v565_v63 }
  0xd3   : > { %625 = vst [vmem:[%s985_s26 + $0xa0] sm:$0xff] %v577_v0  ;;  %v517_v1 = vpop.f32.mrf.mxu2  ;;  %v547_v2 = vpop.f32.mrf.mxu3 }
  0xd4   : > { %v518_v3 = vadd.f32 %v977_v25, %v517_v1  ;;  %v548_v4 = vadd.f32 %v977_v25, %v547_v2  ;;  %v459_v5 = vpop.f32.mrf.mxu0  ;;  %v489_v6 = vpop.f32.mrf.mxu1 }
  0xd5   : > { %v460_v7 = vadd.f32 %v977_v25, %v459_v5  ;;  %v490_v8 = vadd.f32 %v977_v25, %v489_v6 }
  0xd6   : > { %v589_v9 = vmax.f32 %v518_v3, 0.0  ;;  %v601_v10 = vmax.f32 %v548_v4, 0.0 }
  0xd7   : > { %v566_v11 = vmax.f32 %v460_v7, 0.0  ;;  %v578_v12 = vmax.f32 %v490_v8, 0.0 }
  0xd8   : > { %637 = vst [vmem:[%s985_s26 + $0x100] sm:$0xff] %v589_v9 }
  0xd9   : > { %649 = vst [vmem:[%s985_s26 + $0x160] sm:$0xff] %v601_v10 }
  0xda   : > { %614 = vst [vmem:[%s985_s26 + $0x48] sm:$0xff] %v566_v11 }
  0xdb   : > { %626 = vst [vmem:[%s985_s26 + $0xa8] sm:$0xff] %v578_v12  ;;  %v519_v13 = vpop.f32.mrf.mxu2  ;;  %v549_v14 = vpop.f32.mrf.mxu3 }
  0xdc   : > { %v520_v15 = vadd.f32 %v977_v25, %v519_v13  ;;  %v550_v16 = vadd.f32 %v977_v25, %v549_v14  ;;  %v462_v17 = vpop.f32.mrf.mxu0  ;;  %v492_v18 = vpop.f32.mrf.mxu1 }
  0xdd   : > { %v463_v19 = vadd.f32 %v977_v25, %v462_v17  ;;  %v493_v20 = vadd.f32 %v977_v25, %v492_v18 }
  0xde   : > { %v590_v21 = vmax.f32 %v520_v15, 0.0  ;;  %v602_v22 = vmax.f32 %v550_v16, 0.0 }
  0xdf   : > { %v567_v23 = vmax.f32 %v463_v19, 0.0  ;;  %v579_v24 = vmax.f32 %v493_v20, 0.0 }
  0xe0   : > { %638 = vst [vmem:[%s985_s26 + $0x108] sm:$0xff] %v590_v21 }
  0xe1   : > { %650 = vst [vmem:[%s985_s26 + $0x168] sm:$0xff] %v602_v22 }
  0xe2   : > { %615 = vst [vmem:[%s985_s26 + $0x50] sm:$0xff] %v567_v23 }
  0xe3   : > { %627 = vst [vmem:[%s985_s26 + $0xb0] sm:$0xff] %v579_v24  ;;  %v522_v26 = vpop.f32.mrf.mxu2  ;;  %v552_v27 = vpop.f32.mrf.mxu3 }
  0xe4   : > { %v523_v28 = vadd.f32 %v977_v25, %v522_v26  ;;  %v553_v29 = vadd.f32 %v977_v25, %v552_v27  ;;  %v464_v30 = vpop.f32.mrf.mxu0  ;;  %v494_v31 = vpop.f32.mrf.mxu1 }
  0xe5   : > { %v465_v32 = vadd.f32 %v977_v25, %v464_v30  ;;  %v495_v33 = vadd.f32 %v977_v25, %v494_v31 }
  0xe6   : > { %v591_v34 = vmax.f32 %v523_v28, 0.0  ;;  %v603_v35 = vmax.f32 %v553_v29, 0.0 }
  0xe7   : > { %v568_v36 = vmax.f32 %v465_v32, 0.0  ;;  %v580_v37 = vmax.f32 %v495_v33, 0.0 }
  0xe8   : > { %639 = vst [vmem:[%s985_s26 + $0x110] sm:$0xff] %v591_v34 }
  0xe9   : > { %651 = vst [vmem:[%s985_s26 + $0x170] sm:$0xff] %v603_v35 }
  0xea   : > { %616 = vst [vmem:[%s985_s26 + $0x58] sm:$0xff] %v568_v36 }
  0xeb   : > { %628 = vst [vmem:[%s985_s26 + $0xb8] sm:$0xff] %v580_v37  ;;  %v524_v38 = vpop.f32.mrf.mxu2  ;;  %v554_v39 = vpop.f32.mrf.mxu3 }
  0xec   : > { %v525_v40 = vadd.f32 %v977_v25, %v524_v38  ;;  %v555_v41 = vadd.f32 %v977_v25, %v554_v39 }
  0xee   : > { %v592_v42 = vmax.f32 %v525_v40, 0.0  ;;  %v604_v43 = vmax.f32 %v555_v41, 0.0 }
  0xf0   : > { %640 = vst [vmem:[%s985_s26 + $0x118] sm:$0xff] %v592_v42 }
  0xf1   : > { %652 = vst [vmem:[%s985_s26 + $0x178] sm:$0xff] %v604_v43 }
  0xf2 PF: > { %s13_s12 = sadd.s32 1, %s885_s12  }
  0xf3   : > { %p10_p4 = scmp.ge.s32.totalorder %s13_s12, 5  }
  0xf5   :  { %12 = sbr.rel (!%p10_p4) target bundleno = 1 (0x1), region = 62 }

// kernel: peleenet_forward.25
= control target key start
LH: loop header
LB: loop body
LE: loop exit
PB: predicated region body
PF: predicated region fallthrough
CT: control target
= control target key end

     0   :  { %s1367_s12 = smov 0   ;;  %s1664_s0 = inlined_call_operand.vmem [shape: bf16[1152,144], index: 0, kind: input, shape index: {}]   ;;  %s1665_s1 = inlined_call_operand.vmem [shape: bf16[144,128], index: 1, kind: input, shape index: {}]   ;;  %s1666_s2 = inlined_call_operand.vmem [shape: f32[1,128], index: 2, kind: input, shape index: {}]   ;;  %s1667_s3 = inlined_call_operand.vmem [shape: f32[1152,128], index: 3, kind: output, shape index: {}]  }
   0x1 LB: > { %s1001_s13 = sadd.s32 4294967295, %s1345_s12   ;;  %p1005_p0 = scmp.ge.s32.totalorder %s1345_s12, 1  ;;  %s1345_s12 = sphi %s1367_s12, %s13_s12  }
   0x2   : > { %p139_p1 = scmp.lt.s32.totalorder %s1345_s12, 4 }
   0x4   : > { %p140_p2 = pnand %p1005_p0, %p139_p1 }
   0x5   : > { %s164_s18 = smul.u32 (!%p140_p2), 48, %s1001_s13 }
   0x6   : > { %143 = sbr.rel (%p140_p2) target bundleno = 366 (0x16e), region = 32 }
   0x7   : > { %p165_p3 = scmp.lt.s32.totalorder (!%p140_p2), %s164_s18, 143 }
   0xb   : > { %v1319_v0 = vld [vmem:[%s1665_s1 + $0x38] sm:$0xff]  ;;  %v1320_v1 = vld [vmem:[%s1665_s1 + $0x40] sm:$0xff]  ;;  %v1318_v2 = vld [vmem:[%s1665_s1 + $0x30] sm:$0xff]  ;;  %s1669_s18 = smov (!%p165_p3, %s164_s18), 143  ;;  %vm518_vm0 = vcmask 130048  }
   0xc   : > { %591 = vmatpush.bf16.msra.mxu0 %v1319_v0  ;;  %1321 = vmatpush.bf16.msra.mxu2 %v1319_v0  ;;  %v1317_v3 = vld [vmem:[%s1665_s1 + $0x28] sm:$0xff]  ;;  %s1263_s23 = sshll.u32 %s1669_s18, 3  ;;  %v1316_v7 = vld [vmem:[%s1665_s1 + $0x20] sm:$0xff]  ;;  %v1315_v11 = vld [vmem:[%s1665_s1 + $0x18] sm:$0xff] }
   0xd   : > { %727 = vmatpush.bf16.msra.mxu1 %v1320_v1  ;;  %1329 = vmatpush.bf16.msra.mxu3 %v1320_v1  ;;  %s1395_s26 = scalar_lea.vmem %s1664_s0, %s1263_s23  ;;  %v1314_v12 = vld [vmem:[%s1665_s1 + $0x10] sm:$0xff]  ;;  %v1313_v15 = vld [vmem:[%s1665_s1 + $0x8] sm:$0xff]  ;;  %v1312_v19 = vld [vmem:[%s1665_s1] sm:$0xff]  ;;  %s1523_s15 = scalar_lea.vmem %s1667_s3, %s1263_s23 }
   0xe   : > { %v1264_v4 = vld [vmem:[%s1395_s26 + $0x4] sm:$0xf]  ;;  %v1013_v5 = vld [vmem:[%s1395_s26 + $0x8] sm:$0xf0]  ;;  %v1290_v8 = vld [vmem:[%s1395_s26 + $0xd4] sm:$0xf] }
   0xf   : > { %v1016_v6 = vor.u32 %v1264_v4, %v1013_v5  ;;  %v1117_v9 = vld [vmem:[%s1395_s26 + $0xd8] sm:$0xf0]  ;;  %v1266_v13 = vld [vmem:[%s1395_s26 + $0x14] sm:$0xf]  ;;  %v1292_v17 = vld [vmem:[%s1395_s26 + $0xe4] sm:$0xf] }
  0x10   : > { %592 = vmatpush.bf16.msra.mxu0 %v1318_v2  ;;  %1322 = vmatpush.bf16.msra.mxu2 %v1318_v2  ;;  %v1120_v10 = vor.u32 %v1290_v8, %v1117_v9  ;;  %v1021_v14 = vld [vmem:[%s1395_s26 + $0x18] sm:$0xf0]  ;;  %v1125_v18 = vld [vmem:[%s1395_s26 + $0xe8] sm:$0xf0]  ;;  %v1011_v20 = vld [vmem:[%s1395_s26] sm:$0xf] }
  0x11   : > { %1237 = vmatmul.msk.bf16.vlgmr.msra.gmra.mxu1 %vm518_vm0, %v1016_v6  ;;  %v1024_v16 = vor.u32 %v1266_v13, %v1021_v14  ;;  %v1265_v21 = vld [vmem:[%s1395_s26 + $0x4] sm:$0xf0]  ;;  %v1107_v22 = vld [vmem:[%s1395_s26 + $0xc0] sm:$0xf]  ;;  %v1128_v24 = vor.u32 %v1292_v17, %v1125_v18  ;;  %v1268_v27 = vld [vmem:[%s1395_s26 + $0x24] sm:$0xf] }
  0x12   : > { %1250 = vmatmul.msk.bf16.vlgmr.msra.gmra.mxu3 %vm518_vm0, %v1120_v10  ;;  %v1289_v23 = vld [vmem:[%s1395_s26 + $0xc4] sm:$0xf0]  ;;  %v1012_v25 = vor.u32 %v1265_v21, %v1011_v20  ;;  %v1029_v28 = vld [vmem:[%s1395_s26 + $0x28] sm:$0xf0]  ;;  %v1294_v30 = vld [vmem:[%s1395_s26 + $0xf4] sm:$0xf] }
  0x13   : > { %v1108_v26 = vor.u32 %v1289_v23, %v1107_v22  ;;  %v1032_v29 = vor.u32 %v1268_v27, %v1029_v28  ;;  %v1133_v31 = vld [vmem:[%s1395_s26 + $0xf8] sm:$0xf0]  ;;  %v1019_v32 = vld [vmem:[%s1395_s26 + $0x10] sm:$0xf]  ;;  %v1267_v33 = vld [vmem:[%s1395_s26 + $0x14] sm:$0xf0] }
  0x14   : > { %593 = vmatpush.bf16.msra.mxu0 %v1317_v3  ;;  %1323 = vmatpush.bf16.msra.mxu2 %v1317_v3  ;;  %v1115_v34 = vld [vmem:[%s1395_s26 + $0xd0] sm:$0xf]  ;;  %v1291_v35 = vld [vmem:[%s1395_s26 + $0xd4] sm:$0xf0]  ;;  %v1136_v36 = vor.u32 %v1294_v30, %v1133_v31  ;;  %v1020_v37 = vor.u32 %v1267_v33, %v1019_v32  ;;  %v1270_v39 = vld [vmem:[%s1395_s26 + $0x34] sm:$0xf] }
  0x15   : > { %v1116_v38 = vor.u32 %v1291_v35, %v1115_v34  ;;  %v1037_v40 = vld [vmem:[%s1395_s26 + $0x38] sm:$0xf0]  ;;  %v1296_v42 = vld [vmem:[%s1395_s26 + $0x104] sm:$0xf]  ;;  %v1141_v43 = vld [vmem:[%s1395_s26 + $0x108] sm:$0xf0] }
  0x16   : > { %v1040_v41 = vor.u32 %v1270_v39, %v1037_v40  ;;  %v1027_v44 = vld [vmem:[%s1395_s26 + $0x20] sm:$0xf]  ;;  %v1269_v45 = vld [vmem:[%s1395_s26 + $0x24] sm:$0xf0]  ;;  %v1144_v48 = vor.u32 %v1296_v42, %v1141_v43  ;;  %v1272_v51 = vld [vmem:[%s1395_s26 + $0x44] sm:$0xf] }
  0x17   : > { %v1123_v46 = vld [vmem:[%s1395_s26 + $0xe0] sm:$0xf]  ;;  %v1293_v47 = vld [vmem:[%s1395_s26 + $0xe4] sm:$0xf0]  ;;  %v1028_v49 = vor.u32 %v1269_v45, %v1027_v44  ;;  %v1045_v52 = vld [vmem:[%s1395_s26 + $0x48] sm:$0xf0] }
  0x18   : > { %594 = vmatpush.bf16.msra.mxu0 %v1316_v7  ;;  %1324 = vmatpush.bf16.msra.mxu2 %v1316_v7  ;;  %v1124_v50 = vor.u32 %v1293_v47, %v1123_v46  ;;  %v1048_v53 = vor.u32 %v1272_v51, %v1045_v52  ;;  %v1298_v54 = vld [vmem:[%s1395_s26 + $0x114] sm:$0xf]  ;;  %v1149_v55 = vld [vmem:[%s1395_s26 + $0x118] sm:$0xf0]  ;;  %v1035_v56 = vld [vmem:[%s1395_s26 + $0x30] sm:$0xf] }
  0x19   : > { %v1271_v57 = vld [vmem:[%s1395_s26 + $0x34] sm:$0xf0]  ;;  %v1131_v58 = vld [vmem:[%s1395_s26 + $0xf0] sm:$0xf]  ;;  %v1152_v60 = vor.u32 %v1298_v54, %v1149_v55  ;;  %v1274_v63 = vld [vmem:[%s1395_s26 + $0x54] sm:$0xf] }
  0x1a   : > { %v1295_v59 = vld [vmem:[%s1395_s26 + $0xf4] sm:$0xf0]  ;;  %v1036_v61 = vor.u32 %v1271_v57, %v1035_v56  ;;  %v1053_v0 = vld [vmem:[%s1395_s26 + $0x58] sm:$0xf0]  ;;  %v1300_v2 = vld [vmem:[%s1395_s26 + $0x124] sm:$0xf] }
  0x1b   : > { %v1132_v62 = vor.u32 %v1295_v59, %v1131_v58  ;;  %v1056_v1 = vor.u32 %v1274_v63, %v1053_v0  ;;  %v1157_v3 = vld [vmem:[%s1395_s26 + $0x128] sm:$0xf0]  ;;  %v1043_v4 = vld [vmem:[%s1395_s26 + $0x40] sm:$0xf]  ;;  %v1273_v5 = vld [vmem:[%s1395_s26 + $0x44] sm:$0xf0] }
  0x1c   : > { %595 = vmatpush.bf16.msra.mxu0 %v1315_v11  ;;  %1325 = vmatpush.bf16.msra.mxu2 %v1315_v11  ;;  %v1139_v6 = vld [vmem:[%s1395_s26 + $0x100] sm:$0xf]  ;;  %v1297_v7 = vld [vmem:[%s1395_s26 + $0x104] sm:$0xf0]  ;;  %v1160_v8 = vor.u32 %v1300_v2, %v1157_v3  ;;  %v1044_v9 = vor.u32 %v1273_v5, %v1043_v4  ;;  %v1276_v11 = vld [vmem:[%s1395_s26 + $0x64] sm:$0xf] }
  0x1d   : > { %v1140_v10 = vor.u32 %v1297_v7, %v1139_v6  ;;  %v1302_v14 = vld [vmem:[%s1395_s26 + $0x134] sm:$0xf]  ;;  %v1275_v17 = vld [vmem:[%s1395_s26 + $0x54] sm:$0xf0]  ;;  %v1147_v18 = vld [vmem:[%s1395_s26 + $0x110] sm:$0xf] }
  0x1e   : > { %v1278_v23 = vld [vmem:[%s1395_s26 + $0x74] sm:$0xf]  ;;  %v1059_v27 = vld [vmem:[%s1395_s26 + $0x60] sm:$0xf]  ;;  %v1173_v28 = vld [vmem:[%s1395_s26 + $0x148] sm:$0xf0] }
  0x1f   : > { %v1155_v30 = vld [vmem:[%s1395_s26 + $0x120] sm:$0xf]  ;;  %v1301_v31 = vld [vmem:[%s1395_s26 + $0x124] sm:$0xf0]  ;;  %v1280_v35 = vld [vmem:[%s1395_s26 + $0x84] sm:$0xf] }
  0x20   : > { %596 = vmatpush.bf16.msra.mxu0 %v1314_v12  ;;  %1326 = vmatpush.bf16.msra.mxu2 %v1314_v12  ;;  %v1061_v12 = vld [vmem:[%s1395_s26 + $0x68] sm:$0xf0]  ;;  %v1156_v34 = vor.u32 %v1301_v31, %v1155_v30  ;;  %v1306_v39 = vld [vmem:[%s1395_s26 + $0x154] sm:$0xf]  ;;  %v1067_v40 = vld [vmem:[%s1395_s26 + $0x70] sm:$0xf] }
  0x21   : > { %1238 = vmatmul.msk.bf16.gmra.mxu1 %vm518_vm0, %v1024_v16  ;;  %v1064_v13 = vor.u32 %v1276_v11, %v1061_v12  ;;  %v1165_v16 = vld [vmem:[%s1395_s26 + $0x138] sm:$0xf0]  ;;  %v1279_v42 = vld [vmem:[%s1395_s26 + $0x74] sm:$0xf0]  ;;  %v1163_v43 = vld [vmem:[%s1395_s26 + $0x130] sm:$0xf] }
  0x22   : > { %1251 = vmatmul.msk.bf16.gmra.mxu3 %vm518_vm0, %v1128_v24  ;;  %v1168_v20 = vor.u32 %v1302_v14, %v1165_v16  ;;  %v1069_v24 = vld [vmem:[%s1395_s26 + $0x78] sm:$0xf0]  ;;  %v1303_v44 = vld [vmem:[%s1395_s26 + $0x134] sm:$0xf0]  ;;  %v1068_v46 = vor.u32 %v1279_v42, %v1067_v40  ;;  %v1308_v54 = vld [vmem:[%s1395_s26 + $0x164] sm:$0xf] }
  0x23   : > { %v1164_v47 = vor.u32 %v1303_v44, %v1163_v43  ;;  %v1085_v51 = vld [vmem:[%s1395_s26 + $0x98] sm:$0xf0]  ;;  %v1075_v55 = vld [vmem:[%s1395_s26 + $0x80] sm:$0xf]  ;;  %v1189_v56 = vld [vmem:[%s1395_s26 + $0x168] sm:$0xf0] }
  0x24   : > { %597 = vmatpush.bf16.msra.mxu0 %v1313_v15  ;;  %1327 = vmatpush.bf16.msra.mxu2 %v1313_v15  ;;  %v1051_v15 = vld [vmem:[%s1395_s26 + $0x50] sm:$0xf]  ;;  %v1281_v57 = vld [vmem:[%s1395_s26 + $0x84] sm:$0xf0]  ;;  %v1171_v58 = vld [vmem:[%s1395_s26 + $0x140] sm:$0xf] }
  0x25   : > { %v1052_v21 = vor.u32 %v1275_v17, %v1051_v15  ;;  %v1305_v59 = vld [vmem:[%s1395_s26 + $0x144] sm:$0xf0]  ;;  %v1076_v63 = vor.u32 %v1281_v57, %v1075_v55  ;;  %v1310_v14 = vld [vmem:[%s1395_s26 + $0x174] sm:$0xf]  ;;  %v1083_v16 = vld [vmem:[%s1395_s26 + $0x90] sm:$0xf] }
  0x26   : > { %v1172_v0 = vor.u32 %v1305_v59, %v1171_v58  ;;  %v1197_v17 = vld [vmem:[%s1395_s26 + $0x178] sm:$0xf0]  ;;  %v1091_v44 = vld [vmem:[%s1395_s26 + $0xa0] sm:$0xf] }
  0x28   : > { %598 = vmatpush.bf16.msra.mxu0 %v1312_v19  ;;  %1328 = vmatpush.bf16.msra.mxu2 %v1312_v19  ;;  %v1299_v19 = vld [vmem:[%s1395_s26 + $0x114] sm:$0xf0] }
  0x29   : > { %v1148_v22 = vor.u32 %v1299_v19, %v1147_v18  ;;  %v1283_v18 = vld [vmem:[%s1395_s26 + $0x94] sm:$0xf0]  ;;  %v1179_v19 = vld [vmem:[%s1395_s26 + $0x150] sm:$0xf] }
  0x2b   : > { %599 = vmatmul.bf16.vlgmr.msra.gmra.mxu0 %v1012_v25  ;;  %659 = vmatmul.bf16.vlgmr.msra.gmra.mxu2 %v1108_v26  ;;  %v1072_v25 = vor.u32 %v1278_v23, %v1069_v24  ;;  %v1304_v26 = vld [vmem:[%s1395_s26 + $0x144] sm:$0xf]  ;;  %v1200_v23 = vor.u32 %v1310_v14, %v1197_v17  ;;  %v1195_v14 = vld [vmem:[%s1395_s26 + $0x170] sm:$0xf] }
  0x2c   : > { %v1176_v32 = vor.u32 %v1304_v26, %v1173_v28 }
  0x31   : > { %1239 = vmatmul.msk.bf16.gmra.mxu1 %vm518_vm0, %v1032_v29  ;;  %v1277_v29 = vld [vmem:[%s1395_s26 + $0x64] sm:$0xf0] }
  0x32   : > { %1252 = vmatmul.msk.bf16.gmra.mxu3 %vm518_vm0, %v1136_v36  ;;  %v1060_v33 = vor.u32 %v1277_v29, %v1059_v27  ;;  %v1077_v36 = vld [vmem:[%s1395_s26 + $0x88] sm:$0xf0] }
  0x3b   : > { %604 = vmatmul.bf16.gmra.mxu0 %v1020_v37  ;;  %664 = vmatmul.bf16.gmra.mxu2 %v1116_v38  ;;  %v1080_v37 = vor.u32 %v1280_v35, %v1077_v36 }
  0x41   : > { %1240 = vmatmul.msk.bf16.gmra.mxu1 %vm518_vm0, %v1040_v41  ;;  %v1181_v41 = vld [vmem:[%s1395_s26 + $0x158] sm:$0xf0] }
  0x42   : > { %1253 = vmatmul.msk.bf16.gmra.mxu3 %vm518_vm0, %v1144_v48  ;;  %v1184_v45 = vor.u32 %v1306_v39, %v1181_v41 }
  0x4b   : > { %609 = vmatmul.bf16.gmra.mxu0 %v1028_v49  ;;  %669 = vmatmul.bf16.gmra.mxu2 %v1124_v50  ;;  %v1282_v50 = vld [vmem:[%s1395_s26 + $0x94] sm:$0xf] }
  0x4c   : > { %v1088_v52 = vor.u32 %v1282_v50, %v1085_v51 }
  0x51   : > { %1241 = vmatmul.msk.bf16.gmra.mxu1 %vm518_vm0, %v1048_v53 }
  0x52   : > { %1254 = vmatmul.msk.bf16.gmra.mxu3 %vm518_vm0, %v1152_v60 }
  0x5b   : > { %614 = vmatmul.bf16.gmra.mxu0 %v1036_v61  ;;  %674 = vmatmul.bf16.gmra.mxu2 %v1132_v62  ;;  %v1514_v61 = vld [vmem:[%s1666_s2] ss:$0 sm:$0xff]  ;;  %v1192_v62 = vor.u32 %v1308_v54, %v1189_v56 }
  0x61   : > { %1242 = vmatmul.msk.bf16.gmra.mxu1 %vm518_vm0, %v1056_v1 }
  0x62   : > { %1255 = vmatmul.msk.bf16.gmra.mxu3 %vm518_vm0, %v1160_v8  ;;  %v1284_v8 = vld [vmem:[%s1395_s26 + $0xa4] sm:$0xf] }
  0x6b   : > { %619 = vmatmul.bf16.gmra.mxu0 %v1044_v9  ;;  %679 = vmatmul.bf16.gmra.mxu2 %v1140_v10  ;;  %v1093_v9 = vld [vmem:[%s1395_s26 + $0xa8] sm:$0xf0] }
  0x6c   : > { %v1096_v12 = vor.u32 %v1284_v8, %v1093_v9 }
  0x71   : > { %1243 = vmatmul.msk.bf16.gmra.mxu1 %vm518_vm0, %v1064_v13 }
  0x72   : > { %1256 = vmatmul.msk.bf16.gmra.mxu3 %vm518_vm0, %v1168_v20  ;;  %v1307_v20 = vld [vmem:[%s1395_s26 + $0x154] sm:$0xf0] }
  0x73   : > { %v1180_v26 = vor.u32 %v1307_v20, %v1179_v19 }
  0x7b   : > { %624 = vmatmul.bf16.gmra.mxu0 %v1052_v21  ;;  %684 = vmatmul.bf16.gmra.mxu2 %v1148_v22 }
  0x81   : > { %1244 = vmatmul.msk.bf16.gmra.mxu1 %vm518_vm0, %v1072_v25  ;;  %v1084_v25 = vor.u32 %v1283_v18, %v1083_v16 }
  0x82   : > { %1257 = vmatmul.msk.bf16.gmra.mxu3 %vm518_vm0, %v1176_v32 }
  0x8b   : > { %629 = vmatmul.bf16.gmra.mxu0 %v1060_v33  ;;  %689 = vmatmul.bf16.gmra.mxu2 %v1156_v34  ;;  %v1286_v33 = vld [vmem:[%s1395_s26 + $0xb4] sm:$0xf]  ;;  %v1101_v34 = vld [vmem:[%s1395_s26 + $0xb8] sm:$0xf0] }
  0x8c   : > { %v1104_v40 = vor.u32 %v1286_v33, %v1101_v34 }
  0x8e   : > { %v729_v38 = vpop.f32.mrf.mxu1 }
  0x91   : > { %1245 = vmatmul.msk.bf16.gmra.mxu1 %vm518_vm0, %v1080_v37 }
  0x92   : > { %1258 = vmatmul.msk.bf16.gmra.mxu3 %vm518_vm0, %v1184_v45  ;;  %v1285_v45 = vld [vmem:[%s1395_s26 + $0xa4] sm:$0xf0] }
  0x93   : > { %v1092_v51 = vor.u32 %v1285_v45, %v1091_v44 }
  0x95   : > { %v1498_v49 = vpop.f32.mrf.mxu3 }
  0x96   : > { %v731_v48 = vpop.f32.mrf.mxu1 }
  0x9b   : > { %634 = vmatmul.bf16.gmra.mxu0 %v1068_v46  ;;  %694 = vmatmul.bf16.gmra.mxu2 %v1164_v47  ;;  %v1187_v46 = vld [vmem:[%s1395_s26 + $0x160] sm:$0xf]  ;;  %v1309_v47 = vld [vmem:[%s1395_s26 + $0x164] sm:$0xf0] }
  0x9d   : > { %v1508_v60 = vpop.f32.mrf.mxu3 }
  0x9e   : > { %v734_v53 = vpop.f32.mrf.mxu1 }
  0xa1   : > { %1246 = vmatmul.msk.bf16.gmra.mxu1 %vm518_vm0, %v1088_v52  ;;  %v1188_v52 = vor.u32 %v1309_v47, %v1187_v46 }
  0xa2   : > { %1259 = vmatmul.msk.bf16.gmra.mxu3 %vm518_vm0, %v1192_v62 }
  0xa5   : > { %v1525_v5 = vpop.f32.mrf.mxu3 }
  0xa6   : > { %v736_v3 = vpop.f32.mrf.mxu1 }
  0xa8   : > { %v600_v1 = vpop.f32.mrf.mxu0 }
  0xa9   : > { %v601_v2 = vadd.f32 %v1514_v61, %v600_v1  ;;  %v1109_v1 = vld [vmem:[%s1395_s26 + $0xc8] sm:$0xf0] }
  0xab   : > { %v730_v4 = vadd.f32 %v729_v38, %v601_v2  ;;  %639 = vmatmul.bf16.gmra.mxu0 %v1076_v63  ;;  %699 = vmatmul.bf16.gmra.mxu2 %v1172_v0  ;;  %v1288_v0 = vld [vmem:[%s1395_s26 + $0xc4] sm:$0xf] }
  0xad   : > { %v849_v6 = vmax.f32 %v730_v4, 0.0  ;;  %v1539_v21 = vpop.f32.mrf.mxu3 }
  0xae   : > { %v1527_v7 = vpop.f32.mrf.mxu2  ;;  %v739_v13 = vpop.f32.mrf.mxu1 }
  0xaf   : > { %897 = vst [vmem:[%s1523_s15] sm:$0xff] %v849_v6  ;;  %v1112_v6 = vor.u32 %v1288_v0, %v1109_v1 }
  0xb0   : > { %v602_v10 = vpop.f32.mrf.mxu0 }
  0xb1   : > { %v603_v11 = vadd.f32 %v1514_v61, %v602_v10  ;;  %1247 = vmatmul.msk.bf16.gmra.mxu1 %vm518_vm0, %v1096_v12  ;;  %v1099_v12 = vld [vmem:[%s1395_s26 + $0xb0] sm:$0xf] }
  0xb2   : > { %1260 = vmatmul.msk.bf16.gmra.mxu3 %vm518_vm0, %v1200_v23 }
  0xb3   : > { %v732_v15 = vadd.f32 %v731_v48, %v603_v11 }
  0xb5   : > { %v850_v22 = vmax.f32 %v732_v15, 0.0  ;;  %v1549_v35 = vpop.f32.mrf.mxu3  ;;  %v1311_v15 = vld [vmem:[%s1395_s26 + $0x174] sm:$0xf0] }
  0xb6   : > { %v1542_v24 = vpop.f32.mrf.mxu2  ;;  %v741_v29 = vpop.f32.mrf.mxu1  ;;  %v1196_v19 = vor.u32 %v1311_v15, %v1195_v14 }
  0xb7   : > { %898 = vst [vmem:[%s1523_s15 + $0x8] sm:$0xff] %v850_v22 }
  0xb8   : > { %v605_v27 = vpop.f32.mrf.mxu0 }
  0xb9   : > { %v606_v28 = vadd.f32 %v1514_v61, %v605_v27 }
  0xbb   : > { %v735_v30 = vadd.f32 %v734_v53, %v606_v28  ;;  %644 = vmatmul.bf16.gmra.mxu0 %v1084_v25  ;;  %704 = vmatmul.bf16.gmra.mxu2 %v1180_v26 }
  0xbd   : > { %v851_v31 = vmax.f32 %v735_v30, 0.0  ;;  %v806_v54 = vpop.f32.mrf.mxu3 }
  0xbe   : > { %v665_v32 = vpop.f32.mrf.mxu2  ;;  %v744_v41 = vpop.f32.mrf.mxu1 }
  0xbf   : > { %899 = vst [vmem:[%s1523_s15 + $0x10] sm:$0xff] %v851_v31  ;;  %v666_v36 = vadd.f32 %v1514_v61, %v665_v32 }
  0xc0   : > { %v607_v37 = vpop.f32.mrf.mxu0 }
  0xc1   : > { %v795_v38 = vadd.f32 %v1498_v49, %v666_v36  ;;  %v608_v39 = vadd.f32 %v1514_v61, %v607_v37  ;;  %1248 = vmatmul.msk.bf16.gmra.mxu1 %vm518_vm0, %v1104_v40 }
  0xc3   : > { %v875_v42 = vmax.f32 %v795_v38, 0.0  ;;  %v737_v43 = vadd.f32 %v736_v3, %v608_v39 }
  0xc5   : > { %923 = vst [vmem:[%s1523_s15 + $0xd0] sm:$0xff] %v875_v42  ;;  %v852_v48 = vmax.f32 %v737_v43, 0.0  ;;  %v809_v9 = vpop.f32.mrf.mxu3 }
  0xc6   : > { %v667_v50 = vpop.f32.mrf.mxu2  ;;  %v746_v57 = vpop.f32.mrf.mxu1 }
  0xc7   : > { %900 = vst [vmem:[%s1523_s15 + $0x18] sm:$0xff] %v852_v48  ;;  %v668_v49 = vadd.f32 %v1514_v61, %v667_v50 }
  0xc8   : > { %v610_v53 = vpop.f32.mrf.mxu0 }
  0xc9   : > { %v797_v55 = vadd.f32 %v1508_v60, %v668_v49  ;;  %v611_v56 = vadd.f32 %v1514_v61, %v610_v53 }
  0xcb   : > { %v876_v58 = vmax.f32 %v797_v55, 0.0  ;;  %v740_v59 = vadd.f32 %v739_v13, %v611_v56  ;;  %649 = vmatmul.bf16.gmra.mxu0 %v1092_v51  ;;  %709 = vmatmul.bf16.gmra.mxu2 %v1188_v52  ;;  %v1287_v13 = vld [vmem:[%s1395_s26 + $0xb4] sm:$0xf0] }
  0xcc   : > { %v1100_v18 = vor.u32 %v1287_v13, %v1099_v12 }
  0xcd   : > { %924 = vst [vmem:[%s1523_s15 + $0xd8] sm:$0xff] %v876_v58  ;;  %v853_v62 = vmax.f32 %v740_v59, 0.0  ;;  %v811_v28 = vpop.f32.mrf.mxu3 }
  0xce   : > { %v670_v63 = vpop.f32.mrf.mxu2  ;;  %v749_v8 = vpop.f32.mrf.mxu1 }
  0xcf   : > { %901 = vst [vmem:[%s1523_s15 + $0x20] sm:$0xff] %v853_v62  ;;  %v671_v60 = vadd.f32 %v1514_v61, %v670_v63 }
  0xd0   : > { %v612_v2 = vpop.f32.mrf.mxu0 }
  0xd1   : > { %v800_v3 = vadd.f32 %v1525_v5, %v671_v60  ;;  %v613_v4 = vadd.f32 %v1514_v61, %v612_v2  ;;  %1249 = vmatmul.msk.bf16.gmra.mxu1 %vm518_vm0, %v1112_v6 }
  0xd3   : > { %v877_v10 = vmax.f32 %v800_v3, 0.0  ;;  %v742_v11 = vadd.f32 %v741_v29, %v613_v4 }
  0xd5   : > { %925 = vst [vmem:[%s1523_s15 + $0xe0] sm:$0xff] %v877_v10  ;;  %v854_v16 = vmax.f32 %v742_v11, 0.0  ;;  %v814_v40 = vpop.f32.mrf.mxu3 }
  0xd6   : > { %v672_v17 = vpop.f32.mrf.mxu2  ;;  %v751_v25 = vpop.f32.mrf.mxu1 }
  0xd7   : > { %902 = vst [vmem:[%s1523_s15 + $0x28] sm:$0xff] %v854_v16  ;;  %v673_v5 = vadd.f32 %v1514_v61, %v672_v17 }
  0xd8   : > { %v615_v20 = vpop.f32.mrf.mxu0 }
  0xd9   : > { %v802_v22 = vadd.f32 %v1539_v21, %v673_v5  ;;  %v616_v23 = vadd.f32 %v1514_v61, %v615_v20 }
  0xdb   : > { %v878_v26 = vmax.f32 %v802_v22, 0.0  ;;  %v745_v27 = vadd.f32 %v744_v41, %v616_v23  ;;  %654 = vmatmul.bf16.gmra.mxu0 %v1100_v18  ;;  %714 = vmatmul.bf16.gmra.mxu2 %v1196_v19 }
  0xdd   : > { %926 = vst [vmem:[%s1523_s15 + $0xe8] sm:$0xff] %v878_v26  ;;  %v855_v29 = vmax.f32 %v745_v27, 0.0  ;;  %v816_v51 = vpop.f32.mrf.mxu3 }
  0xde   : > { %v675_v30 = vpop.f32.mrf.mxu2  ;;  %v754_v34 = vpop.f32.mrf.mxu1 }
  0xdf   : > { %903 = vst [vmem:[%s1523_s15 + $0x30] sm:$0xff] %v855_v29  ;;  %v676_v31 = vadd.f32 %v1514_v61, %v675_v30 }
  0xe0   : > { %v617_v32 = vpop.f32.mrf.mxu0 }
  0xe1   : > { %v805_v33 = vadd.f32 %v1549_v35, %v676_v31  ;;  %v618_v21 = vadd.f32 %v1514_v61, %v617_v32 }
  0xe3   : > { %v879_v36 = vmax.f32 %v805_v33, 0.0  ;;  %v747_v37 = vadd.f32 %v746_v57, %v618_v21 }
  0xe5   : > { %927 = vst [vmem:[%s1523_s15 + $0xf0] sm:$0xff] %v879_v36  ;;  %v856_v38 = vmax.f32 %v747_v37, 0.0  ;;  %v819_v60 = vpop.f32.mrf.mxu3 }
  0xe6   : > { %v677_v39 = vpop.f32.mrf.mxu2  ;;  %v756_v35 = vpop.f32.mrf.mxu1 }
  0xe7   : > { %904 = vst [vmem:[%s1523_s15 + $0x38] sm:$0xff] %v856_v38  ;;  %v678_v41 = vadd.f32 %v1514_v61, %v677_v39 }
  0xe8   : > { %v620_v42 = vpop.f32.mrf.mxu0 }
  0xe9   : > { %v807_v43 = vadd.f32 %v806_v54, %v678_v41  ;;  %v621_v44 = vadd.f32 %v1514_v61, %v620_v42 }
  0xeb   : > { %v880_v45 = vmax.f32 %v807_v43, 0.0  ;;  %v750_v46 = vadd.f32 %v749_v8, %v621_v44 }
  0xed   : > { %928 = vst [vmem:[%s1523_s15 + $0xf8] sm:$0xff] %v880_v45  ;;  %v857_v47 = vmax.f32 %v750_v46, 0.0  ;;  %v821_v15 = vpop.f32.mrf.mxu3 }
  0xee   : > { %v680_v48 = vpop.f32.mrf.mxu2  ;;  %v759_v54 = vpop.f32.mrf.mxu1 }
  0xef   : > { %905 = vst [vmem:[%s1523_s15 + $0x40] sm:$0xff] %v857_v47  ;;  %v681_v50 = vadd.f32 %v1514_v61, %v680_v48 }
  0xf0   : > { %v622_v49 = vpop.f32.mrf.mxu0 }
  0xf1   : > { %v810_v52 = vadd.f32 %v809_v9, %v681_v50  ;;  %v623_v53 = vadd.f32 %v1514_v61, %v622_v49 }
  0xf3   : > { %v881_v55 = vmax.f32 %v810_v52, 0.0  ;;  %v752_v56 = vadd.f32 %v751_v25, %v623_v53 }
  0xf5   : > { %929 = vst [vmem:[%s1523_s15 + $0x100] sm:$0xff] %v881_v55  ;;  %v858_v57 = vmax.f32 %v752_v56, 0.0 }
  0xf6   : > { %v682_v58 = vpop.f32.mrf.mxu2  ;;  %v761_v1 = vpop.f32.mrf.mxu1 }
  0xf7   : > { %906 = vst [vmem:[%s1523_s15 + $0x48] sm:$0xff] %v858_v57  ;;  %v683_v59 = vadd.f32 %v1514_v61, %v682_v58 }
  0xf8   : > { %v625_v62 = vpop.f32.mrf.mxu0 }
  0xf9   : > { %v812_v63 = vadd.f32 %v811_v28, %v683_v59  ;;  %v626_v0 = vadd.f32 %v1514_v61, %v625_v62  ;;  %v824_v28 = vpop.f32.mrf.mxu3 }
  0xfb   : > { %v882_v2 = vmax.f32 %v812_v63, 0.0  ;;  %v755_v3 = vadd.f32 %v754_v34, %v626_v0 }
  0xfd   : > { %930 = vst [vmem:[%s1523_s15 + $0x108] sm:$0xff] %v882_v2  ;;  %v859_v4 = vmax.f32 %v755_v3, 0.0 }
  0xfe   : > { %v685_v6 = vpop.f32.mrf.mxu2  ;;  %v764_v12 = vpop.f32.mrf.mxu1 }
  0xff   : > { %907 = vst [vmem:[%s1523_s15 + $0x50] sm:$0xff] %v859_v4  ;;  %v686_v8 = vadd.f32 %v1514_v61, %v685_v6 }
 0x100   : > { %v627_v9 = vpop.f32.mrf.mxu0 }
 0x101   : > { %v815_v10 = vadd.f32 %v814_v40, %v686_v8  ;;  %v628_v11 = vadd.f32 %v1514_v61, %v627_v9  ;;  %v826_v40 = vpop.f32.mrf.mxu3 }
 0x103   : > { %v883_v13 = vmax.f32 %v815_v10, 0.0  ;;  %v757_v14 = vadd.f32 %v756_v35, %v628_v11 }
 0x105   : > { %931 = vst [vmem:[%s1523_s15 + $0x110] sm:$0xff] %v883_v13  ;;  %v860_v16 = vmax.f32 %v757_v14, 0.0 }
 0x106   : > { %v687_v17 = vpop.f32.mrf.mxu2  ;;  %v766_v22 = vpop.f32.mrf.mxu1 }
 0x107   : > { %908 = vst [vmem:[%s1523_s15 + $0x58] sm:$0xff] %v860_v16  ;;  %v688_v5 = vadd.f32 %v1514_v61, %v687_v17 }
 0x108   : > { %v630_v18 = vpop.f32.mrf.mxu0 }
 0x109   : > { %v817_v19 = vadd.f32 %v816_v51, %v688_v5  ;;  %v631_v20 = vadd.f32 %v1514_v61, %v630_v18  ;;  %v829_v52 = vpop.f32.mrf.mxu3 }
 0x10b   : > { %v884_v23 = vmax.f32 %v817_v19, 0.0  ;;  %v760_v25 = vadd.f32 %v759_v54, %v631_v20 }
 0x10d   : > { %932 = vst [vmem:[%s1523_s15 + $0x118] sm:$0xff] %v884_v23  ;;  %v861_v26 = vmax.f32 %v760_v25, 0.0 }
 0x10e   : > { %v690_v27 = vpop.f32.mrf.mxu2  ;;  %v769_v33 = vpop.f32.mrf.mxu1 }
 0x10f   : > { %909 = vst [vmem:[%s1523_s15 + $0x60] sm:$0xff] %v861_v26  ;;  %v691_v29 = vadd.f32 %v1514_v61, %v690_v27 }
 0x110   : > { %v632_v30 = vpop.f32.mrf.mxu0 }
 0x111   : > { %v820_v31 = vadd.f32 %v819_v60, %v691_v29  ;;  %v633_v32 = vadd.f32 %v1514_v61, %v632_v30  ;;  %v831_v60 = vpop.f32.mrf.mxu3 }
 0x113   : > { %v885_v21 = vmax.f32 %v820_v31, 0.0  ;;  %v762_v34 = vadd.f32 %v761_v1, %v633_v32 }
 0x115   : > { %933 = vst [vmem:[%s1523_s15 + $0x120] sm:$0xff] %v885_v21  ;;  %v862_v36 = vmax.f32 %v762_v34, 0.0 }
 0x116   : > { %v692_v37 = vpop.f32.mrf.mxu2  ;;  %v771_v43 = vpop.f32.mrf.mxu1 }
 0x117   : > { %910 = vst [vmem:[%s1523_s15 + $0x68] sm:$0xff] %v862_v36  ;;  %v693_v38 = vadd.f32 %v1514_v61, %v692_v37 }
 0x118   : > { %v635_v39 = vpop.f32.mrf.mxu0 }
 0x119   : > { %v822_v41 = vadd.f32 %v821_v15, %v693_v38  ;;  %v636_v42 = vadd.f32 %v1514_v61, %v635_v39  ;;  %v834_v15 = vpop.f32.mrf.mxu3 }
 0x11b   : > { %v886_v44 = vmax.f32 %v822_v41, 0.0  ;;  %v765_v35 = vadd.f32 %v764_v12, %v636_v42 }
 0x11d   : > { %934 = vst [vmem:[%s1523_s15 + $0x128] sm:$0xff] %v886_v44  ;;  %v863_v45 = vmax.f32 %v765_v35, 0.0 }
 0x11e   : > { %v695_v46 = vpop.f32.mrf.mxu2  ;;  %v774_v51 = vpop.f32.mrf.mxu1 }
 0x11f   : > { %911 = vst [vmem:[%s1523_s15 + $0x70] sm:$0xff] %v863_v45  ;;  %v696_v47 = vadd.f32 %v1514_v61, %v695_v46 }
 0x120   : > { %v637_v48 = vpop.f32.mrf.mxu0 }
 0x121   : > { %v825_v50 = vadd.f32 %v824_v28, %v696_v47  ;;  %v638_v49 = vadd.f32 %v1514_v61, %v637_v48  ;;  %v836_v28 = vpop.f32.mrf.mxu3  ;;  %v661_v47 = vadd.f32 %v1514_v61, %v1527_v7 }
 0x123   : > { %v887_v53 = vmax.f32 %v825_v50, 0.0  ;;  %v767_v54 = vadd.f32 %v766_v22, %v638_v49 }
 0x125   : > { %935 = vst [vmem:[%s1523_s15 + $0x130] sm:$0xff] %v887_v53  ;;  %v864_v55 = vmax.f32 %v767_v54, 0.0 }
 0x126   : > { %v697_v56 = vpop.f32.mrf.mxu2  ;;  %v776_v63 = vpop.f32.mrf.mxu1 }
 0x127   : > { %912 = vst [vmem:[%s1523_s15 + $0x78] sm:$0xff] %v864_v55  ;;  %v698_v57 = vadd.f32 %v1514_v61, %v697_v56 }
 0x128   : > { %v640_v58 = vpop.f32.mrf.mxu0 }
 0x129   : > { %v827_v59 = vadd.f32 %v826_v40, %v698_v57  ;;  %v641_v62 = vadd.f32 %v1514_v61, %v640_v58  ;;  %v839_v40 = vpop.f32.mrf.mxu3 }
 0x12b   : > { %v888_v0 = vmax.f32 %v827_v59, 0.0  ;;  %v770_v1 = vadd.f32 %v769_v33, %v641_v62  ;;  %v663_v59 = vadd.f32 %v1514_v61, %v1542_v24 }
 0x12d   : > { %936 = vst [vmem:[%s1523_s15 + $0x138] sm:$0xff] %v888_v0  ;;  %v865_v2 = vmax.f32 %v770_v1, 0.0 }
 0x12e   : > { %v700_v3 = vpop.f32.mrf.mxu2  ;;  %v779_v10 = vpop.f32.mrf.mxu1 }
 0x12f   : > { %913 = vst [vmem:[%s1523_s15 + $0x80] sm:$0xff] %v865_v2  ;;  %v701_v4 = vadd.f32 %v1514_v61, %v700_v3 }
 0x130   : > { %v642_v6 = vpop.f32.mrf.mxu0 }
 0x131   : > { %v830_v8 = vadd.f32 %v829_v52, %v701_v4  ;;  %v643_v9 = vadd.f32 %v1514_v61, %v642_v6  ;;  %v841_v54 = vpop.f32.mrf.mxu3 }
 0x133   : > { %v889_v11 = vmax.f32 %v830_v8, 0.0  ;;  %v772_v12 = vadd.f32 %v771_v43, %v643_v9 }
 0x135   : > { %937 = vst [vmem:[%s1523_s15 + $0x140] sm:$0xff] %v889_v11  ;;  %v866_v13 = vmax.f32 %v772_v12, 0.0 }
 0x136   : > { %v702_v14 = vpop.f32.mrf.mxu2  ;;  %v781_v19 = vpop.f32.mrf.mxu1 }
 0x137   : > { %914 = vst [vmem:[%s1523_s15 + $0x88] sm:$0xff] %v866_v13  ;;  %v703_v16 = vadd.f32 %v1514_v61, %v702_v14 }
 0x138   : > { %v645_v17 = vpop.f32.mrf.mxu0 }
 0x139   : > { %v832_v5 = vadd.f32 %v831_v60, %v703_v16  ;;  %v646_v18 = vadd.f32 %v1514_v61, %v645_v17  ;;  %v844_v6 = vpop.f32.mrf.mxu3 }
 0x13b   : > { %v890_v20 = vmax.f32 %v832_v5, 0.0  ;;  %v775_v22 = vadd.f32 %v774_v51, %v646_v18 }
 0x13d   : > { %938 = vst [vmem:[%s1523_s15 + $0x148] sm:$0xff] %v890_v20  ;;  %v867_v23 = vmax.f32 %v775_v22, 0.0 }
 0x13e   : > { %v705_v25 = vpop.f32.mrf.mxu2  ;;  %v784_v31 = vpop.f32.mrf.mxu1 }
 0x13f   : > { %915 = vst [vmem:[%s1523_s15 + $0x90] sm:$0xff] %v867_v23  ;;  %v706_v26 = vadd.f32 %v1514_v61, %v705_v25 }
 0x140   : > { %v647_v27 = vpop.f32.mrf.mxu0 }
 0x141   : > { %v835_v29 = vadd.f32 %v834_v15, %v706_v26  ;;  %v648_v30 = vadd.f32 %v1514_v61, %v647_v27  ;;  %v846_v17 = vpop.f32.mrf.mxu3 }
 0x143   : > { %v891_v32 = vmax.f32 %v835_v29, 0.0  ;;  %v777_v33 = vadd.f32 %v776_v63, %v648_v30 }
 0x145   : > { %939 = vst [vmem:[%s1523_s15 + $0x150] sm:$0xff] %v891_v32  ;;  %v868_v21 = vmax.f32 %v777_v33, 0.0 }
 0x146   : > { %v707_v34 = vpop.f32.mrf.mxu2  ;;  %v786_v41 = vpop.f32.mrf.mxu1 }
 0x147   : > { %916 = vst [vmem:[%s1523_s15 + $0x98] sm:$0xff] %v868_v21  ;;  %v708_v36 = vadd.f32 %v1514_v61, %v707_v34 }
 0x148   : > { %v650_v37 = vpop.f32.mrf.mxu0 }
 0x149   : > { %v837_v38 = vadd.f32 %v836_v28, %v708_v36  ;;  %v651_v39 = vadd.f32 %v1514_v61, %v650_v37 }
 0x14b   : > { %v892_v42 = vmax.f32 %v837_v38, 0.0  ;;  %v780_v43 = vadd.f32 %v779_v10, %v651_v39 }
 0x14d   : > { %940 = vst [vmem:[%s1523_s15 + $0x158] sm:$0xff] %v892_v42  ;;  %v869_v44 = vmax.f32 %v780_v43, 0.0 }
 0x14e   : > { %v710_v35 = vpop.f32.mrf.mxu2  ;;  %v789_v49 = vpop.f32.mrf.mxu1 }
 0x14f   : > { %917 = vst [vmem:[%s1523_s15 + $0xa0] sm:$0xff] %v869_v44  ;;  %v711_v45 = vadd.f32 %v1514_v61, %v710_v35  ;;  %v790_v53 = vadd.f32 %v789_v49, %v661_v47 }
 0x150   : > { %v652_v46 = vpop.f32.mrf.mxu0 }
 0x151   : > { %v840_v48 = vadd.f32 %v839_v40, %v711_v45  ;;  %v653_v50 = vadd.f32 %v1514_v61, %v652_v46  ;;  %v873_v56 = vmax.f32 %v790_v53, 0.0 }
 0x153   : > { %v893_v51 = vmax.f32 %v840_v48, 0.0  ;;  %v782_v52 = vadd.f32 %v781_v19, %v653_v50  ;;  %921 = vst [vmem:[%s1523_s15 + $0xc0] sm:$0xff] %v873_v56 }
 0x155   : > { %941 = vst [vmem:[%s1523_s15 + $0x160] sm:$0xff] %v893_v51  ;;  %v870_v55 = vmax.f32 %v782_v52, 0.0 }
 0x156   : > { %v712_v57 = vpop.f32.mrf.mxu2  ;;  %v791_v0 = vpop.f32.mrf.mxu1 }
 0x157   : > { %918 = vst [vmem:[%s1523_s15 + $0xa8] sm:$0xff] %v870_v55  ;;  %v713_v58 = vadd.f32 %v1514_v61, %v712_v57  ;;  %v792_v2 = vadd.f32 %v791_v0, %v663_v59 }
 0x158   : > { %v655_v7 = vpop.f32.mrf.mxu0 }
 0x159   : > { %v842_v62 = vadd.f32 %v841_v54, %v713_v58  ;;  %v656_v63 = vadd.f32 %v1514_v61, %v655_v7  ;;  %v874_v4 = vmax.f32 %v792_v2, 0.0 }
 0x15b   : > { %v894_v1 = vmax.f32 %v842_v62, 0.0  ;;  %v785_v60 = vadd.f32 %v784_v31, %v656_v63  ;;  %922 = vst [vmem:[%s1523_s15 + $0xc8] sm:$0xff] %v874_v4 }
 0x15d   : > { %942 = vst [vmem:[%s1523_s15 + $0x168] sm:$0xff] %v894_v1  ;;  %v871_v3 = vmax.f32 %v785_v60, 0.0 }
 0x15e   : > { %v715_v8 = vpop.f32.mrf.mxu2 }
 0x15f   : > { %919 = vst [vmem:[%s1523_s15 + $0xb0] sm:$0xff] %v871_v3  ;;  %v716_v9 = vadd.f32 %v1514_v61, %v715_v8 }
 0x160   : > { %v657_v24 = vpop.f32.mrf.mxu0 }
 0x161   : > { %v845_v10 = vadd.f32 %v844_v6, %v716_v9  ;;  %v658_v11 = vadd.f32 %v1514_v61, %v657_v24 }
 0x163   : > { %v895_v12 = vmax.f32 %v845_v10, 0.0  ;;  %v787_v13 = vadd.f32 %v786_v41, %v658_v11 }
 0x165   : > { %943 = vst [vmem:[%s1523_s15 + $0x170] sm:$0xff] %v895_v12  ;;  %v872_v14 = vmax.f32 %v787_v13, 0.0 }
 0x166   : > { %v717_v15 = vpop.f32.mrf.mxu2 }
 0x167   : > { %920 = vst [vmem:[%s1523_s15 + $0xb8] sm:$0xff] %v872_v14  ;;  %v718_v16 = vadd.f32 %v1514_v61, %v717_v15 }
 0x169   : > { %v847_v5 = vadd.f32 %v846_v17, %v718_v16 }
 0x16b   : > { %v896_v18 = vmax.f32 %v847_v5, 0.0 }
 0x16d   : > { %944 = vst [vmem:[%s1523_s15 + $0x178] sm:$0xff] %v896_v18 }
 0x16e PF: > { %s13_s12 = sadd.s32 1, %s1345_s12  }
 0x16f   : > { %p10_p4 = scmp.ge.s32.totalorder %s13_s12, 5  }
 0x171   :  { %12 = sbr.rel (!%p10_p4) target bundleno = 1 (0x1), region = 62 }

// kernel: peleenet_forward.28
= control target key start
LH: loop header
LB: loop body
LE: loop exit
PB: predicated region body
PF: predicated region fallthrough
CT: control target
= control target key end

     0   :  { %s548_s12 = smov 0   ;;  %s627_s0 = inlined_call_operand.vmem [shape: bf16[288,32], index: 0, kind: input, shape index: {}]   ;;  %s628_s1 = inlined_call_operand.vmem [shape: bf16[32,128], index: 1, kind: input, shape index: {}]   ;;  %s629_s2 = inlined_call_operand.vmem [shape: f32[1,128], index: 2, kind: input, shape index: {}]   ;;  %s630_s3 = inlined_call_operand.vmem [shape: f32[288,128], index: 3, kind: output, shape index: {}]  }
   0x1 LB: > { %s432_s13 = sadd.s32 4294967295, %s526_s12   ;;  %p436_p0 = scmp.ge.s32.totalorder %s526_s12, 1  ;;  %s526_s12 = sphi %s548_s12, %s13_s12  }
   0x2   : > { %p138_p1 = scmp.lt.s32.totalorder %s526_s12, 3 }
   0x4   : > { %p139_p2 = pnand %p436_p0, %p138_p1 }
   0x5   : > { %s162_s16 = smul.u32 (!%p139_p2), 18, %s432_s13 }
   0x6   : > { %142 = sbr.rel (%p139_p2) target bundleno = 196 (0xc4), region = 32 }
   0x7   : > { %p163_p3 = scmp.lt.s32.totalorder (!%p139_p2), %s162_s16, 35 }
   0xb   : > { %v504_v0 = vld [vmem:[%s628_s1 + $0x8] sm:$0xff]  ;;  %v503_v1 = vld [vmem:[%s628_s1] sm:$0xff]  ;;  %s632_s16 = smov (!%p163_p3, %s162_s16), 35  ;;  %vm258_vm0 = vcmask 261120  }
   0xc   : > { %505 = vmatpush.bf16.msra.mxu1 %v504_v0  ;;  %507 = vmatpush.bf16.msra.mxu3 %v504_v0  ;;  %s437_s19 = sshll.u32 %s632_s16, 2  ;;  %v580_v11 = vld [vmem:[%s629_s2] ss:$0 sm:$0xff]  ;;  %s438_s25 = sshll.u32 %s632_s16, 3 }
   0xd   : > { %292 = vmatpush.bf16.msra.mxu0 %v504_v0  ;;  %506 = vmatpush.bf16.msra.mxu2 %v504_v0  ;;  %s166_s22 = scalar_lea.vmem %s627_s0, %s437_s19  ;;  %s587_s28 = scalar_lea.vmem %s630_s3, %s438_s25 }
   0xe   : > { %v496_v2 = vld [vmem:[%s166_s22 + $0x10] sm:$0xff]  ;;  %v494_v4 = vld [vmem:[%s166_s22] sm:$0xff]  ;;  %v499_v5 = vld [vmem:[%s166_s22 + $0x28] sm:$0xff] }
   0xf   : > { %v500_v3 = vld [vmem:[%s166_s22 + $0x30] sm:$0xff]  ;;  %v497_v6 = vld [vmem:[%s166_s22 + $0x18] sm:$0xff]  ;;  %v495_v8 = vld [vmem:[%s166_s22 + $0x8] sm:$0xff] }
  0x10   : > { %508 = vmatpush.bf16.msra.mxu1 %v503_v1  ;;  %510 = vmatpush.bf16.msra.mxu3 %v503_v1  ;;  %v501_v7 = vld [vmem:[%s166_s22 + $0x38] sm:$0xff]  ;;  %v498_v9 = vld [vmem:[%s166_s22 + $0x20] sm:$0xff] }
  0x11   : > { %293 = vmatpush.bf16.msra.mxu0 %v503_v1  ;;  %509 = vmatpush.bf16.msra.mxu2 %v503_v1  ;;  %v502_v10 = vld [vmem:[%s166_s22 + $0x40] sm:$0xff] }
  0x13   : > { %485 = vmatmul.msk.bf16.vlgmr.msra.gmra.mxu1 %vm258_vm0, %v496_v2  ;;  %489 = vmatmul.msk.bf16.vlgmr.msra.gmra.mxu3 %vm258_vm0, %v500_v3 }
  0x14   : > { %483 = vmatmul.msk.bf16.vlgmr.msra.gmra.mxu0 %vm258_vm0, %v494_v4  ;;  %488 = vmatmul.msk.bf16.vlgmr.msra.gmra.mxu2 %vm258_vm0, %v499_v5 }
  0x23   : > { %486 = vmatmul.msk.bf16.gmra.mxu1 %vm258_vm0, %v497_v6  ;;  %490 = vmatmul.msk.bf16.gmra.mxu3 %vm258_vm0, %v501_v7 }
  0x24   : > { %484 = vmatmul.msk.bf16.gmra.mxu0 %vm258_vm0, %v495_v8 }
  0x33   : > { %487 = vmatmul.msk.bf16.gmra.mxu1 %vm258_vm0, %v498_v9  ;;  %491 = vmatmul.msk.bf16.gmra.mxu3 %vm258_vm0, %v502_v10 }
  0x90   : > { %v305_v12 = vpop.f32.mrf.mxu1 }
  0x91   : > { %v306_v13 = vadd.f32 %v580_v11, %v305_v12  ;;  %v295_v14 = vpop.f32.mrf.mxu0 }
  0x92   : > { %v296_v15 = vadd.f32 %v580_v11, %v295_v14 }
  0x93   : > { %v344_v16 = vmax.f32 %v306_v13, 0.0 }
  0x94   : > { %v340_v17 = vmax.f32 %v296_v15, 0.0 }
  0x95   : > { %362 = vst [vmem:[%s587_s28 + $0x20] sm:$0xff] %v344_v16 }
  0x96   : > { %v325_v18 = vpop.f32.mrf.mxu3  ;;  %358 = vst [vmem:[%s587_s28] sm:$0xff] %v340_v17 }
  0x97   : > { %v326_v19 = vadd.f32 %v580_v11, %v325_v18  ;;  %v320_v20 = vpop.f32.mrf.mxu2 }
  0x98   : > { %v307_v21 = vpop.f32.mrf.mxu1  ;;  %v321_v22 = vadd.f32 %v580_v11, %v320_v20 }
  0x99   : > { %v352_v23 = vmax.f32 %v326_v19, 0.0  ;;  %v308_v24 = vadd.f32 %v580_v11, %v307_v21  ;;  %v297_v25 = vpop.f32.mrf.mxu0 }
  0x9a   : > { %v298_v26 = vadd.f32 %v580_v11, %v297_v25  ;;  %v350_v27 = vmax.f32 %v321_v22, 0.0 }
  0x9b   : > { %370 = vst [vmem:[%s587_s28 + $0x60] sm:$0xff] %v352_v23  ;;  %v345_v28 = vmax.f32 %v308_v24, 0.0 }
  0x9c   : > { %v341_v29 = vmax.f32 %v298_v26, 0.0  ;;  %368 = vst [vmem:[%s587_s28 + $0x50] sm:$0xff] %v350_v27 }
  0x9d   : > { %363 = vst [vmem:[%s587_s28 + $0x28] sm:$0xff] %v345_v28 }
  0x9e   : > { %v327_v30 = vpop.f32.mrf.mxu3  ;;  %359 = vst [vmem:[%s587_s28 + $0x8] sm:$0xff] %v341_v29 }
  0x9f   : > { %v328_v31 = vadd.f32 %v580_v11, %v327_v30  ;;  %v322_v32 = vpop.f32.mrf.mxu2 }
  0xa0   : > { %v310_v33 = vpop.f32.mrf.mxu1  ;;  %v323_v34 = vadd.f32 %v580_v11, %v322_v32 }
  0xa1   : > { %v353_v35 = vmax.f32 %v328_v31, 0.0  ;;  %v311_v36 = vadd.f32 %v580_v11, %v310_v33  ;;  %v300_v37 = vpop.f32.mrf.mxu0 }
  0xa2   : > { %v301_v38 = vadd.f32 %v580_v11, %v300_v37  ;;  %v351_v39 = vmax.f32 %v323_v34, 0.0 }
  0xa3   : > { %371 = vst [vmem:[%s587_s28 + $0x68] sm:$0xff] %v353_v35  ;;  %v346_v40 = vmax.f32 %v311_v36, 0.0 }
  0xa4   : > { %v342_v41 = vmax.f32 %v301_v38, 0.0  ;;  %369 = vst [vmem:[%s587_s28 + $0x58] sm:$0xff] %v351_v39 }
  0xa5   : > { %364 = vst [vmem:[%s587_s28 + $0x30] sm:$0xff] %v346_v40 }
  0xa6   : > { %v330_v42 = vpop.f32.mrf.mxu3  ;;  %360 = vst [vmem:[%s587_s28 + $0x10] sm:$0xff] %v342_v41 }
  0xa7   : > { %v331_v43 = vadd.f32 %v580_v11, %v330_v42 }
  0xa8   : > { %v312_v44 = vpop.f32.mrf.mxu1 }
  0xa9   : > { %v354_v45 = vmax.f32 %v331_v43, 0.0  ;;  %v313_v46 = vadd.f32 %v580_v11, %v312_v44  ;;  %v302_v47 = vpop.f32.mrf.mxu0 }
  0xaa   : > { %v303_v48 = vadd.f32 %v580_v11, %v302_v47 }
  0xab   : > { %372 = vst [vmem:[%s587_s28 + $0x70] sm:$0xff] %v354_v45  ;;  %v347_v49 = vmax.f32 %v313_v46, 0.0 }
  0xac   : > { %v343_v50 = vmax.f32 %v303_v48, 0.0 }
  0xad   : > { %365 = vst [vmem:[%s587_s28 + $0x38] sm:$0xff] %v347_v49 }
  0xae   : > { %v332_v51 = vpop.f32.mrf.mxu3  ;;  %361 = vst [vmem:[%s587_s28 + $0x18] sm:$0xff] %v343_v50 }
  0xaf   : > { %v333_v52 = vadd.f32 %v580_v11, %v332_v51 }
  0xb0   : > { %v315_v53 = vpop.f32.mrf.mxu1 }
  0xb1   : > { %v355_v54 = vmax.f32 %v333_v52, 0.0  ;;  %v316_v55 = vadd.f32 %v580_v11, %v315_v53 }
  0xb3   : > { %373 = vst [vmem:[%s587_s28 + $0x78] sm:$0xff] %v355_v54  ;;  %v348_v56 = vmax.f32 %v316_v55, 0.0 }
  0xb5   : > { %366 = vst [vmem:[%s587_s28 + $0x40] sm:$0xff] %v348_v56 }
  0xb6   : > { %v335_v57 = vpop.f32.mrf.mxu3 }
  0xb7   : > { %v336_v58 = vadd.f32 %v580_v11, %v335_v57 }
  0xb8   : > { %v317_v59 = vpop.f32.mrf.mxu1 }
  0xb9   : > { %v356_v60 = vmax.f32 %v336_v58, 0.0  ;;  %v318_v61 = vadd.f32 %v580_v11, %v317_v59 }
  0xbb   : > { %374 = vst [vmem:[%s587_s28 + $0x80] sm:$0xff] %v356_v60  ;;  %v349_v62 = vmax.f32 %v318_v61, 0.0 }
  0xbd   : > { %367 = vst [vmem:[%s587_s28 + $0x48] sm:$0xff] %v349_v62 }
  0xbe   : > { %v337_v63 = vpop.f32.mrf.mxu3 }
  0xbf   : > { %v338_v0 = vadd.f32 %v580_v11, %v337_v63 }
  0xc1   : > { %v357_v1 = vmax.f32 %v338_v0, 0.0 }
  0xc3   : > { %375 = vst [vmem:[%s587_s28 + $0x88] sm:$0xff] %v357_v1 }
  0xc4 PF: > { %s13_s12 = sadd.s32 1, %s526_s12  }
  0xc5   : > { %p10_p4 = scmp.ge.s32.totalorder %s13_s12, 4  }
  0xc7   :  { %12 = sbr.rel (!%p10_p4) target bundleno = 1 (0x1), region = 62 }

// kernel: peleenet_forward.29
= control target key start
LH: loop header
LB: loop body
LE: loop exit
PB: predicated region body
PF: predicated region fallthrough
CT: control target
= control target key end

     0   :  { %s1078_s12 = smov 0   ;;  %s1285_s0 = inlined_call_operand.vmem [shape: bf16[288,288], index: 0, kind: input, shape index: {}]   ;;  %s1286_s1 = inlined_call_operand.vmem [shape: bf16[288,128], index: 1, kind: input, shape index: {}]   ;;  %s1287_s2 = inlined_call_operand.vmem [shape: f32[1,128], index: 2, kind: input, shape index: {}]   ;;  %s1288_s3 = inlined_call_operand.vmem [shape: f32[288,128], index: 3, kind: output, shape index: {}]  }
   0x1 LB: > { %s779_s13 = sadd.s32 4294967295, %s1056_s12   ;;  %p783_p0 = scmp.ge.s32.totalorder %s1056_s12, 1  ;;  %s1056_s12 = sphi %s1078_s12, %s13_s12  }
   0x2   : > { %p139_p1 = scmp.lt.s32.totalorder %s1056_s12, 3 }
   0x4   : > { %p140_p2 = pnand %p783_p0, %p139_p1 }
   0x5   : > { %s164_s20 = smul.u32 (!%p140_p2), 18, %s779_s13 }
   0x6   : > { %143 = sbr.rel (%p140_p2) target bundleno = 282 (0x11a), region = 32 }
   0x7   : > { %p165_p3 = scmp.lt.s32.totalorder (!%p140_p2), %s164_s20, 35 }
   0xb   : > { %v1011_v0 = vld [vmem:[%s1286_s1 + $0x38] sm:$0xff]  ;;  %v1097_v2 = vld [vmem:[%s1286_s1 + $0x88] sm:$0xff]  ;;  %v1010_v3 = vld [vmem:[%s1286_s1 + $0x30] sm:$0xff]  ;;  %s1290_s20 = smov (!%p165_p3, %s164_s20), 35  ;;  %vm497_vm0 = vcmask 261120  }
   0xc   : > { %v1092_v1 = vld [vmem:[%s1286_s1 + $0x78] sm:$0xff]  ;;  %525 = vmatpush.bf16.msra.mxu0 %v1011_v0  ;;  %1022 = vmatpush.bf16.msra.mxu3 %v1011_v0  ;;  %v1018_v4 = vld [vmem:[%s1286_s1 + $0x70] sm:$0xff]  ;;  %v1110_v5 = vld [vmem:[%s1286_s1 + $0x80] sm:$0xff]  ;;  %s1040_s29 = smul.u32 12, %s1290_s20  ;;  %s785_s5 = sshll.u32 %s1290_s20, 3 }
   0xd   : > { %579 = vmatpush.bf16.msra.mxu1 %v1092_v1  ;;  %639 = vmatpush.bf16.msra.mxu2 %v1097_v2  ;;  %v1009_v6 = vld [vmem:[%s1286_s1 + $0x28] sm:$0xff]  ;;  %v1008_v11 = vld [vmem:[%s1286_s1 + $0x20] sm:$0xff]  ;;  %v1007_v13 = vld [vmem:[%s1286_s1 + $0x18] sm:$0xff]  ;;  %s1233_s8 = scalar_lea.vmem %s1288_s3, %s785_s5 }
   0xe   : > { %v1017_v7 = vld [vmem:[%s1286_s1 + $0x68] sm:$0xff]  ;;  %s1125_s7 = scalar_lea.vmem %s1285_s0, %s1040_s29  ;;  %v1016_v12 = vld [vmem:[%s1286_s1 + $0x60] sm:$0xff]  ;;  %v1015_v14 = vld [vmem:[%s1286_s1 + $0x58] sm:$0xff] }
   0xf   : > { %v796_v8 = vld [vmem:[%s1125_s7 + $0x8] sm:$0xf]  ;;  %v979_v9 = vld [vmem:[%s1125_s7 + $0x10] sm:$0xf0]  ;;  %v808_v17 = vld [vmem:[%s1125_s7 + $0x20] sm:$0xf] }
  0x10   : > { %526 = vmatpush.bf16.msra.mxu0 %v1010_v3  ;;  %1023 = vmatpush.bf16.msra.mxu3 %v1010_v3  ;;  %v797_v10 = vor.u32 %v979_v9, %v796_v8  ;;  %v1006_v15 = vld [vmem:[%s1286_s1 + $0x10] sm:$0xff]  ;;  %v982_v18 = vld [vmem:[%s1125_s7 + $0x28] sm:$0xf0]  ;;  %v1004_v22 = vld [vmem:[%s1286_s1] sm:$0xff] }
  0x11   : > { %580 = vmatpush.bf16.msra.mxu1 %v1018_v4  ;;  %640 = vmatpush.bf16.msra.mxu2 %v1110_v5  ;;  %v1014_v16 = vld [vmem:[%s1286_s1 + $0x50] sm:$0xff]  ;;  %v1005_v19 = vld [vmem:[%s1286_s1 + $0x8] sm:$0xff]  ;;  %v809_v21 = vor.u32 %v982_v18, %v808_v17  ;;  %v788_v23 = vld [vmem:[%s1125_s7] sm:$0xf] }
  0x12   : > { %v1013_v20 = vld [vmem:[%s1286_s1 + $0x48] sm:$0xff]  ;;  %v999_v26 = vld [vmem:[%s1125_s7 + $0xb0] sm:$0xf0]  ;;  %v1012_v27 = vld [vmem:[%s1286_s1 + $0x40] sm:$0xff] }
  0x13   : > { %v978_v24 = vld [vmem:[%s1125_s7 + $0x8] sm:$0xf0]  ;;  %v872_v25 = vld [vmem:[%s1125_s7 + $0xa8] sm:$0xf]  ;;  %v977_v28 = vld [vmem:[%s1125_s7 + $0x4] sm:$0xf] }
  0x14   : > { %527 = vmatpush.bf16.msra.mxu0 %v1009_v6  ;;  %1024 = vmatpush.bf16.msra.mxu3 %v1009_v6  ;;  %v790_v29 = vld [vmem:[%s1125_s7 + $0xc] sm:$0xf0]  ;;  %v789_v30 = vor.u32 %v978_v24, %v788_v23  ;;  %v873_v31 = vor.u32 %v999_v26, %v872_v25  ;;  %v820_v33 = vld [vmem:[%s1125_s7 + $0x38] sm:$0xf]  ;;  %v985_v34 = vld [vmem:[%s1125_s7 + $0x40] sm:$0xf0] }
  0x15   : > { %581 = vmatpush.bf16.msra.mxu1 %v1017_v7  ;;  %966 = vmatmul.msk.bf16.vlgmr.msra.gmra.mxu2 %vm497_vm0, %v797_v10  ;;  %v793_v32 = vor.u32 %v977_v28, %v790_v29  ;;  %v821_v35 = vor.u32 %v985_v34, %v820_v33  ;;  %v800_v36 = vld [vmem:[%s1125_s7 + $0x18] sm:$0xf]  ;;  %v981_v37 = vld [vmem:[%s1125_s7 + $0x20] sm:$0xf0]  ;;  %v884_v38 = vld [vmem:[%s1125_s7 + $0xc0] sm:$0xf] }
  0x16   : > { %v1002_v39 = vld [vmem:[%s1125_s7 + $0xc8] sm:$0xf0]  ;;  %v980_v40 = vld [vmem:[%s1125_s7 + $0x1c] sm:$0xf]  ;;  %v802_v41 = vld [vmem:[%s1125_s7 + $0x24] sm:$0xf0]  ;;  %v801_v42 = vor.u32 %v981_v37, %v800_v36 }
  0x17   : > { %v885_v43 = vor.u32 %v1002_v39, %v884_v38  ;;  %v805_v44 = vor.u32 %v980_v40, %v802_v41  ;;  %v832_v45 = vld [vmem:[%s1125_s7 + $0x50] sm:$0xf]  ;;  %v988_v46 = vld [vmem:[%s1125_s7 + $0x58] sm:$0xf0]  ;;  %v998_v50 = vld [vmem:[%s1125_s7 + $0xac] sm:$0xf] }
  0x18   : > { %528 = vmatpush.bf16.msra.mxu0 %v1008_v11  ;;  %1025 = vmatpush.bf16.msra.mxu3 %v1008_v11  ;;  %v833_v47 = vor.u32 %v988_v46, %v832_v45  ;;  %v812_v48 = vld [vmem:[%s1125_s7 + $0x30] sm:$0xf]  ;;  %v984_v49 = vld [vmem:[%s1125_s7 + $0x38] sm:$0xf0]  ;;  %v874_v51 = vld [vmem:[%s1125_s7 + $0xb4] sm:$0xf0] }
  0x19   : > { %582 = vmatpush.bf16.msra.mxu1 %v1016_v12  ;;  %v983_v52 = vld [vmem:[%s1125_s7 + $0x34] sm:$0xf]  ;;  %v814_v53 = vld [vmem:[%s1125_s7 + $0x3c] sm:$0xf0]  ;;  %v813_v54 = vor.u32 %v984_v49, %v812_v48  ;;  %v877_v55 = vor.u32 %v998_v50, %v874_v51  ;;  %v844_v57 = vld [vmem:[%s1125_s7 + $0x68] sm:$0xf] }
  0x1a   : > { %v817_v56 = vor.u32 %v983_v52, %v814_v53  ;;  %v991_v58 = vld [vmem:[%s1125_s7 + $0x70] sm:$0xf0]  ;;  %v824_v60 = vld [vmem:[%s1125_s7 + $0x48] sm:$0xf]  ;;  %v1001_v62 = vld [vmem:[%s1125_s7 + $0xc4] sm:$0xf] }
  0x1b   : > { %v845_v59 = vor.u32 %v991_v58, %v844_v57  ;;  %v987_v61 = vld [vmem:[%s1125_s7 + $0x50] sm:$0xf0]  ;;  %v886_v63 = vld [vmem:[%s1125_s7 + $0xcc] sm:$0xf0]  ;;  %v986_v0 = vld [vmem:[%s1125_s7 + $0x4c] sm:$0xf] }
  0x1c   : > { %529 = vmatpush.bf16.msra.mxu0 %v1007_v13  ;;  %1026 = vmatpush.bf16.msra.mxu3 %v1007_v13  ;;  %v889_v3 = vor.u32 %v1001_v62, %v886_v63  ;;  %v994_v6 = vld [vmem:[%s1125_s7 + $0x88] sm:$0xf0]  ;;  %v836_v8 = vld [vmem:[%s1125_s7 + $0x60] sm:$0xf]  ;;  %v892_v10 = vld [vmem:[%s1125_s7 + $0xc8] sm:$0xf] }
  0x1d   : > { %583 = vmatpush.bf16.msra.mxu1 %v1015_v14  ;;  %v990_v9 = vld [vmem:[%s1125_s7 + $0x68] sm:$0xf0]  ;;  %v1003_v11 = vld [vmem:[%s1125_s7 + $0xd0] sm:$0xf0]  ;;  %v838_v13 = vld [vmem:[%s1125_s7 + $0x6c] sm:$0xf0] }
  0x1e   : > { %v868_v17 = vld [vmem:[%s1125_s7 + $0x98] sm:$0xf]  ;;  %v997_v18 = vld [vmem:[%s1125_s7 + $0xa0] sm:$0xf0]  ;;  %v850_v23 = vld [vmem:[%s1125_s7 + $0x84] sm:$0xf0] }
  0x1f   : > { %v880_v26 = vld [vmem:[%s1125_s7 + $0xb0] sm:$0xf]  ;;  %v1226_v37 = vld [vmem:[%s1287_s2] ss:$0 sm:$0xff] }
  0x20   : > { %530 = vmatpush.bf16.msra.mxu0 %v1006_v15  ;;  %1027 = vmatpush.bf16.msra.mxu3 %v1006_v15  ;;  %v893_v15 = vor.u32 %v1003_v11, %v892_v10  ;;  %v860_v29 = vld [vmem:[%s1125_s7 + $0x90] sm:$0xf] }
  0x21   : > { %584 = vmatpush.bf16.msra.mxu1 %v1014_v16 }
  0x24   : > { %531 = vmatpush.bf16.msra.mxu0 %v1005_v19  ;;  %1028 = vmatpush.bf16.msra.mxu3 %v1005_v19  ;;  %v869_v19 = vor.u32 %v997_v18, %v868_v17 }
  0x25   : > { %585 = vmatpush.bf16.msra.mxu1 %v1013_v20  ;;  %967 = vmatmul.msk.bf16.gmra.mxu2 %vm497_vm0, %v809_v21  ;;  %v993_v21 = vld [vmem:[%s1125_s7 + $0x80] sm:$0xf0] }
  0x28   : > { %532 = vmatpush.bf16.msra.mxu0 %v1004_v22  ;;  %1029 = vmatpush.bf16.msra.mxu3 %v1004_v22  ;;  %v992_v22 = vld [vmem:[%s1125_s7 + $0x7c] sm:$0xf] }
  0x29   : > { %586 = vmatpush.bf16.msra.mxu1 %v1012_v27  ;;  %v853_v25 = vor.u32 %v992_v22, %v850_v23 }
  0x2b   : > { %533 = vmatmul.bf16.vlgmr.msra.gmra.mxu0 %v789_v30  ;;  %568 = vmatmul.bf16.vlgmr.msra.gmra.mxu3 %v873_v31  ;;  %v996_v30 = vld [vmem:[%s1125_s7 + $0x98] sm:$0xf0]  ;;  %v995_v31 = vld [vmem:[%s1125_s7 + $0x94] sm:$0xf] }
  0x2c   : > { %1030 = vmatpush.bf16.msrb.mxu3 %v1092_v1  ;;  %587 = vmatmul.bf16.vlgmr.msra.gmra.mxu1 %v793_v32  ;;  %v826_v1 = vld [vmem:[%s1125_s7 + $0x54] sm:$0xf0]  ;;  %v862_v32 = vld [vmem:[%s1125_s7 + $0x9c] sm:$0xf0]  ;;  %v861_v33 = vor.u32 %v996_v30, %v860_v29 }
  0x2d   : > { %v865_v34 = vor.u32 %v995_v31, %v862_v32 }
  0x30   : > { %1031 = vmatpush.bf16.msrb.mxu3 %v1018_v4  ;;  %v829_v4 = vor.u32 %v986_v0, %v826_v1 }
  0x34   : > { %1032 = vmatpush.bf16.msrb.mxu3 %v1017_v7 }
  0x35   : > { %968 = vmatmul.msk.bf16.gmra.mxu2 %vm497_vm0, %v821_v35 }
  0x38   : > { %1033 = vmatpush.bf16.msrb.mxu3 %v1016_v12  ;;  %v989_v12 = vld [vmem:[%s1125_s7 + $0x64] sm:$0xf] }
  0x3b   : > { %538 = vmatmul.bf16.gmra.mxu0 %v801_v42  ;;  %573 = vmatmul.bf16.gmra.mxu3 %v885_v43 }
  0x3c   : > { %1034 = vmatpush.bf16.msrb.mxu3 %v1015_v14  ;;  %592 = vmatmul.bf16.gmra.mxu1 %v805_v44  ;;  %v837_v14 = vor.u32 %v990_v9, %v836_v8 }
  0x40   : > { %1035 = vmatpush.bf16.msrb.mxu3 %v1014_v16  ;;  %v841_v16 = vor.u32 %v989_v12, %v838_v13 }
  0x44   : > { %1036 = vmatpush.bf16.msrb.mxu3 %v1013_v20  ;;  %v848_v20 = vld [vmem:[%s1125_s7 + $0x78] sm:$0xf] }
  0x45   : > { %969 = vmatmul.msk.bf16.gmra.mxu2 %vm497_vm0, %v833_v47  ;;  %v849_v24 = vor.u32 %v993_v21, %v848_v20 }
  0x48   : > { %1037 = vmatpush.bf16.msrb.mxu3 %v1012_v27  ;;  %v1000_v27 = vld [vmem:[%s1125_s7 + $0xb8] sm:$0xf0] }
  0x49   : > { %v881_v28 = vor.u32 %v1000_v27, %v880_v26 }
  0x4b   : > { %543 = vmatmul.bf16.gmra.mxu0 %v813_v54  ;;  %622 = vmatmul.bf16.vlgmr.msrb.gmra.mxu3 %v877_v55 }
  0x4c   : > { %1038 = vmatpush.bf16.msra.mxu3 %v1097_v2  ;;  %597 = vmatmul.bf16.gmra.mxu1 %v817_v56  ;;  %v825_v2 = vor.u32 %v987_v61, %v824_v60 }
  0x50   : > { %1039 = vmatpush.bf16.msra.mxu3 %v1110_v5  ;;  %v856_v5 = vld [vmem:[%s1125_s7 + $0x80] sm:$0xf] }
  0x51   : > { %v857_v7 = vor.u32 %v994_v6, %v856_v5 }
  0x55   : > { %970 = vmatmul.msk.bf16.gmra.mxu2 %vm497_vm0, %v845_v59 }
  0x5b   : > { %548 = vmatmul.bf16.gmra.mxu0 %v825_v2  ;;  %627 = vmatmul.bf16.gmra.mxu3 %v889_v3 }
  0x5c   : > { %602 = vmatmul.bf16.gmra.mxu1 %v829_v4 }
  0x65   : > { %971 = vmatmul.msk.bf16.gmra.mxu2 %vm497_vm0, %v857_v7 }
  0x6b   : > { %553 = vmatmul.bf16.gmra.mxu0 %v837_v14  ;;  %974 = vmatmul.msk.bf16.vlgmr.msra.gmra.mxu3 %vm497_vm0, %v893_v15 }
  0x6c   : > { %607 = vmatmul.bf16.gmra.mxu1 %v841_v16 }
  0x75   : > { %972 = vmatmul.msk.bf16.gmra.mxu2 %vm497_vm0, %v869_v19 }
  0x7b   : > { %558 = vmatmul.bf16.gmra.mxu0 %v849_v24 }
  0x7c   : > { %612 = vmatmul.bf16.gmra.mxu1 %v853_v25 }
  0x85   : > { %973 = vmatmul.msk.bf16.gmra.mxu2 %vm497_vm0, %v881_v28 }
  0x8b   : > { %563 = vmatmul.bf16.gmra.mxu0 %v861_v33 }
  0x8c   : > { %617 = vmatmul.bf16.gmra.mxu1 %v865_v34 }
  0x98   : > { %v642_v35 = vpop.f32.mrf.mxu2 }
  0xa0   : > { %v644_v36 = vpop.f32.mrf.mxu2 }
  0xa8   : > { %v534_v38 = vpop.f32.mrf.mxu0  ;;  %v647_v41 = vpop.f32.mrf.mxu2 }
  0xa9   : > { %v535_v39 = vadd.f32 %v1226_v37, %v534_v38  ;;  %v588_v40 = vpop.f32.mrf.mxu1 }
  0xab   : > { %v589_v42 = vadd.f32 %v588_v40, %v535_v39 }
  0xad   : > { %v643_v43 = vadd.f32 %v642_v35, %v589_v42 }
  0xae   : > { %v1235_v44 = vpop.f32.mrf.mxu3 }
  0xaf   : > { %v687_v45 = vmax.f32 %v643_v43, 0.0 }
  0xb0   : > { %v536_v46 = vpop.f32.mrf.mxu0  ;;  %v649_v49 = vpop.f32.mrf.mxu2 }
  0xb1   : > { %705 = vst [vmem:[%s1233_s8] sm:$0xff] %v687_v45  ;;  %v537_v47 = vadd.f32 %v1226_v37, %v536_v46  ;;  %v590_v48 = vpop.f32.mrf.mxu1 }
  0xb3   : > { %v591_v50 = vadd.f32 %v590_v48, %v537_v47 }
  0xb5   : > { %v645_v51 = vadd.f32 %v644_v36, %v591_v50 }
  0xb6   : > { %v1239_v52 = vpop.f32.mrf.mxu3 }
  0xb7   : > { %v688_v53 = vmax.f32 %v645_v51, 0.0 }
  0xb8   : > { %v539_v54 = vpop.f32.mrf.mxu0  ;;  %v652_v57 = vpop.f32.mrf.mxu2 }
  0xb9   : > { %706 = vst [vmem:[%s1233_s8 + $0x8] sm:$0xff] %v688_v53  ;;  %v540_v55 = vadd.f32 %v1226_v37, %v539_v54  ;;  %v593_v56 = vpop.f32.mrf.mxu1 }
  0xbb   : > { %v594_v58 = vadd.f32 %v593_v56, %v540_v55 }
  0xbd   : > { %v648_v59 = vadd.f32 %v647_v41, %v594_v58 }
  0xbe   : > { %v574_v60 = vpop.f32.mrf.mxu3 }
  0xbf   : > { %v689_v61 = vmax.f32 %v648_v59, 0.0  ;;  %v575_v40 = vadd.f32 %v1226_v37, %v574_v60 }
  0xc0   : > { %v541_v62 = vpop.f32.mrf.mxu0  ;;  %v654_v1 = vpop.f32.mrf.mxu2 }
  0xc1   : > { %707 = vst [vmem:[%s1233_s8 + $0x10] sm:$0xff] %v689_v61  ;;  %v542_v63 = vadd.f32 %v1226_v37, %v541_v62  ;;  %v595_v0 = vpop.f32.mrf.mxu1 }
  0xc3   : > { %v596_v2 = vadd.f32 %v595_v0, %v542_v63 }
  0xc5   : > { %v650_v3 = vadd.f32 %v649_v49, %v596_v2 }
  0xc6   : > { %v576_v4 = vpop.f32.mrf.mxu3 }
  0xc7   : > { %v690_v5 = vmax.f32 %v650_v3, 0.0 }
  0xc8   : > { %v544_v6 = vpop.f32.mrf.mxu0  ;;  %v657_v9 = vpop.f32.mrf.mxu2 }
  0xc9   : > { %708 = vst [vmem:[%s1233_s8 + $0x18] sm:$0xff] %v690_v5  ;;  %v545_v7 = vadd.f32 %v1226_v37, %v544_v6  ;;  %v598_v8 = vpop.f32.mrf.mxu1 }
  0xcb   : > { %v599_v10 = vadd.f32 %v598_v8, %v545_v7 }
  0xcd   : > { %v653_v11 = vadd.f32 %v652_v57, %v599_v10  ;;  %v577_v57 = vadd.f32 %v1226_v37, %v576_v4 }
  0xce   : > { %v1247_v12 = vpop.f32.mrf.mxu3 }
  0xcf   : > { %v691_v13 = vmax.f32 %v653_v11, 0.0 }
  0xd0   : > { %v546_v14 = vpop.f32.mrf.mxu0  ;;  %v659_v17 = vpop.f32.mrf.mxu2 }
  0xd1   : > { %709 = vst [vmem:[%s1233_s8 + $0x20] sm:$0xff] %v691_v13  ;;  %v547_v15 = vadd.f32 %v1226_v37, %v546_v14  ;;  %v600_v16 = vpop.f32.mrf.mxu1  ;;  %v570_v14 = vadd.f32 %v1226_v37, %v1235_v44  ;;  %v572_v44 = vadd.f32 %v1226_v37, %v1239_v52 }
  0xd3   : > { %v601_v18 = vadd.f32 %v600_v16, %v547_v15 }
  0xd5   : > { %v655_v19 = vadd.f32 %v654_v1, %v601_v18 }
  0xd6   : > { %v1251_v20 = vpop.f32.mrf.mxu3 }
  0xd7   : > { %v692_v21 = vmax.f32 %v655_v19, 0.0 }
  0xd8   : > { %v549_v22 = vpop.f32.mrf.mxu0  ;;  %v662_v25 = vpop.f32.mrf.mxu2 }
  0xd9   : > { %710 = vst [vmem:[%s1233_s8 + $0x28] sm:$0xff] %v692_v21  ;;  %v550_v23 = vadd.f32 %v1226_v37, %v549_v22  ;;  %v603_v24 = vpop.f32.mrf.mxu1 }
  0xdb   : > { %v604_v26 = vadd.f32 %v603_v24, %v550_v23 }
  0xdd   : > { %v658_v27 = vadd.f32 %v657_v9, %v604_v26 }
  0xde   : > { %v628_v28 = vpop.f32.mrf.mxu3 }
  0xdf   : > { %v693_v29 = vmax.f32 %v658_v27, 0.0  ;;  %v629_v46 = vadd.f32 %v628_v28, %v575_v40  ;;  %v626_v28 = vadd.f32 %v1251_v20, %v572_v44 }
  0xe0   : > { %v551_v30 = vpop.f32.mrf.mxu0  ;;  %v664_v33 = vpop.f32.mrf.mxu2 }
  0xe1   : > { %711 = vst [vmem:[%s1233_s8 + $0x30] sm:$0xff] %v693_v29  ;;  %v552_v31 = vadd.f32 %v1226_v37, %v551_v30  ;;  %v605_v32 = vpop.f32.mrf.mxu1 }
  0xe3   : > { %v606_v34 = vadd.f32 %v605_v32, %v552_v31 }
  0xe5   : > { %v660_v35 = vadd.f32 %v659_v17, %v606_v34  ;;  %v624_v17 = vadd.f32 %v1247_v12, %v570_v14 }
  0xe6   : > { %v630_v36 = vpop.f32.mrf.mxu3 }
  0xe7   : > { %v694_v38 = vmax.f32 %v660_v35, 0.0  ;;  %v631_v59 = vadd.f32 %v630_v36, %v577_v57 }
  0xe8   : > { %v554_v39 = vpop.f32.mrf.mxu0  ;;  %v667_v43 = vpop.f32.mrf.mxu2 }
  0xe9   : > { %712 = vst [vmem:[%s1233_s8 + $0x38] sm:$0xff] %v694_v38  ;;  %v555_v41 = vadd.f32 %v1226_v37, %v554_v39  ;;  %v608_v42 = vpop.f32.mrf.mxu1 }
  0xeb   : > { %v609_v45 = vadd.f32 %v608_v42, %v555_v41 }
  0xed   : > { %v663_v47 = vadd.f32 %v662_v25, %v609_v45 }
  0xee   : > { %v682_v48 = vpop.f32.mrf.mxu3 }
  0xef   : > { %v695_v49 = vmax.f32 %v663_v47, 0.0  ;;  %v683_v50 = vadd.f32 %v682_v48, %v629_v46 }
  0xf0   : > { %v556_v51 = vpop.f32.mrf.mxu0  ;;  %v669_v56 = vpop.f32.mrf.mxu2 }
  0xf1   : > { %713 = vst [vmem:[%s1233_s8 + $0x40] sm:$0xff] %v695_v49  ;;  %v703_v53 = vmax.f32 %v683_v50, 0.0  ;;  %v557_v54 = vadd.f32 %v1226_v37, %v556_v51  ;;  %v610_v55 = vpop.f32.mrf.mxu1 }
  0xf3   : > { %721 = vst [vmem:[%s1233_s8 + $0x80] sm:$0xff] %v703_v53  ;;  %v611_v58 = vadd.f32 %v610_v55, %v557_v54 }
  0xf5   : > { %v665_v60 = vadd.f32 %v664_v33, %v611_v58 }
  0xf6   : > { %v684_v61 = vpop.f32.mrf.mxu3 }
  0xf7   : > { %v696_v62 = vmax.f32 %v665_v60, 0.0  ;;  %v685_v63 = vadd.f32 %v684_v61, %v631_v59 }
  0xf8   : > { %v559_v0 = vpop.f32.mrf.mxu0  ;;  %v672_v5 = vpop.f32.mrf.mxu2 }
  0xf9   : > { %714 = vst [vmem:[%s1233_s8 + $0x48] sm:$0xff] %v696_v62  ;;  %v704_v1 = vmax.f32 %v685_v63, 0.0  ;;  %v560_v2 = vadd.f32 %v1226_v37, %v559_v0  ;;  %v613_v3 = vpop.f32.mrf.mxu1 }
  0xfb   : > { %722 = vst [vmem:[%s1233_s8 + $0x88] sm:$0xff] %v704_v1  ;;  %v614_v6 = vadd.f32 %v613_v3, %v560_v2 }
  0xfd   : > { %v668_v7 = vadd.f32 %v667_v43, %v614_v6 }
  0xff   : > { %v697_v4 = vmax.f32 %v668_v7, 0.0 }
 0x100   : > { %v561_v8 = vpop.f32.mrf.mxu0  ;;  %v674_v11 = vpop.f32.mrf.mxu2 }
 0x101   : > { %715 = vst [vmem:[%s1233_s8 + $0x50] sm:$0xff] %v697_v4  ;;  %v562_v9 = vadd.f32 %v1226_v37, %v561_v8  ;;  %v615_v10 = vpop.f32.mrf.mxu1 }
 0x103   : > { %v616_v13 = vadd.f32 %v615_v10, %v562_v9 }
 0x105   : > { %v670_v15 = vadd.f32 %v669_v56, %v616_v13 }
 0x107   : > { %v698_v16 = vmax.f32 %v670_v15, 0.0 }
 0x108   : > { %v564_v18 = vpop.f32.mrf.mxu0  ;;  %v677_v22 = vpop.f32.mrf.mxu2 }
 0x109   : > { %716 = vst [vmem:[%s1233_s8 + $0x58] sm:$0xff] %v698_v16  ;;  %v565_v19 = vadd.f32 %v1226_v37, %v564_v18  ;;  %v618_v21 = vpop.f32.mrf.mxu1  ;;  %v678_v23 = vadd.f32 %v677_v22, %v624_v17 }
 0x10b   : > { %v619_v24 = vadd.f32 %v618_v21, %v565_v19  ;;  %v701_v25 = vmax.f32 %v678_v23, 0.0 }
 0x10d   : > { %v673_v26 = vadd.f32 %v672_v5, %v619_v24  ;;  %719 = vst [vmem:[%s1233_s8 + $0x70] sm:$0xff] %v701_v25 }
 0x10f   : > { %v699_v27 = vmax.f32 %v673_v26, 0.0 }
 0x110   : > { %v566_v12 = vpop.f32.mrf.mxu0  ;;  %v679_v30 = vpop.f32.mrf.mxu2 }
 0x111   : > { %717 = vst [vmem:[%s1233_s8 + $0x60] sm:$0xff] %v699_v27  ;;  %v567_v29 = vadd.f32 %v1226_v37, %v566_v12  ;;  %v620_v31 = vpop.f32.mrf.mxu1  ;;  %v680_v32 = vadd.f32 %v679_v30, %v626_v28 }
 0x113   : > { %v621_v33 = vadd.f32 %v620_v31, %v567_v29  ;;  %v702_v34 = vmax.f32 %v680_v32, 0.0 }
 0x115   : > { %v675_v35 = vadd.f32 %v674_v11, %v621_v33  ;;  %720 = vst [vmem:[%s1233_s8 + $0x78] sm:$0xff] %v702_v34 }
 0x117   : > { %v700_v36 = vmax.f32 %v675_v35, 0.0 }
 0x119   : > { %718 = vst [vmem:[%s1233_s8 + $0x68] sm:$0xff] %v700_v36 }
 0x11a PF: > { %s13_s12 = sadd.s32 1, %s1056_s12  }
 0x11b   : > { %p10_p4 = scmp.ge.s32.totalorder %s13_s12, 4  }
 0x11d   :  { %12 = sbr.rel (!%p10_p4) target bundleno = 1 (0x1), region = 62 }

// kernel: peleenet_forward.30
= control target key start
LH: loop header
LB: loop body
LE: loop exit
PB: predicated region body
PF: predicated region fallthrough
CT: control target
= control target key end

     0   :  { %s596_s12 = smov 0   ;;  %s684_s0 = inlined_call_operand.vmem [shape: bf16[288,80], index: 0, kind: input, shape index: {}]   ;;  %s685_s1 = inlined_call_operand.vmem [shape: bf16[80,128], index: 1, kind: input, shape index: {}]   ;;  %s686_s2 = inlined_call_operand.vmem [shape: f32[1,128], index: 2, kind: input, shape index: {}]   ;;  %s687_s3 = inlined_call_operand.vmem [shape: f32[288,128], index: 3, kind: output, shape index: {}]  }
   0x1 LB: > { %s456_s13 = sadd.s32 4294967295, %s574_s12   ;;  %p460_p0 = scmp.ge.s32.totalorder %s574_s12, 1  ;;  %s574_s12 = sphi %s596_s12, %s13_s12  }
   0x2   : > { %p138_p1 = scmp.lt.s32.totalorder %s574_s12, 3 }
   0x4   : > { %p139_p2 = pnand %p460_p0, %p138_p1 }
   0x5   : > { %s162_s16 = smul.u32 (!%p139_p2), 18, %s456_s13 }
   0x6   : > { %142 = sbr.rel (%p139_p2) target bundleno = 208 (0xd0), region = 32 }
   0x7   : > { %p163_p3 = scmp.lt.s32.totalorder (!%p139_p2), %s162_s16, 35 }
   0xb   : > { %v543_v0 = vld [vmem:[%s685_s1 + $0x20] sm:$0xff]  ;;  %v542_v1 = vld [vmem:[%s685_s1 + $0x18] sm:$0xff]  ;;  %v541_v2 = vld [vmem:[%s685_s1 + $0x10] sm:$0xff]  ;;  %s689_s16 = smov (!%p163_p3, %s162_s16), 35  ;;  %vm282_vm0 = vcmask 654336  }
   0xc   : > { %545 = vmatpush.bf16.msra.mxu2 %v543_v0  ;;  %546 = vmatpush.bf16.msra.mxu3 %v543_v0  ;;  %v540_v3 = vld [vmem:[%s685_s1 + $0x8] sm:$0xff]  ;;  %s461_s23 = sshll.u32 %s689_s16, 2  ;;  %v539_v4 = vld [vmem:[%s685_s1] sm:$0xff]  ;;  %s462_s4 = sshll.u32 %s689_s16, 3 }
   0xd   : > { %313 = vmatpush.bf16.msra.mxu0 %v543_v0  ;;  %544 = vmatpush.bf16.msra.mxu1 %v543_v0  ;;  %s166_s28 = scalar_lea.vmem %s684_s0, %s461_s23  ;;  %v637_v14 = vld [vmem:[%s686_s2] ss:$0 sm:$0xff]  ;;  %s645_s7 = scalar_lea.vmem %s687_s3, %s462_s4 }
   0xe   : > { %v534_v5 = vld [vmem:[%s166_s28 + $0x20] sm:$0xff]  ;;  %v537_v6 = vld [vmem:[%s166_s28 + $0x38] sm:$0xff]  ;;  %v532_v8 = vld [vmem:[%s166_s28 + $0x10] sm:$0xff] }
   0xf   : > { %v530_v7 = vld [vmem:[%s166_s28] sm:$0xff]  ;;  %v535_v9 = vld [vmem:[%s166_s28 + $0x28] sm:$0xff]  ;;  %v533_v12 = vld [vmem:[%s166_s28 + $0x18] sm:$0xff] }
  0x10   : > { %548 = vmatpush.bf16.msra.mxu2 %v542_v1  ;;  %549 = vmatpush.bf16.msra.mxu3 %v542_v1  ;;  %v538_v10 = vld [vmem:[%s166_s28 + $0x40] sm:$0xff]  ;;  %v531_v11 = vld [vmem:[%s166_s28 + $0x8] sm:$0xff]  ;;  %v536_v13 = vld [vmem:[%s166_s28 + $0x30] sm:$0xff] }
  0x11   : > { %314 = vmatpush.bf16.msra.mxu0 %v542_v1  ;;  %547 = vmatpush.bf16.msra.mxu1 %v542_v1 }
  0x14   : > { %551 = vmatpush.bf16.msra.mxu2 %v541_v2  ;;  %552 = vmatpush.bf16.msra.mxu3 %v541_v2 }
  0x15   : > { %315 = vmatpush.bf16.msra.mxu0 %v541_v2  ;;  %550 = vmatpush.bf16.msra.mxu1 %v541_v2 }
  0x18   : > { %554 = vmatpush.bf16.msra.mxu2 %v540_v3  ;;  %555 = vmatpush.bf16.msra.mxu3 %v540_v3 }
  0x19   : > { %316 = vmatpush.bf16.msra.mxu0 %v540_v3  ;;  %553 = vmatpush.bf16.msra.mxu1 %v540_v3 }
  0x1c   : > { %557 = vmatpush.bf16.msra.mxu2 %v539_v4  ;;  %558 = vmatpush.bf16.msra.mxu3 %v539_v4 }
  0x1d   : > { %317 = vmatpush.bf16.msra.mxu0 %v539_v4  ;;  %556 = vmatpush.bf16.msra.mxu1 %v539_v4 }
  0x1f   : > { %523 = vmatmul.msk.bf16.vlgmr.msra.gmra.mxu2 %vm282_vm0, %v534_v5  ;;  %526 = vmatmul.msk.bf16.vlgmr.msra.gmra.mxu3 %vm282_vm0, %v537_v6 }
  0x20   : > { %519 = vmatmul.msk.bf16.vlgmr.msra.gmra.mxu0 %vm282_vm0, %v530_v7  ;;  %521 = vmatmul.msk.bf16.vlgmr.msra.gmra.mxu1 %vm282_vm0, %v532_v8 }
  0x2f   : > { %524 = vmatmul.msk.bf16.gmra.mxu2 %vm282_vm0, %v535_v9  ;;  %527 = vmatmul.msk.bf16.gmra.mxu3 %vm282_vm0, %v538_v10 }
  0x30   : > { %520 = vmatmul.msk.bf16.gmra.mxu0 %vm282_vm0, %v531_v11  ;;  %522 = vmatmul.msk.bf16.gmra.mxu1 %vm282_vm0, %v533_v12 }
  0x3f   : > { %525 = vmatmul.msk.bf16.gmra.mxu2 %vm282_vm0, %v536_v13 }
  0x9d   : > { %v319_v15 = vpop.f32.mrf.mxu0  ;;  %v329_v16 = vpop.f32.mrf.mxu1 }
  0x9e   : > { %v320_v17 = vadd.f32 %v637_v14, %v319_v15  ;;  %v330_v18 = vadd.f32 %v637_v14, %v329_v16 }
  0xa0   : > { %v364_v19 = vmax.f32 %v320_v17, 0.0  ;;  %v368_v20 = vmax.f32 %v330_v18, 0.0 }
  0xa2   : > { %v339_v21 = vpop.f32.mrf.mxu2  ;;  %382 = vst [vmem:[%s645_s7] sm:$0xff] %v364_v19  ;;  %v354_v22 = vpop.f32.mrf.mxu3 }
  0xa3   : > { %v340_v23 = vadd.f32 %v637_v14, %v339_v21  ;;  %386 = vst [vmem:[%s645_s7 + $0x20] sm:$0xff] %v368_v20  ;;  %v355_v24 = vadd.f32 %v637_v14, %v354_v22 }
  0xa5   : > { %v372_v25 = vmax.f32 %v340_v23, 0.0  ;;  %v378_v26 = vmax.f32 %v355_v24, 0.0  ;;  %v321_v27 = vpop.f32.mrf.mxu0  ;;  %v331_v28 = vpop.f32.mrf.mxu1 }
  0xa6   : > { %v322_v29 = vadd.f32 %v637_v14, %v321_v27  ;;  %v332_v30 = vadd.f32 %v637_v14, %v331_v28 }
  0xa7   : > { %390 = vst [vmem:[%s645_s7 + $0x40] sm:$0xff] %v372_v25 }
  0xa8   : > { %396 = vst [vmem:[%s645_s7 + $0x70] sm:$0xff] %v378_v26  ;;  %v365_v31 = vmax.f32 %v322_v29, 0.0  ;;  %v369_v32 = vmax.f32 %v332_v30, 0.0 }
  0xaa   : > { %v341_v33 = vpop.f32.mrf.mxu2  ;;  %383 = vst [vmem:[%s645_s7 + $0x8] sm:$0xff] %v365_v31  ;;  %v356_v34 = vpop.f32.mrf.mxu3 }
  0xab   : > { %v342_v35 = vadd.f32 %v637_v14, %v341_v33  ;;  %387 = vst [vmem:[%s645_s7 + $0x28] sm:$0xff] %v369_v32  ;;  %v357_v36 = vadd.f32 %v637_v14, %v356_v34 }
  0xad   : > { %v373_v37 = vmax.f32 %v342_v35, 0.0  ;;  %v379_v38 = vmax.f32 %v357_v36, 0.0  ;;  %v324_v39 = vpop.f32.mrf.mxu0  ;;  %v334_v40 = vpop.f32.mrf.mxu1 }
  0xae   : > { %v325_v41 = vadd.f32 %v637_v14, %v324_v39  ;;  %v335_v42 = vadd.f32 %v637_v14, %v334_v40 }
  0xaf   : > { %391 = vst [vmem:[%s645_s7 + $0x48] sm:$0xff] %v373_v37 }
  0xb0   : > { %397 = vst [vmem:[%s645_s7 + $0x78] sm:$0xff] %v379_v38  ;;  %v366_v43 = vmax.f32 %v325_v41, 0.0  ;;  %v370_v44 = vmax.f32 %v335_v42, 0.0 }
  0xb2   : > { %v344_v45 = vpop.f32.mrf.mxu2  ;;  %384 = vst [vmem:[%s645_s7 + $0x10] sm:$0xff] %v366_v43  ;;  %v359_v46 = vpop.f32.mrf.mxu3 }
  0xb3   : > { %v345_v47 = vadd.f32 %v637_v14, %v344_v45  ;;  %388 = vst [vmem:[%s645_s7 + $0x30] sm:$0xff] %v370_v44  ;;  %v360_v48 = vadd.f32 %v637_v14, %v359_v46 }
  0xb5   : > { %v374_v49 = vmax.f32 %v345_v47, 0.0  ;;  %v380_v50 = vmax.f32 %v360_v48, 0.0  ;;  %v326_v51 = vpop.f32.mrf.mxu0  ;;  %v336_v52 = vpop.f32.mrf.mxu1 }
  0xb6   : > { %v327_v53 = vadd.f32 %v637_v14, %v326_v51  ;;  %v337_v54 = vadd.f32 %v637_v14, %v336_v52 }
  0xb7   : > { %392 = vst [vmem:[%s645_s7 + $0x50] sm:$0xff] %v374_v49 }
  0xb8   : > { %398 = vst [vmem:[%s645_s7 + $0x80] sm:$0xff] %v380_v50  ;;  %v367_v55 = vmax.f32 %v327_v53, 0.0  ;;  %v371_v56 = vmax.f32 %v337_v54, 0.0 }
  0xba   : > { %v346_v57 = vpop.f32.mrf.mxu2  ;;  %385 = vst [vmem:[%s645_s7 + $0x18] sm:$0xff] %v367_v55  ;;  %v361_v58 = vpop.f32.mrf.mxu3 }
  0xbb   : > { %v347_v59 = vadd.f32 %v637_v14, %v346_v57  ;;  %389 = vst [vmem:[%s645_s7 + $0x38] sm:$0xff] %v371_v56  ;;  %v362_v60 = vadd.f32 %v637_v14, %v361_v58 }
  0xbd   : > { %v375_v61 = vmax.f32 %v347_v59, 0.0  ;;  %v381_v62 = vmax.f32 %v362_v60, 0.0 }
  0xbf   : > { %393 = vst [vmem:[%s645_s7 + $0x58] sm:$0xff] %v375_v61 }
  0xc0   : > { %399 = vst [vmem:[%s645_s7 + $0x88] sm:$0xff] %v381_v62 }
  0xc2   : > { %v349_v63 = vpop.f32.mrf.mxu2 }
  0xc3   : > { %v350_v0 = vadd.f32 %v637_v14, %v349_v63 }
  0xc5   : > { %v376_v1 = vmax.f32 %v350_v0, 0.0 }
  0xc7   : > { %394 = vst [vmem:[%s645_s7 + $0x60] sm:$0xff] %v376_v1 }
  0xca   : > { %v351_v2 = vpop.f32.mrf.mxu2 }
  0xcb   : > { %v352_v3 = vadd.f32 %v637_v14, %v351_v2 }
  0xcd   : > { %v377_v4 = vmax.f32 %v352_v3, 0.0 }
  0xcf   : > { %395 = vst [vmem:[%s645_s7 + $0x68] sm:$0xff] %v377_v4 }
  0xd0 PF: > { %s13_s12 = sadd.s32 1, %s574_s12  }
  0xd1   : > { %p10_p4 = scmp.ge.s32.totalorder %s13_s12, 4  }
  0xd3   :  { %12 = sbr.rel (!%p10_p4) target bundleno = 1 (0x1), region = 62 }

// kernel: peleenet_forward.31
= control target key start
LH: loop header
LB: loop body
LE: loop exit
PB: predicated region body
PF: predicated region fallthrough
CT: control target
= control target key end

     0   :  { %s564_s12 = smov 0   ;;  %s646_s0 = inlined_call_operand.vmem [shape: bf16[288,48], index: 0, kind: input, shape index: {}]   ;;  %s647_s1 = inlined_call_operand.vmem [shape: bf16[48,128], index: 1, kind: input, shape index: {}]   ;;  %s648_s2 = inlined_call_operand.vmem [shape: f32[1,128], index: 2, kind: input, shape index: {}]   ;;  %s649_s3 = inlined_call_operand.vmem [shape: f32[288,128], index: 3, kind: output, shape index: {}]  }
   0x1 LB: > { %s440_s13 = sadd.s32 4294967295, %s542_s12   ;;  %p444_p0 = scmp.ge.s32.totalorder %s542_s12, 1  ;;  %s542_s12 = sphi %s564_s12, %s13_s12  }
   0x2   : > { %p138_p1 = scmp.lt.s32.totalorder %s542_s12, 3 }
   0x4   : > { %p139_p2 = pnand %p444_p0, %p138_p1 }
   0x5   : > { %s162_s16 = smul.u32 (!%p139_p2), 18, %s440_s13 }
   0x6   : > { %142 = sbr.rel (%p139_p2) target bundleno = 200 (0xc8), region = 32 }
   0x7   : > { %p163_p3 = scmp.lt.s32.totalorder (!%p139_p2), %s162_s16, 35 }
   0xb   : > { %v517_v0 = vld [vmem:[%s647_s1 + $0x10] sm:$0xff]  ;;  %v516_v1 = vld [vmem:[%s647_s1 + $0x8] sm:$0xff]  ;;  %s651_s16 = smov (!%p163_p3, %s162_s16), 35  ;;  %v515_v2 = vld [vmem:[%s647_s1] sm:$0xff]  ;;  %vm266_vm0 = vcmask 392192  }
   0xc   : > { %518 = vmatpush.bf16.msra.mxu1 %v517_v0  ;;  %520 = vmatpush.bf16.msra.mxu3 %v517_v0  ;;  %s445_s21 = sshll.u32 %s651_s16, 2  ;;  %v599_v12 = vld [vmem:[%s648_s2] ss:$0 sm:$0xff]  ;;  %s446_s27 = sshll.u32 %s651_s16, 3 }
   0xd   : > { %299 = vmatpush.bf16.msra.mxu0 %v517_v0  ;;  %519 = vmatpush.bf16.msra.mxu2 %v517_v0  ;;  %s166_s24 = scalar_lea.vmem %s646_s0, %s445_s21  ;;  %s606_s30 = scalar_lea.vmem %s649_s3, %s446_s27 }
   0xe   : > { %v508_v3 = vld [vmem:[%s166_s24 + $0x10] sm:$0xff]  ;;  %v506_v5 = vld [vmem:[%s166_s24] sm:$0xff]  ;;  %v511_v6 = vld [vmem:[%s166_s24 + $0x28] sm:$0xff] }
   0xf   : > { %v512_v4 = vld [vmem:[%s166_s24 + $0x30] sm:$0xff]  ;;  %v509_v7 = vld [vmem:[%s166_s24 + $0x18] sm:$0xff]  ;;  %v507_v9 = vld [vmem:[%s166_s24 + $0x8] sm:$0xff] }
  0x10   : > { %521 = vmatpush.bf16.msra.mxu1 %v516_v1  ;;  %523 = vmatpush.bf16.msra.mxu3 %v516_v1  ;;  %v513_v8 = vld [vmem:[%s166_s24 + $0x38] sm:$0xff]  ;;  %v510_v10 = vld [vmem:[%s166_s24 + $0x20] sm:$0xff] }
  0x11   : > { %300 = vmatpush.bf16.msra.mxu0 %v516_v1  ;;  %522 = vmatpush.bf16.msra.mxu2 %v516_v1  ;;  %v514_v11 = vld [vmem:[%s166_s24 + $0x40] sm:$0xff] }
  0x14   : > { %524 = vmatpush.bf16.msra.mxu1 %v515_v2  ;;  %526 = vmatpush.bf16.msra.mxu3 %v515_v2 }
  0x15   : > { %301 = vmatpush.bf16.msra.mxu0 %v515_v2  ;;  %525 = vmatpush.bf16.msra.mxu2 %v515_v2 }
  0x17   : > { %497 = vmatmul.msk.bf16.vlgmr.msra.gmra.mxu1 %vm266_vm0, %v508_v3  ;;  %501 = vmatmul.msk.bf16.vlgmr.msra.gmra.mxu3 %vm266_vm0, %v512_v4 }
  0x18   : > { %495 = vmatmul.msk.bf16.vlgmr.msra.gmra.mxu0 %vm266_vm0, %v506_v5  ;;  %500 = vmatmul.msk.bf16.vlgmr.msra.gmra.mxu2 %vm266_vm0, %v511_v6 }
  0x27   : > { %498 = vmatmul.msk.bf16.gmra.mxu1 %vm266_vm0, %v509_v7  ;;  %502 = vmatmul.msk.bf16.gmra.mxu3 %vm266_vm0, %v513_v8 }
  0x28   : > { %496 = vmatmul.msk.bf16.gmra.mxu0 %vm266_vm0, %v507_v9 }
  0x37   : > { %499 = vmatmul.msk.bf16.gmra.mxu1 %vm266_vm0, %v510_v10  ;;  %503 = vmatmul.msk.bf16.gmra.mxu3 %vm266_vm0, %v514_v11 }
  0x94   : > { %v313_v13 = vpop.f32.mrf.mxu1 }
  0x95   : > { %v314_v14 = vadd.f32 %v599_v12, %v313_v13  ;;  %v303_v15 = vpop.f32.mrf.mxu0 }
  0x96   : > { %v304_v16 = vadd.f32 %v599_v12, %v303_v15 }
  0x97   : > { %v352_v17 = vmax.f32 %v314_v14, 0.0 }
  0x98   : > { %v348_v18 = vmax.f32 %v304_v16, 0.0 }
  0x99   : > { %370 = vst [vmem:[%s606_s30 + $0x20] sm:$0xff] %v352_v17 }
  0x9a   : > { %v333_v19 = vpop.f32.mrf.mxu3  ;;  %366 = vst [vmem:[%s606_s30] sm:$0xff] %v348_v18 }
  0x9b   : > { %v334_v20 = vadd.f32 %v599_v12, %v333_v19  ;;  %v328_v21 = vpop.f32.mrf.mxu2 }
  0x9c   : > { %v315_v22 = vpop.f32.mrf.mxu1  ;;  %v329_v23 = vadd.f32 %v599_v12, %v328_v21 }
  0x9d   : > { %v360_v24 = vmax.f32 %v334_v20, 0.0  ;;  %v316_v25 = vadd.f32 %v599_v12, %v315_v22  ;;  %v305_v26 = vpop.f32.mrf.mxu0 }
  0x9e   : > { %v306_v27 = vadd.f32 %v599_v12, %v305_v26  ;;  %v358_v28 = vmax.f32 %v329_v23, 0.0 }
  0x9f   : > { %378 = vst [vmem:[%s606_s30 + $0x60] sm:$0xff] %v360_v24  ;;  %v353_v29 = vmax.f32 %v316_v25, 0.0 }
  0xa0   : > { %v349_v30 = vmax.f32 %v306_v27, 0.0  ;;  %376 = vst [vmem:[%s606_s30 + $0x50] sm:$0xff] %v358_v28 }
  0xa1   : > { %371 = vst [vmem:[%s606_s30 + $0x28] sm:$0xff] %v353_v29 }
  0xa2   : > { %v335_v31 = vpop.f32.mrf.mxu3  ;;  %367 = vst [vmem:[%s606_s30 + $0x8] sm:$0xff] %v349_v30 }
  0xa3   : > { %v336_v32 = vadd.f32 %v599_v12, %v335_v31  ;;  %v330_v33 = vpop.f32.mrf.mxu2 }
  0xa4   : > { %v318_v34 = vpop.f32.mrf.mxu1  ;;  %v331_v35 = vadd.f32 %v599_v12, %v330_v33 }
  0xa5   : > { %v361_v36 = vmax.f32 %v336_v32, 0.0  ;;  %v319_v37 = vadd.f32 %v599_v12, %v318_v34  ;;  %v308_v38 = vpop.f32.mrf.mxu0 }
  0xa6   : > { %v309_v39 = vadd.f32 %v599_v12, %v308_v38  ;;  %v359_v40 = vmax.f32 %v331_v35, 0.0 }
  0xa7   : > { %379 = vst [vmem:[%s606_s30 + $0x68] sm:$0xff] %v361_v36  ;;  %v354_v41 = vmax.f32 %v319_v37, 0.0 }
  0xa8   : > { %v350_v42 = vmax.f32 %v309_v39, 0.0  ;;  %377 = vst [vmem:[%s606_s30 + $0x58] sm:$0xff] %v359_v40 }
  0xa9   : > { %372 = vst [vmem:[%s606_s30 + $0x30] sm:$0xff] %v354_v41 }
  0xaa   : > { %v338_v43 = vpop.f32.mrf.mxu3  ;;  %368 = vst [vmem:[%s606_s30 + $0x10] sm:$0xff] %v350_v42 }
  0xab   : > { %v339_v44 = vadd.f32 %v599_v12, %v338_v43 }
  0xac   : > { %v320_v45 = vpop.f32.mrf.mxu1 }
  0xad   : > { %v362_v46 = vmax.f32 %v339_v44, 0.0  ;;  %v321_v47 = vadd.f32 %v599_v12, %v320_v45  ;;  %v310_v48 = vpop.f32.mrf.mxu0 }
  0xae   : > { %v311_v49 = vadd.f32 %v599_v12, %v310_v48 }
  0xaf   : > { %380 = vst [vmem:[%s606_s30 + $0x70] sm:$0xff] %v362_v46  ;;  %v355_v50 = vmax.f32 %v321_v47, 0.0 }
  0xb0   : > { %v351_v51 = vmax.f32 %v311_v49, 0.0 }
  0xb1   : > { %373 = vst [vmem:[%s606_s30 + $0x38] sm:$0xff] %v355_v50 }
  0xb2   : > { %v340_v52 = vpop.f32.mrf.mxu3  ;;  %369 = vst [vmem:[%s606_s30 + $0x18] sm:$0xff] %v351_v51 }
  0xb3   : > { %v341_v53 = vadd.f32 %v599_v12, %v340_v52 }
  0xb4   : > { %v323_v54 = vpop.f32.mrf.mxu1 }
  0xb5   : > { %v363_v55 = vmax.f32 %v341_v53, 0.0  ;;  %v324_v56 = vadd.f32 %v599_v12, %v323_v54 }
  0xb7   : > { %381 = vst [vmem:[%s606_s30 + $0x78] sm:$0xff] %v363_v55  ;;  %v356_v57 = vmax.f32 %v324_v56, 0.0 }
  0xb9   : > { %374 = vst [vmem:[%s606_s30 + $0x40] sm:$0xff] %v356_v57 }
  0xba   : > { %v343_v58 = vpop.f32.mrf.mxu3 }
  0xbb   : > { %v344_v59 = vadd.f32 %v599_v12, %v343_v58 }
  0xbc   : > { %v325_v60 = vpop.f32.mrf.mxu1 }
  0xbd   : > { %v364_v61 = vmax.f32 %v344_v59, 0.0  ;;  %v326_v62 = vadd.f32 %v599_v12, %v325_v60 }
  0xbf   : > { %382 = vst [vmem:[%s606_s30 + $0x80] sm:$0xff] %v364_v61  ;;  %v357_v63 = vmax.f32 %v326_v62, 0.0 }
  0xc1   : > { %375 = vst [vmem:[%s606_s30 + $0x48] sm:$0xff] %v357_v63 }
  0xc2   : > { %v345_v0 = vpop.f32.mrf.mxu3 }
  0xc3   : > { %v346_v1 = vadd.f32 %v599_v12, %v345_v0 }
  0xc5   : > { %v365_v2 = vmax.f32 %v346_v1, 0.0 }
  0xc7   : > { %383 = vst [vmem:[%s606_s30 + $0x88] sm:$0xff] %v365_v2 }
  0xc8 PF: > { %s13_s12 = sadd.s32 1, %s542_s12  }
  0xc9   : > { %p10_p4 = scmp.ge.s32.totalorder %s13_s12, 4  }
  0xcb   :  { %12 = sbr.rel (!%p10_p4) target bundleno = 1 (0x1), region = 62 }

// kernel: peleenet_forward.32
= control target key start
LH: loop header
LB: loop body
LE: loop exit
PB: predicated region body
PF: predicated region fallthrough
CT: control target
= control target key end

     0   :  { %s411_s12 = smov 0   ;;  %s440_s0 = inlined_call_operand.vmem [shape: bf16[96,48], index: 0, kind: input, shape index: {}]   ;;  %s441_s1 = inlined_call_operand.vmem [shape: bf16[48,128], index: 1, kind: input, shape index: {}]   ;;  %s442_s2 = inlined_call_operand.vmem [shape: f32[1,128], index: 2, kind: input, shape index: {}]   ;;  %s443_s3 = inlined_call_operand.vmem [shape: f32[96,128], index: 3, kind: output, shape index: {}]  }
   0x1 LB: > { %s326_s13 = sadd.s32 4294967295, %s389_s12   ;;  %p330_p0 = scmp.ge.s32.totalorder %s389_s12, 1  ;;  %s389_s12 = sphi %s411_s12, %s13_s12  }
   0x2   : > { %p138_p1 = scmp.lt.s32.totalorder %s389_s12, 3 }
   0x4   : > { %p139_p2 = pnand %p330_p0, %p138_p1 }
   0x5   : > { %s162_s16 = smul.u32 (!%p139_p2), 6, %s326_s13 }
   0x6   : > { %142 = sbr.rel (%p139_p2) target bundleno = 169 (0xa9), region = 32 }
   0x7   : > { %p163_p3 = scmp.lt.s32.totalorder (!%p139_p2), %s162_s16, 11 }
   0xb   : > { %v367_v0 = vld [vmem:[%s441_s1 + $0x10] sm:$0xff]  ;;  %v366_v1 = vld [vmem:[%s441_s1 + $0x8] sm:$0xff]  ;;  %s445_s16 = smov (!%p163_p3, %s162_s16), 11  ;;  %v365_v2 = vld [vmem:[%s441_s1] sm:$0xff]  ;;  %vm224_vm0 = vcmask 392192  }
   0xc   : > { %239 = vmatpush.bf16.msra.mxu0 %v367_v0  ;;  %368 = vmatpush.bf16.msra.mxu1 %v367_v0  ;;  %s331_s21 = sshll.u32 %s445_s16, 2  ;;  %v382_v6 = vld [vmem:[%s442_s2] ss:$0 sm:$0xff]  ;;  %s332_s27 = sshll.u32 %s445_s16, 3 }
   0xd   : > { %369 = vmatpush.bf16.msra.mxu2 %v367_v0  ;;  %s166_s24 = scalar_lea.vmem %s440_s0, %s331_s21  ;;  %s172_s30 = scalar_lea.vmem %s443_s3, %s332_s27 }
   0xe   : > { %v362_v3 = vld [vmem:[%s166_s24] sm:$0xff]  ;;  %v363_v4 = vld [vmem:[%s166_s24 + $0x8] sm:$0xff]  ;;  %v364_v5 = vld [vmem:[%s166_s24 + $0x10] sm:$0xff] }
  0x10   : > { %240 = vmatpush.bf16.msra.mxu0 %v366_v1  ;;  %370 = vmatpush.bf16.msra.mxu1 %v366_v1 }
  0x11   : > { %371 = vmatpush.bf16.msra.mxu2 %v366_v1 }
  0x14   : > { %241 = vmatpush.bf16.msra.mxu0 %v365_v2  ;;  %372 = vmatpush.bf16.msra.mxu1 %v365_v2 }
  0x15   : > { %373 = vmatpush.bf16.msra.mxu2 %v365_v2 }
  0x17   : > { %357 = vmatmul.msk.bf16.vlgmr.msra.gmra.mxu0 %vm224_vm0, %v362_v3  ;;  %358 = vmatmul.msk.bf16.vlgmr.msra.gmra.mxu1 %vm224_vm0, %v363_v4 }
  0x18   : > { %359 = vmatmul.msk.bf16.vlgmr.msra.gmra.mxu2 %vm224_vm0, %v364_v5 }
  0x94   : > { %v243_v7 = vpop.f32.mrf.mxu0  ;;  %v248_v8 = vpop.f32.mrf.mxu1 }
  0x95   : > { %v244_v9 = vadd.f32 %v382_v6, %v243_v7  ;;  %v249_v10 = vadd.f32 %v382_v6, %v248_v8 }
  0x97   : > { %v258_v11 = vmax.f32 %v244_v9, 0.0  ;;  %v260_v12 = vmax.f32 %v249_v10, 0.0 }
  0x99   : > { %264 = vst [vmem:[%s172_s30] sm:$0xff] %v258_v11 }
  0x9a   : > { %266 = vst [vmem:[%s172_s30 + $0x10] sm:$0xff] %v260_v12 }
  0x9b   : > { %v253_v13 = vpop.f32.mrf.mxu2 }
  0x9c   : > { %v254_v14 = vadd.f32 %v382_v6, %v253_v13  ;;  %v245_v15 = vpop.f32.mrf.mxu0  ;;  %v250_v16 = vpop.f32.mrf.mxu1 }
  0x9d   : > { %v246_v17 = vadd.f32 %v382_v6, %v245_v15  ;;  %v251_v18 = vadd.f32 %v382_v6, %v250_v16 }
  0x9e   : > { %v262_v19 = vmax.f32 %v254_v14, 0.0 }
  0x9f   : > { %v259_v20 = vmax.f32 %v246_v17, 0.0  ;;  %v261_v21 = vmax.f32 %v251_v18, 0.0 }
  0xa0   : > { %268 = vst [vmem:[%s172_s30 + $0x20] sm:$0xff] %v262_v19 }
  0xa1   : > { %265 = vst [vmem:[%s172_s30 + $0x8] sm:$0xff] %v259_v20 }
  0xa2   : > { %267 = vst [vmem:[%s172_s30 + $0x18] sm:$0xff] %v261_v21 }
  0xa3   : > { %v255_v22 = vpop.f32.mrf.mxu2 }
  0xa4   : > { %v256_v23 = vadd.f32 %v382_v6, %v255_v22 }
  0xa6   : > { %v263_v24 = vmax.f32 %v256_v23, 0.0 }
  0xa8   : > { %269 = vst [vmem:[%s172_s30 + $0x28] sm:$0xff] %v263_v24 }
  0xa9 PF: > { %s13_s12 = sadd.s32 1, %s389_s12  }
  0xaa   : > { %p10_p4 = scmp.ge.s32.totalorder %s13_s12, 4  }
  0xac   :  { %12 = sbr.rel (!%p10_p4) target bundleno = 1 (0x1), region = 62 }

// kernel: peleenet_forward.33
= control target key start
LH: loop header
LB: loop body
LE: loop exit
PB: predicated region body
PF: predicated region fallthrough
CT: control target
= control target key end

     0   :  { %s1074_s12 = smov 0   ;;  %s1249_s0 = inlined_call_operand.vmem [shape: bf16[96,576], index: 0, kind: input, shape index: {}]   ;;  %s1250_s1 = inlined_call_operand.vmem [shape: bf16[576,128], index: 1, kind: input, shape index: {}]   ;;  %s1251_s2 = inlined_call_operand.vmem [shape: f32[1,128], index: 2, kind: input, shape index: {}]   ;;  %s1252_s3 = inlined_call_operand.vmem [shape: f32[96,128], index: 3, kind: output, shape index: {}]  }
   0x1 LB: > { %s761_s13 = sadd.s32 4294967295, %s1052_s12   ;;  %p765_p0 = scmp.ge.s32.totalorder %s1052_s12, 1  ;;  %s1052_s12 = sphi %s1074_s12, %s13_s12  }
   0x2   : > { %p139_p1 = scmp.lt.s32.totalorder %s1052_s12, 3 }
   0x4   : > { %p140_p2 = pnand %p765_p0, %p139_p1 }
   0x5   : > { %s164_s28 = smul.u32 (!%p140_p2), 6, %s761_s13 }
   0x6   : > { %143 = sbr.rel (%p140_p2) target bundleno = 252 (0xfc), region = 32 }
   0x7   : > { %p165_p3 = scmp.lt.s32.totalorder (!%p140_p2), %s164_s28, 11 }
   0xb   : > { %v999_v0 = vld [vmem:[%s1250_s1 + $0x38] sm:$0xff]  ;;  %v998_v1 = vld [vmem:[%s1250_s1 + $0x30] sm:$0xff]  ;;  %v997_v6 = vld [vmem:[%s1250_s1 + $0x28] sm:$0xff]  ;;  %s1254_s28 = smov (!%p165_p3, %s164_s28), 11  ;;  %vm563_vm0 = vcmask 523264  }
   0xc   : > { %1028 = vmatpush.bf16.msra.mxu1 %v999_v0  ;;  %573 = vmatpush.bf16.msra.mxu0 %v999_v0  ;;  %v1015_v2 = vld [vmem:[%s1250_s1 + $0xb8] sm:$0xff]  ;;  %v1014_v4 = vld [vmem:[%s1250_s1 + $0xb0] sm:$0xff]  ;;  %v1013_v7 = vld [vmem:[%s1250_s1 + $0xa8] sm:$0xff]  ;;  %s1036_s21 = smul.u32 20, %s1254_s28 }
   0xd   : > { %v1023_v3 = vld [vmem:[%s1250_s1 + $0xf8] sm:$0xff]  ;;  %621 = vmatpush.bf16.msra.mxu2 %v1015_v2  ;;  %v1022_v5 = vld [vmem:[%s1250_s1 + $0xf0] sm:$0xff]  ;;  %v1021_v8 = vld [vmem:[%s1250_s1 + $0xe8] sm:$0xff] }
   0xe   : > { %645 = vmatpush.bf16.msra.mxu3 %v1023_v3  ;;  %v996_v9 = vld [vmem:[%s1250_s1 + $0x20] sm:$0xff]  ;;  %v995_v12 = vld [vmem:[%s1250_s1 + $0x18] sm:$0xff]  ;;  %v994_v15 = vld [vmem:[%s1250_s1 + $0x10] sm:$0xff]  ;;  %s1145_s4 = scalar_lea.vmem %s1249_s0, %s1036_s21 }
   0xf   : > { %v1012_v10 = vld [vmem:[%s1250_s1 + $0xa0] sm:$0xff]  ;;  %v1011_v13 = vld [vmem:[%s1250_s1 + $0x98] sm:$0xff]  ;;  %v1010_v16 = vld [vmem:[%s1250_s1 + $0x90] sm:$0xff] }
  0x10   : > { %1029 = vmatpush.bf16.msra.mxu1 %v998_v1  ;;  %574 = vmatpush.bf16.msra.mxu0 %v998_v1  ;;  %v1020_v11 = vld [vmem:[%s1250_s1 + $0xe0] sm:$0xff]  ;;  %v1019_v14 = vld [vmem:[%s1250_s1 + $0xd8] sm:$0xff]  ;;  %v1018_v17 = vld [vmem:[%s1250_s1 + $0xd0] sm:$0xff] }
  0x11   : > { %622 = vmatpush.bf16.msra.mxu2 %v1014_v4  ;;  %v993_v18 = vld [vmem:[%s1250_s1 + $0x8] sm:$0xff]  ;;  %v992_v21 = vld [vmem:[%s1250_s1] sm:$0xff]  ;;  %v984_v23 = vld [vmem:[%s1145_s4 + $0x38] sm:$0xf0] }
  0x12   : > { %646 = vmatpush.bf16.msra.mxu3 %v1022_v5  ;;  %v1009_v19 = vld [vmem:[%s1250_s1 + $0x88] sm:$0xff]  ;;  %v770_v24 = vld [vmem:[%s1145_s4] sm:$0xf]  ;;  %v979_v25 = vld [vmem:[%s1145_s4 + $0x10] sm:$0xf0] }
  0x13   : > { %v1017_v20 = vld [vmem:[%s1250_s1 + $0xc8] sm:$0xff]  ;;  %v1007_v26 = vld [vmem:[%s1250_s1 + $0x78] sm:$0xff]  ;;  %v1008_v28 = vld [vmem:[%s1250_s1 + $0x80] sm:$0xff]  ;;  %v771_v32 = vor.u32 %v979_v25, %v770_v24 }
  0x14   : > { %1030 = vmatpush.bf16.msra.mxu1 %v997_v6  ;;  %575 = vmatpush.bf16.msra.mxu0 %v997_v6  ;;  %v790_v22 = vld [vmem:[%s1145_s4 + $0x28] sm:$0xf]  ;;  %v1027_v27 = vld [vmem:[%s1250_s1 + $0x118] sm:$0xff]  ;;  %v1016_v29 = vld [vmem:[%s1250_s1 + $0xc0] sm:$0xff] }
  0x15   : > { %623 = vmatpush.bf16.msra.mxu2 %v1013_v7  ;;  %v778_v30 = vld [vmem:[%s1145_s4 + $0x8] sm:$0xf]  ;;  %v791_v31 = vor.u32 %v984_v23, %v790_v22  ;;  %v980_v33 = vld [vmem:[%s1145_s4 + $0x18] sm:$0xf0]  ;;  %v978_v34 = vld [vmem:[%s1145_s4 + $0xc] sm:$0xf] }
  0x16   : > { %647 = vmatpush.bf16.msra.mxu3 %v1021_v8  ;;  %v780_v35 = vld [vmem:[%s1145_s4 + $0x1c] sm:$0xf0]  ;;  %v1006_v36 = vld [vmem:[%s1250_s1 + $0x70] sm:$0xff]  ;;  %v779_v38 = vor.u32 %v980_v33, %v778_v30  ;;  %v1005_v40 = vld [vmem:[%s1250_s1 + $0x68] sm:$0xff] }
  0x17   : > { %v1026_v37 = vld [vmem:[%s1250_s1 + $0x110] sm:$0xff]  ;;  %v783_v39 = vor.u32 %v978_v34, %v780_v35  ;;  %v1025_v41 = vld [vmem:[%s1250_s1 + $0x108] sm:$0xff]  ;;  %v1004_v42 = vld [vmem:[%s1250_s1 + $0x60] sm:$0xff] }
  0x18   : > { %1031 = vmatpush.bf16.msra.mxu1 %v996_v9  ;;  %576 = vmatpush.bf16.msra.mxu0 %v996_v9  ;;  %v1024_v43 = vld [vmem:[%s1250_s1 + $0x100] sm:$0xff]  ;;  %v810_v44 = vld [vmem:[%s1145_s4 + $0x50] sm:$0xf]  ;;  %v1003_v48 = vld [vmem:[%s1250_s1 + $0x58] sm:$0xff] }
  0x19   : > { %624 = vmatpush.bf16.msra.mxu2 %v1012_v10  ;;  %v989_v45 = vld [vmem:[%s1145_s4 + $0x60] sm:$0xf0]  ;;  %v786_v46 = vld [vmem:[%s1145_s4 + $0x10] sm:$0xf]  ;;  %v983_v53 = vld [vmem:[%s1145_s4 + $0x34] sm:$0xf] }
  0x1a   : > { %648 = vmatpush.bf16.msra.mxu3 %v1020_v11  ;;  %v981_v47 = vld [vmem:[%s1145_s4 + $0x20] sm:$0xf0]  ;;  %v798_v49 = vld [vmem:[%s1145_s4 + $0x30] sm:$0xf]  ;;  %v811_v50 = vor.u32 %v989_v45, %v810_v44  ;;  %v800_v54 = vld [vmem:[%s1145_s4 + $0x44] sm:$0xf0] }
  0x1b   : > { %v787_v51 = vor.u32 %v981_v47, %v786_v46  ;;  %v985_v52 = vld [vmem:[%s1145_s4 + $0x40] sm:$0xf0]  ;;  %v1002_v55 = vld [vmem:[%s1250_s1 + $0x50] sm:$0xff]  ;;  %v803_v57 = vor.u32 %v983_v53, %v800_v54  ;;  %v1001_v58 = vld [vmem:[%s1250_s1 + $0x48] sm:$0xff] }
  0x1c   : > { %1032 = vmatpush.bf16.msra.mxu1 %v995_v12  ;;  %577 = vmatpush.bf16.msra.mxu0 %v995_v12  ;;  %v799_v56 = vor.u32 %v985_v52, %v798_v49  ;;  %v1000_v59 = vld [vmem:[%s1250_s1 + $0x40] sm:$0xff]  ;;  %v772_v61 = vld [vmem:[%s1145_s4 + $0x14] sm:$0xf0]  ;;  %v986_v63 = vld [vmem:[%s1145_s4 + $0x48] sm:$0xf0] }
  0x1d   : > { %625 = vmatpush.bf16.msra.mxu2 %v1011_v13  ;;  %v977_v60 = vld [vmem:[%s1145_s4 + $0x4] sm:$0xf]  ;;  %v806_v62 = vld [vmem:[%s1145_s4 + $0x38] sm:$0xf]  ;;  %v990_v3 = vld [vmem:[%s1145_s4 + $0x68] sm:$0xf0] }
  0x1e   : > { %649 = vmatpush.bf16.msra.mxu3 %v1019_v14  ;;  %v818_v0 = vld [vmem:[%s1145_s4 + $0x58] sm:$0xf]  ;;  %v775_v1 = vor.u32 %v977_v60, %v772_v61  ;;  %v807_v2 = vor.u32 %v986_v63, %v806_v62  ;;  %v988_v4 = vld [vmem:[%s1145_s4 + $0x5c] sm:$0xf]  ;;  %v820_v5 = vld [vmem:[%s1145_s4 + $0x6c] sm:$0xf0] }
  0x1f   : > { %v819_v6 = vor.u32 %v990_v3, %v818_v0  ;;  %v823_v7 = vor.u32 %v988_v4, %v820_v5  ;;  %v982_v8 = vld [vmem:[%s1145_s4 + $0x2c] sm:$0xf]  ;;  %v792_v9 = vld [vmem:[%s1145_s4 + $0x3c] sm:$0xf0]  ;;  %v991_v11 = vld [vmem:[%s1145_s4 + $0x70] sm:$0xf0] }
  0x20   : > { %1033 = vmatpush.bf16.msra.mxu1 %v994_v15  ;;  %578 = vmatpush.bf16.msra.mxu0 %v994_v15  ;;  %v826_v10 = vld [vmem:[%s1145_s4 + $0x60] sm:$0xf]  ;;  %v795_v12 = vor.u32 %v982_v8, %v792_v9  ;;  %v987_v14 = vld [vmem:[%s1145_s4 + $0x54] sm:$0xf]  ;;  %v812_v15 = vld [vmem:[%s1145_s4 + $0x64] sm:$0xf0] }
  0x21   : > { %626 = vmatpush.bf16.msra.mxu2 %v1010_v16  ;;  %v827_v13 = vor.u32 %v991_v11, %v826_v10  ;;  %v815_v16 = vor.u32 %v987_v14, %v812_v15  ;;  %s767_s4 = sshll.u32 %s1254_s28, 3 }
  0x22   : > { %650 = vmatpush.bf16.msra.mxu3 %v1018_v17  ;;  %s1238_s20 = scalar_lea.vmem %s1252_s3, %s767_s4 }
  0x24   : > { %1034 = vmatpush.bf16.msra.mxu1 %v993_v18  ;;  %579 = vmatpush.bf16.msra.mxu0 %v993_v18 }
  0x25   : > { %627 = vmatpush.bf16.msra.mxu2 %v1009_v19 }
  0x26   : > { %651 = vmatpush.bf16.msra.mxu3 %v1017_v20 }
  0x28   : > { %1035 = vmatpush.bf16.msra.mxu1 %v992_v21  ;;  %580 = vmatpush.bf16.msra.mxu0 %v992_v21 }
  0x29   : > { %628 = vmatpush.bf16.msra.mxu2 %v1008_v28 }
  0x2a   : > { %652 = vmatpush.bf16.msra.mxu3 %v1016_v29 }
  0x2b   : > { %586 = vmatmul.bf16.vlgmr.msra.gmra.mxu1 %v791_v31  ;;  %581 = vmatmul.bf16.vlgmr.msra.gmra.mxu0 %v771_v32 }
  0x2c   : > { %597 = vmatpush.bf16.msrb.mxu1 %v1007_v26  ;;  %673 = vmatpush.bf16.msrb.mxu0 %v1027_v27  ;;  %v1045_v26 = vld [vmem:[%s1251_s2] ss:$0 sm:$0xff] }
  0x2d   : > { %629 = vmatmul.bf16.vlgmr.msra.gmra.mxu2 %v779_v38  ;;  %653 = vmatmul.bf16.vlgmr.msra.gmra.mxu3 %v783_v39 }
  0x30   : > { %598 = vmatpush.bf16.msrb.mxu1 %v1006_v36  ;;  %674 = vmatpush.bf16.msrb.mxu0 %v1026_v37 }
  0x34   : > { %599 = vmatpush.bf16.msrb.mxu1 %v1005_v40  ;;  %675 = vmatpush.bf16.msrb.mxu0 %v1025_v41 }
  0x38   : > { %600 = vmatpush.bf16.msrb.mxu1 %v1004_v42  ;;  %676 = vmatpush.bf16.msrb.mxu0 %v1024_v43 }
  0x3b   : > { %591 = vmatmul.bf16.gmra.mxu1 %v811_v50  ;;  %972 = vmatmul.msk.bf16.vlgmr.msrb.gmra.mxu0 %vm563_vm0, %v787_v51 }
  0x3c   : > { %601 = vmatpush.bf16.msrb.mxu1 %v1003_v48 }
  0x3d   : > { %634 = vmatmul.bf16.gmra.mxu2 %v799_v56  ;;  %658 = vmatmul.bf16.gmra.mxu3 %v803_v57 }
  0x40   : > { %602 = vmatpush.bf16.msrb.mxu1 %v1002_v55 }
  0x44   : > { %603 = vmatpush.bf16.msrb.mxu1 %v1001_v58 }
  0x48   : > { %604 = vmatpush.bf16.msrb.mxu1 %v1000_v59 }
  0x4b   : > { %605 = vmatmul.bf16.vlgmr.msrb.gmra.mxu1 %v775_v1  ;;  %973 = vmatmul.msk.bf16.gmra.mxu0 %vm563_vm0, %v807_v2 }
  0x4d   : > { %639 = vmatmul.bf16.gmra.mxu2 %v819_v6  ;;  %663 = vmatmul.bf16.gmra.mxu3 %v823_v7 }
  0x5b   : > { %610 = vmatmul.bf16.gmra.mxu1 %v795_v12  ;;  %974 = vmatmul.msk.bf16.gmra.mxu0 %vm563_vm0, %v827_v13 }
  0x6b   : > { %615 = vmatmul.bf16.gmra.mxu1 %v815_v16 }
  0xa8   : > { %v587_v17 = vpop.f32.mrf.mxu1  ;;  %v582_v19 = vpop.f32.mrf.mxu0 }
  0xa9   : > { %v583_v27 = vadd.f32 %v1045_v26, %v582_v19  ;;  %v588_v44 = vadd.f32 %v1045_v26, %v587_v17 }
  0xb0   : > { %v589_v18 = vpop.f32.mrf.mxu1  ;;  %v584_v21 = vpop.f32.mrf.mxu0 }
  0xb1   : > { %v630_v23 = vpop.f32.mrf.mxu2  ;;  %v654_v24 = vpop.f32.mrf.mxu3  ;;  %v585_v35 = vadd.f32 %v1045_v26, %v584_v21  ;;  %v590_v53 = vadd.f32 %v1045_v26, %v589_v18 }
  0xb8   : > { %v592_v20 = vpop.f32.mrf.mxu1  ;;  %v678_v25 = vpop.f32.mrf.mxu0 }
  0xb9   : > { %v632_v30 = vpop.f32.mrf.mxu2  ;;  %v656_v32 = vpop.f32.mrf.mxu3  ;;  %v593_v62 = vadd.f32 %v1045_v26, %v592_v20 }
  0xc0   : > { %v594_v22 = vpop.f32.mrf.mxu1  ;;  %v680_v34 = vpop.f32.mrf.mxu0 }
  0xc1   : > { %v635_v41 = vpop.f32.mrf.mxu2  ;;  %v659_v43 = vpop.f32.mrf.mxu3  ;;  %v595_v8 = vadd.f32 %v1045_v26, %v594_v22 }
  0xc8   : > { %v606_v28 = vpop.f32.mrf.mxu1  ;;  %v683_v46 = vpop.f32.mrf.mxu0 }
  0xc9   : > { %v607_v29 = vadd.f32 %v606_v28, %v583_v27  ;;  %v637_v52 = vpop.f32.mrf.mxu2  ;;  %v661_v55 = vpop.f32.mrf.mxu3 }
  0xcb   : > { %v631_v31 = vadd.f32 %v630_v23, %v607_v29 }
  0xcd   : > { %v655_v33 = vadd.f32 %v654_v24, %v631_v31 }
  0xcf   : > { %v679_v36 = vadd.f32 %v678_v25, %v655_v33 }
  0xd0   : > { %v608_v37 = vpop.f32.mrf.mxu1  ;;  %v685_v59 = vpop.f32.mrf.mxu0 }
  0xd1   : > { %v693_v38 = vmax.f32 %v679_v36, 0.0  ;;  %v609_v39 = vadd.f32 %v608_v37, %v585_v35  ;;  %v640_v0 = vpop.f32.mrf.mxu2  ;;  %v664_v4 = vpop.f32.mrf.mxu3 }
  0xd3   : > { %699 = vst [vmem:[%s1238_s20] sm:$0xff] %v693_v38  ;;  %v633_v40 = vadd.f32 %v632_v30, %v609_v39 }
  0xd5   : > { %v657_v42 = vadd.f32 %v656_v32, %v633_v40 }
  0xd7   : > { %v681_v45 = vadd.f32 %v680_v34, %v657_v42 }
  0xd8   : > { %v611_v47 = vpop.f32.mrf.mxu1  ;;  %v688_v6 = vpop.f32.mrf.mxu0 }
  0xd9   : > { %v694_v48 = vmax.f32 %v681_v45, 0.0  ;;  %v612_v49 = vadd.f32 %v611_v47, %v588_v44  ;;  %v642_v13 = vpop.f32.mrf.mxu2  ;;  %v666_v15 = vpop.f32.mrf.mxu3 }
  0xdb   : > { %700 = vst [vmem:[%s1238_s20 + $0x8] sm:$0xff] %v694_v48  ;;  %v636_v50 = vadd.f32 %v635_v41, %v612_v49 }
  0xdd   : > { %v660_v51 = vadd.f32 %v659_v43, %v636_v50 }
  0xdf   : > { %v684_v54 = vadd.f32 %v683_v46, %v660_v51 }
  0xe0   : > { %v613_v56 = vpop.f32.mrf.mxu1  ;;  %v690_v17 = vpop.f32.mrf.mxu0 }
  0xe1   : > { %v695_v57 = vmax.f32 %v684_v54, 0.0  ;;  %v614_v58 = vadd.f32 %v613_v56, %v590_v53 }
  0xe3   : > { %701 = vst [vmem:[%s1238_s20 + $0x10] sm:$0xff] %v695_v57  ;;  %v638_v60 = vadd.f32 %v637_v52, %v614_v58 }
  0xe5   : > { %v662_v61 = vadd.f32 %v661_v55, %v638_v60 }
  0xe7   : > { %v686_v63 = vadd.f32 %v685_v59, %v662_v61 }
  0xe8   : > { %v616_v1 = vpop.f32.mrf.mxu1 }
  0xe9   : > { %v696_v2 = vmax.f32 %v686_v63, 0.0  ;;  %v617_v3 = vadd.f32 %v616_v1, %v593_v62 }
  0xeb   : > { %702 = vst [vmem:[%s1238_s20 + $0x18] sm:$0xff] %v696_v2  ;;  %v641_v5 = vadd.f32 %v640_v0, %v617_v3 }
  0xed   : > { %v665_v7 = vadd.f32 %v664_v4, %v641_v5 }
  0xef   : > { %v689_v9 = vadd.f32 %v688_v6, %v665_v7 }
  0xf0   : > { %v618_v10 = vpop.f32.mrf.mxu1 }
  0xf1   : > { %v697_v11 = vmax.f32 %v689_v9, 0.0  ;;  %v619_v12 = vadd.f32 %v618_v10, %v595_v8 }
  0xf3   : > { %703 = vst [vmem:[%s1238_s20 + $0x20] sm:$0xff] %v697_v11  ;;  %v643_v14 = vadd.f32 %v642_v13, %v619_v12 }
  0xf5   : > { %v667_v16 = vadd.f32 %v666_v15, %v643_v14 }
  0xf7   : > { %v691_v18 = vadd.f32 %v690_v17, %v667_v16 }
  0xf9   : > { %v698_v19 = vmax.f32 %v691_v18, 0.0 }
  0xfb   : > { %704 = vst [vmem:[%s1238_s20 + $0x28] sm:$0xff] %v698_v19 }
  0xfc PF: > { %s13_s12 = sadd.s32 1, %s1052_s12  }
  0xfd   : > { %p10_p4 = scmp.ge.s32.totalorder %s13_s12, 4  }
  0xff   :  { %12 = sbr.rel (!%p10_p4) target bundleno = 1 (0x1), region = 62 }

// kernel: peleenet_forward.34
= control target key start
LH: loop header
LB: loop body
LE: loop exit
PB: predicated region body
PF: predicated region fallthrough
CT: control target
= control target key end

     0   :  { %s441_s12 = smov 0   ;;  %s476_s0 = inlined_call_operand.vmem [shape: bf16[96,80], index: 0, kind: input, shape index: {}]   ;;  %s477_s1 = inlined_call_operand.vmem [shape: bf16[80,128], index: 1, kind: input, shape index: {}]   ;;  %s478_s2 = inlined_call_operand.vmem [shape: f32[1,128], index: 2, kind: input, shape index: {}]   ;;  %s479_s3 = inlined_call_operand.vmem [shape: f32[96,128], index: 3, kind: output, shape index: {}]  }
   0x1 LB: > { %s342_s13 = sadd.s32 4294967295, %s419_s12   ;;  %p346_p0 = scmp.ge.s32.totalorder %s419_s12, 1  ;;  %s419_s12 = sphi %s441_s12, %s13_s12  }
   0x2   : > { %p138_p1 = scmp.lt.s32.totalorder %s419_s12, 3 }
   0x4   : > { %p139_p2 = pnand %p346_p0, %p138_p1 }
   0x5   : > { %s162_s16 = smul.u32 (!%p139_p2), 6, %s342_s13 }
   0x6   : > { %142 = sbr.rel (%p139_p2) target bundleno = 177 (0xb1), region = 32 }
   0x7   : > { %p163_p3 = scmp.lt.s32.totalorder (!%p139_p2), %s162_s16, 11 }
   0xb   : > { %v393_v0 = vld [vmem:[%s477_s1 + $0x20] sm:$0xff]  ;;  %v392_v1 = vld [vmem:[%s477_s1 + $0x18] sm:$0xff]  ;;  %v391_v2 = vld [vmem:[%s477_s1 + $0x10] sm:$0xff]  ;;  %s481_s16 = smov (!%p163_p3, %s162_s16), 11  ;;  %vm240_vm0 = vcmask 654336  }
   0xc   : > { %253 = vmatpush.bf16.msra.mxu0 %v393_v0  ;;  %394 = vmatpush.bf16.msra.mxu1 %v393_v0  ;;  %v390_v3 = vld [vmem:[%s477_s1 + $0x8] sm:$0xff]  ;;  %s347_s23 = sshll.u32 %s481_s16, 2  ;;  %v389_v4 = vld [vmem:[%s477_s1] sm:$0xff]  ;;  %s348_s4 = sshll.u32 %s481_s16, 3 }
   0xd   : > { %395 = vmatpush.bf16.msra.mxu2 %v393_v0  ;;  %s166_s28 = scalar_lea.vmem %s476_s0, %s347_s23  ;;  %v412_v8 = vld [vmem:[%s478_s2] ss:$0 sm:$0xff]  ;;  %s172_s7 = scalar_lea.vmem %s479_s3, %s348_s4 }
   0xe   : > { %v386_v5 = vld [vmem:[%s166_s28] sm:$0xff]  ;;  %v387_v6 = vld [vmem:[%s166_s28 + $0x8] sm:$0xff]  ;;  %v388_v7 = vld [vmem:[%s166_s28 + $0x10] sm:$0xff] }
  0x10   : > { %254 = vmatpush.bf16.msra.mxu0 %v392_v1  ;;  %396 = vmatpush.bf16.msra.mxu1 %v392_v1 }
  0x11   : > { %397 = vmatpush.bf16.msra.mxu2 %v392_v1 }
  0x14   : > { %255 = vmatpush.bf16.msra.mxu0 %v391_v2  ;;  %398 = vmatpush.bf16.msra.mxu1 %v391_v2 }
  0x15   : > { %399 = vmatpush.bf16.msra.mxu2 %v391_v2 }
  0x18   : > { %256 = vmatpush.bf16.msra.mxu0 %v390_v3  ;;  %400 = vmatpush.bf16.msra.mxu1 %v390_v3 }
  0x19   : > { %401 = vmatpush.bf16.msra.mxu2 %v390_v3 }
  0x1c   : > { %257 = vmatpush.bf16.msra.mxu0 %v389_v4  ;;  %402 = vmatpush.bf16.msra.mxu1 %v389_v4 }
  0x1d   : > { %403 = vmatpush.bf16.msra.mxu2 %v389_v4 }
  0x1f   : > { %381 = vmatmul.msk.bf16.vlgmr.msra.gmra.mxu0 %vm240_vm0, %v386_v5  ;;  %382 = vmatmul.msk.bf16.vlgmr.msra.gmra.mxu1 %vm240_vm0, %v387_v6 }
  0x20   : > { %383 = vmatmul.msk.bf16.vlgmr.msra.gmra.mxu2 %vm240_vm0, %v388_v7 }
  0x9c   : > { %v259_v9 = vpop.f32.mrf.mxu0  ;;  %v264_v10 = vpop.f32.mrf.mxu1 }
  0x9d   : > { %v260_v11 = vadd.f32 %v412_v8, %v259_v9  ;;  %v265_v12 = vadd.f32 %v412_v8, %v264_v10 }
  0x9f   : > { %v274_v13 = vmax.f32 %v260_v11, 0.0  ;;  %v276_v14 = vmax.f32 %v265_v12, 0.0 }
  0xa1   : > { %280 = vst [vmem:[%s172_s7] sm:$0xff] %v274_v13 }
  0xa2   : > { %282 = vst [vmem:[%s172_s7 + $0x10] sm:$0xff] %v276_v14 }
  0xa3   : > { %v269_v15 = vpop.f32.mrf.mxu2 }
  0xa4   : > { %v270_v16 = vadd.f32 %v412_v8, %v269_v15  ;;  %v261_v17 = vpop.f32.mrf.mxu0  ;;  %v266_v18 = vpop.f32.mrf.mxu1 }
  0xa5   : > { %v262_v19 = vadd.f32 %v412_v8, %v261_v17  ;;  %v267_v20 = vadd.f32 %v412_v8, %v266_v18 }
  0xa6   : > { %v278_v21 = vmax.f32 %v270_v16, 0.0 }
  0xa7   : > { %v275_v22 = vmax.f32 %v262_v19, 0.0  ;;  %v277_v23 = vmax.f32 %v267_v20, 0.0 }
  0xa8   : > { %284 = vst [vmem:[%s172_s7 + $0x20] sm:$0xff] %v278_v21 }
  0xa9   : > { %281 = vst [vmem:[%s172_s7 + $0x8] sm:$0xff] %v275_v22 }
  0xaa   : > { %283 = vst [vmem:[%s172_s7 + $0x18] sm:$0xff] %v277_v23 }
  0xab   : > { %v271_v24 = vpop.f32.mrf.mxu2 }
  0xac   : > { %v272_v25 = vadd.f32 %v412_v8, %v271_v24 }
  0xae   : > { %v279_v26 = vmax.f32 %v272_v25, 0.0 }
  0xb0   : > { %285 = vst [vmem:[%s172_s7 + $0x28] sm:$0xff] %v279_v26 }
  0xb1 PF: > { %s13_s12 = sadd.s32 1, %s419_s12  }
  0xb2   : > { %p10_p4 = scmp.ge.s32.totalorder %s13_s12, 4  }
  0xb4   :  { %12 = sbr.rel (!%p10_p4) target bundleno = 1 (0x1), region = 62 }

// kernel: peleenet_forward.35
= control target key start
LH: loop header
LB: loop body
LE: loop exit
PB: predicated region body
PF: predicated region fallthrough
CT: control target
= control target key end

     0   :  { %s426_s12 = smov 0   ;;  %s458_s0 = inlined_call_operand.vmem [shape: bf16[96,64], index: 0, kind: input, shape index: {}]   ;;  %s459_s1 = inlined_call_operand.vmem [shape: bf16[64,128], index: 1, kind: input, shape index: {}]   ;;  %s460_s2 = inlined_call_operand.vmem [shape: f32[1,128], index: 2, kind: input, shape index: {}]   ;;  %s461_s3 = inlined_call_operand.vmem [shape: f32[96,128], index: 3, kind: output, shape index: {}]  }
   0x1 LB: > { %s334_s13 = sadd.s32 4294967295, %s404_s12   ;;  %p338_p0 = scmp.ge.s32.totalorder %s404_s12, 1  ;;  %s404_s12 = sphi %s426_s12, %s13_s12  }
   0x2   : > { %p138_p1 = scmp.lt.s32.totalorder %s404_s12, 3 }
   0x4   : > { %p139_p2 = pnand %p338_p0, %p138_p1 }
   0x5   : > { %s162_s16 = smul.u32 (!%p139_p2), 6, %s334_s13 }
   0x6   : > { %142 = sbr.rel (%p139_p2) target bundleno = 173 (0xad), region = 32 }
   0x7   : > { %p163_p3 = scmp.lt.s32.totalorder (!%p139_p2), %s162_s16, 11 }
   0xb   : > { %v380_v0 = vld [vmem:[%s459_s1 + $0x18] sm:$0xff]  ;;  %v379_v1 = vld [vmem:[%s459_s1 + $0x10] sm:$0xff]  ;;  %s463_s16 = smov (!%p163_p3, %s162_s16), 11  ;;  %v378_v2 = vld [vmem:[%s459_s1 + $0x8] sm:$0xff]  ;;  %vm232_vm0 = vcmask 523264  }
   0xc   : > { %246 = vmatpush.bf16.msra.mxu0 %v380_v0  ;;  %381 = vmatpush.bf16.msra.mxu1 %v380_v0  ;;  %s339_s21 = sshll.u32 %s463_s16, 2  ;;  %v377_v3 = vld [vmem:[%s459_s1] sm:$0xff]  ;;  %s340_s29 = sshll.u32 %s463_s16, 3 }
   0xd   : > { %382 = vmatpush.bf16.msra.mxu2 %v380_v0  ;;  %s166_s26 = scalar_lea.vmem %s458_s0, %s339_s21  ;;  %v397_v7 = vld [vmem:[%s460_s2] ss:$0 sm:$0xff]  ;;  %s172_s5 = scalar_lea.vmem %s461_s3, %s340_s29 }
   0xe   : > { %v374_v4 = vld [vmem:[%s166_s26] sm:$0xff]  ;;  %v375_v5 = vld [vmem:[%s166_s26 + $0x8] sm:$0xff]  ;;  %v376_v6 = vld [vmem:[%s166_s26 + $0x10] sm:$0xff] }
  0x10   : > { %247 = vmatpush.bf16.msra.mxu0 %v379_v1  ;;  %383 = vmatpush.bf16.msra.mxu1 %v379_v1 }
  0x11   : > { %384 = vmatpush.bf16.msra.mxu2 %v379_v1 }
  0x14   : > { %248 = vmatpush.bf16.msra.mxu0 %v378_v2  ;;  %385 = vmatpush.bf16.msra.mxu1 %v378_v2 }
  0x15   : > { %386 = vmatpush.bf16.msra.mxu2 %v378_v2 }
  0x18   : > { %249 = vmatpush.bf16.msra.mxu0 %v377_v3  ;;  %387 = vmatpush.bf16.msra.mxu1 %v377_v3 }
  0x19   : > { %388 = vmatpush.bf16.msra.mxu2 %v377_v3 }
  0x1b   : > { %369 = vmatmul.msk.bf16.vlgmr.msra.gmra.mxu0 %vm232_vm0, %v374_v4  ;;  %370 = vmatmul.msk.bf16.vlgmr.msra.gmra.mxu1 %vm232_vm0, %v375_v5 }
  0x1c   : > { %371 = vmatmul.msk.bf16.vlgmr.msra.gmra.mxu2 %vm232_vm0, %v376_v6 }
  0x98   : > { %v251_v8 = vpop.f32.mrf.mxu0  ;;  %v256_v9 = vpop.f32.mrf.mxu1 }
  0x99   : > { %v252_v10 = vadd.f32 %v397_v7, %v251_v8  ;;  %v257_v11 = vadd.f32 %v397_v7, %v256_v9 }
  0x9b   : > { %v266_v12 = vmax.f32 %v252_v10, 0.0  ;;  %v268_v13 = vmax.f32 %v257_v11, 0.0 }
  0x9d   : > { %272 = vst [vmem:[%s172_s5] sm:$0xff] %v266_v12 }
  0x9e   : > { %274 = vst [vmem:[%s172_s5 + $0x10] sm:$0xff] %v268_v13 }
  0x9f   : > { %v261_v14 = vpop.f32.mrf.mxu2 }
  0xa0   : > { %v262_v15 = vadd.f32 %v397_v7, %v261_v14  ;;  %v253_v16 = vpop.f32.mrf.mxu0  ;;  %v258_v17 = vpop.f32.mrf.mxu1 }
  0xa1   : > { %v254_v18 = vadd.f32 %v397_v7, %v253_v16  ;;  %v259_v19 = vadd.f32 %v397_v7, %v258_v17 }
  0xa2   : > { %v270_v20 = vmax.f32 %v262_v15, 0.0 }
  0xa3   : > { %v267_v21 = vmax.f32 %v254_v18, 0.0  ;;  %v269_v22 = vmax.f32 %v259_v19, 0.0 }
  0xa4   : > { %276 = vst [vmem:[%s172_s5 + $0x20] sm:$0xff] %v270_v20 }
  0xa5   : > { %273 = vst [vmem:[%s172_s5 + $0x8] sm:$0xff] %v267_v21 }
  0xa6   : > { %275 = vst [vmem:[%s172_s5 + $0x18] sm:$0xff] %v269_v22 }
  0xa7   : > { %v263_v23 = vpop.f32.mrf.mxu2 }
  0xa8   : > { %v264_v24 = vadd.f32 %v397_v7, %v263_v23 }
  0xaa   : > { %v271_v25 = vmax.f32 %v264_v24, 0.0 }
  0xac   : > { %277 = vst [vmem:[%s172_s5 + $0x28] sm:$0xff] %v271_v25 }
  0xad PF: > { %s13_s12 = sadd.s32 1, %s404_s12  }
  0xae   : > { %p10_p4 = scmp.ge.s32.totalorder %s13_s12, 4  }
  0xb0   :  { %12 = sbr.rel (!%p10_p4) target bundleno = 1 (0x1), region = 62 }

// kernel: peleenet_forward.36
= control target key start
LH: loop header
LB: loop body
LE: loop exit
PB: predicated region body
PF: predicated region fallthrough
CT: control target
= control target key end

     0   :  { %s370_s12 = smov 0   ;;  %s402_s0 = inlined_call_operand.vmem [shape: bf16[32,64], index: 0, kind: input, shape index: {}]   ;;  %s403_s1 = inlined_call_operand.vmem [shape: bf16[64,128], index: 1, kind: input, shape index: {}]   ;;  %s404_s2 = inlined_call_operand.vmem [shape: f32[1,128], index: 2, kind: input, shape index: {}]   ;;  %s405_s3 = inlined_call_operand.vmem [shape: f32[32,128], index: 3, kind: output, shape index: {}]  }
   0x1 LB: > { %s296_s13 = sadd.s32 4294967295, %s348_s12   ;;  %p300_p0 = scmp.ge.s32.totalorder %s348_s12, 1  ;;  %s348_s12 = sphi %s370_s12, %s13_s12  }
   0x2   : > { %p138_p1 = scmp.lt.s32.totalorder %s348_s12, 3 }
   0x4   : > { %p139_p2 = pnand %p300_p0, %p138_p1 }
   0x5   : > { %s301_s16 = sshll.u32 (!%p139_p2), %s296_s13, 1 }
   0x6   : > { %142 = sbr.rel (%p139_p2) target bundleno = 166 (0xa6), region = 32  ;;  %p163_p3 = scmp.lt.s32.totalorder (!%p139_p2), %s301_s16, 3 }
   0xb   : > { %v332_v0 = vld [vmem:[%s403_s1 + $0x18] sm:$0xff]  ;;  %v331_v1 = vld [vmem:[%s403_s1 + $0x10] sm:$0xff]  ;;  %s407_s16 = smov (!%p163_p3, %s301_s16), 3  ;;  %v330_v2 = vld [vmem:[%s403_s1 + $0x8] sm:$0xff]  ;;  %vm218_vm0 = vcmask 523264  }
   0xc   : > { %226 = vmatpush.bf16.msra.mxu0 %v332_v0  ;;  %s302_s21 = sshll.u32 %s407_s16, 2  ;;  %v329_v3 = vld [vmem:[%s403_s1] sm:$0xff]  ;;  %s304_s29 = sshll.u32 %s407_s16, 3 }
   0xd   : > { %s166_s26 = scalar_lea.vmem %s402_s0, %s302_s21  ;;  %v341_v5 = vld [vmem:[%s404_s2] ss:$0 sm:$0xff]  ;;  %s172_s5 = scalar_lea.vmem %s405_s3, %s304_s29 }
   0xe   : > { %v328_v4 = vld [vmem:[%s166_s26] sm:$0xff] }
  0x10   : > { %227 = vmatpush.bf16.msra.mxu0 %v331_v1 }
  0x14   : > { %228 = vmatpush.bf16.msra.mxu0 %v330_v2 }
  0x18   : > { %229 = vmatpush.bf16.msra.mxu0 %v329_v3 }
  0x1b   : > { %325 = vmatmul.msk.bf16.vlgmr.msra.gmra.mxu0 %vm218_vm0, %v328_v4 }
  0x98   : > { %v231_v6 = vpop.f32.mrf.mxu0 }
  0x99   : > { %v232_v7 = vadd.f32 %v341_v5, %v231_v6 }
  0x9b   : > { %v236_v8 = vmax.f32 %v232_v7, 0.0 }
  0x9d   : > { %238 = vst [vmem:[%s172_s5] sm:$0xff] %v236_v8 }
  0xa0   : > { %v233_v9 = vpop.f32.mrf.mxu0 }
  0xa1   : > { %v234_v10 = vadd.f32 %v341_v5, %v233_v9 }
  0xa3   : > { %v237_v11 = vmax.f32 %v234_v10, 0.0 }
  0xa5   : > { %239 = vst [vmem:[%s172_s5 + $0x8] sm:$0xff] %v237_v11 }
  0xa6 PF: > { %s13_s12 = sadd.s32 1, %s348_s12  }
  0xa7   : > { %p10_p4 = scmp.ge.s32.totalorder %s13_s12, 4  }
  0xa9   :  { %12 = sbr.rel (!%p10_p4) target bundleno = 1 (0x1), region = 62 }

// kernel: peleenet_forward.37
= control target key start
LH: loop header
LB: loop body
LE: loop exit
PB: predicated region body
PF: predicated region fallthrough
CT: control target
= control target key end

     0   :  { %s890_s12 = smov 0   ;;  %s1034_s0 = inlined_call_operand.vmem [shape: bf16[32,576], index: 0, kind: input, shape index: {}]   ;;  %s1035_s1 = inlined_call_operand.vmem [shape: bf16[576,128], index: 1, kind: input, shape index: {}]   ;;  %s1036_s2 = inlined_call_operand.vmem [shape: f32[1,128], index: 2, kind: input, shape index: {}]   ;;  %s1037_s3 = inlined_call_operand.vmem [shape: f32[32,128], index: 3, kind: output, shape index: {}]  }
   0x1 LB: > { %s635_s13 = sadd.s32 4294967295, %s868_s12   ;;  %p639_p0 = scmp.ge.s32.totalorder %s868_s12, 1  ;;  %s868_s12 = sphi %s890_s12, %s13_s12  }
   0x2   : > { %p139_p1 = scmp.lt.s32.totalorder %s868_s12, 3 }
   0x4   : > { %p140_p2 = pnand %p639_p0, %p139_p1 }
   0x5   : > { %s640_s11 = sshll.u32 (!%p140_p2), %s635_s13, 1 }
   0x6   : > { %143 = sbr.rel (%p140_p2) target bundleno = 198 (0xc6), region = 32  ;;  %p165_p3 = scmp.lt.s32.totalorder (!%p140_p2), %s640_s11, 3 }
   0xb   : > { %v823_v0 = vld [vmem:[%s1035_s1 + $0x38] sm:$0xff]  ;;  %v822_v4 = vld [vmem:[%s1035_s1 + $0x30] sm:$0xff]  ;;  %v821_v8 = vld [vmem:[%s1035_s1 + $0x28] sm:$0xff]  ;;  %s1039_s11 = smov (!%p165_p3, %s640_s11), 3  ;;  %vm501_vm0 = vcmask 523264  }
   0xc   : > { %v839_v1 = vld [vmem:[%s1035_s1 + $0xb8] sm:$0xff]  ;;  %505 = vmatpush.bf16.msra.mxu0 %v823_v0  ;;  %v838_v5 = vld [vmem:[%s1035_s1 + $0xb0] sm:$0xff]  ;;  %v837_v9 = vld [vmem:[%s1035_s1 + $0xa8] sm:$0xff]  ;;  %s852_s6 = smul.u32 20, %s1039_s11  ;;  %s643_s18 = sshll.u32 %s1039_s11, 3 }
   0xd   : > { %v847_v2 = vld [vmem:[%s1035_s1 + $0xf8] sm:$0xff]  ;;  %533 = vmatpush.bf16.msra.mxu2 %v839_v1  ;;  %v846_v6 = vld [vmem:[%s1035_s1 + $0xf0] sm:$0xff]  ;;  %v845_v10 = vld [vmem:[%s1035_s1 + $0xe8] sm:$0xff]  ;;  %s175_s21 = scalar_lea.vmem %s1037_s3, %s643_s18 }
   0xe   : > { %v831_v3 = vld [vmem:[%s1035_s1 + $0x78] sm:$0xff]  ;;  %547 = vmatpush.bf16.msra.mxu3 %v847_v2  ;;  %v830_v7 = vld [vmem:[%s1035_s1 + $0x70] sm:$0xff]  ;;  %v829_v11 = vld [vmem:[%s1035_s1 + $0x68] sm:$0xff]  ;;  %s982_s20 = scalar_lea.vmem %s1034_s0, %s852_s6 }
   0xf   : > { %519 = vmatpush.bf16.msra.mxu1 %v831_v3  ;;  %v820_v12 = vld [vmem:[%s1035_s1 + $0x20] sm:$0xff]  ;;  %v819_v16 = vld [vmem:[%s1035_s1 + $0x18] sm:$0xff]  ;;  %v818_v20 = vld [vmem:[%s1035_s1 + $0x10] sm:$0xff] }
  0x10   : > { %506 = vmatpush.bf16.msra.mxu0 %v822_v4  ;;  %v836_v13 = vld [vmem:[%s1035_s1 + $0xa0] sm:$0xff]  ;;  %v835_v17 = vld [vmem:[%s1035_s1 + $0x98] sm:$0xff]  ;;  %v834_v21 = vld [vmem:[%s1035_s1 + $0x90] sm:$0xff] }
  0x11   : > { %534 = vmatpush.bf16.msra.mxu2 %v838_v5  ;;  %v844_v14 = vld [vmem:[%s1035_s1 + $0xe0] sm:$0xff]  ;;  %v843_v18 = vld [vmem:[%s1035_s1 + $0xd8] sm:$0xff]  ;;  %v842_v22 = vld [vmem:[%s1035_s1 + $0xd0] sm:$0xff] }
  0x12   : > { %548 = vmatpush.bf16.msra.mxu3 %v846_v6  ;;  %v828_v15 = vld [vmem:[%s1035_s1 + $0x60] sm:$0xff]  ;;  %v827_v19 = vld [vmem:[%s1035_s1 + $0x58] sm:$0xff]  ;;  %v826_v23 = vld [vmem:[%s1035_s1 + $0x50] sm:$0xff] }
  0x13   : > { %520 = vmatpush.bf16.msra.mxu1 %v830_v7  ;;  %v817_v24 = vld [vmem:[%s1035_s1 + $0x8] sm:$0xff]  ;;  %v816_v28 = vld [vmem:[%s1035_s1] sm:$0xff]  ;;  %v813_v33 = vld [vmem:[%s982_s20 + $0x10] sm:$0xf0] }
  0x14   : > { %507 = vmatpush.bf16.msra.mxu0 %v821_v8  ;;  %v833_v25 = vld [vmem:[%s1035_s1 + $0x88] sm:$0xff]  ;;  %v832_v29 = vld [vmem:[%s1035_s1 + $0x80] sm:$0xff]  ;;  %v814_v35 = vld [vmem:[%s982_s20 + $0x18] sm:$0xf0] }
  0x15   : > { %535 = vmatpush.bf16.msra.mxu2 %v837_v9  ;;  %v841_v26 = vld [vmem:[%s1035_s1 + $0xc8] sm:$0xff]  ;;  %v840_v30 = vld [vmem:[%s1035_s1 + $0xc0] sm:$0xff]  ;;  %v648_v39 = vld [vmem:[%s982_s20 + $0x14] sm:$0xf0] }
  0x16   : > { %549 = vmatpush.bf16.msra.mxu3 %v845_v10  ;;  %v825_v27 = vld [vmem:[%s1035_s1 + $0x48] sm:$0xff]  ;;  %v824_v31 = vld [vmem:[%s1035_s1 + $0x40] sm:$0xff]  ;;  %v851_v40 = vld [vmem:[%s1035_s1 + $0x118] sm:$0xff] }
  0x17   : > { %521 = vmatpush.bf16.msra.mxu1 %v829_v11  ;;  %v646_v32 = vld [vmem:[%s982_s20] sm:$0xf]  ;;  %v654_v34 = vld [vmem:[%s982_s20 + $0x8] sm:$0xf]  ;;  %v812_v36 = vld [vmem:[%s982_s20 + $0xc] sm:$0xf] }
  0x18   : > { %508 = vmatpush.bf16.msra.mxu0 %v820_v12  ;;  %v656_v37 = vld [vmem:[%s982_s20 + $0x1c] sm:$0xf0]  ;;  %v811_v38 = vld [vmem:[%s982_s20 + $0x4] sm:$0xf]  ;;  %v647_v41 = vor.u32 %v813_v33, %v646_v32  ;;  %v655_v42 = vor.u32 %v814_v35, %v654_v34  ;;  %v850_v45 = vld [vmem:[%s1035_s1 + $0x110] sm:$0xff] }
  0x19   : > { %536 = vmatpush.bf16.msra.mxu2 %v836_v13  ;;  %v659_v43 = vor.u32 %v812_v36, %v656_v37  ;;  %v651_v44 = vor.u32 %v811_v38, %v648_v39  ;;  %v849_v46 = vld [vmem:[%s1035_s1 + $0x108] sm:$0xff]  ;;  %v848_v47 = vld [vmem:[%s1035_s1 + $0x100] sm:$0xff]  ;;  %v662_v48 = vld [vmem:[%s982_s20 + $0x10] sm:$0xf] }
  0x1a   : > { %550 = vmatpush.bf16.msra.mxu3 %v844_v14  ;;  %v815_v49 = vld [vmem:[%s982_s20 + $0x20] sm:$0xf0]  ;;  %v861_v52 = vld [vmem:[%s1036_s2] ss:$0 sm:$0xff] }
  0x1b   : > { %522 = vmatpush.bf16.msra.mxu1 %v828_v15  ;;  %v663_v50 = vor.u32 %v815_v49, %v662_v48 }
  0x1c   : > { %509 = vmatpush.bf16.msra.mxu0 %v819_v16 }
  0x1d   : > { %537 = vmatpush.bf16.msra.mxu2 %v835_v17 }
  0x1e   : > { %551 = vmatpush.bf16.msra.mxu3 %v843_v18 }
  0x1f   : > { %523 = vmatpush.bf16.msra.mxu1 %v827_v19 }
  0x20   : > { %510 = vmatpush.bf16.msra.mxu0 %v818_v20 }
  0x21   : > { %538 = vmatpush.bf16.msra.mxu2 %v834_v21 }
  0x22   : > { %552 = vmatpush.bf16.msra.mxu3 %v842_v22 }
  0x23   : > { %524 = vmatpush.bf16.msra.mxu1 %v826_v23 }
  0x24   : > { %511 = vmatpush.bf16.msra.mxu0 %v817_v24 }
  0x25   : > { %539 = vmatpush.bf16.msra.mxu2 %v833_v25 }
  0x26   : > { %553 = vmatpush.bf16.msra.mxu3 %v841_v26 }
  0x27   : > { %525 = vmatpush.bf16.msra.mxu1 %v825_v27 }
  0x28   : > { %512 = vmatpush.bf16.msra.mxu0 %v816_v28 }
  0x29   : > { %540 = vmatpush.bf16.msra.mxu2 %v832_v29 }
  0x2a   : > { %554 = vmatpush.bf16.msra.mxu3 %v840_v30 }
  0x2b   : > { %526 = vmatpush.bf16.msra.mxu1 %v824_v31  ;;  %513 = vmatmul.bf16.vlgmr.msra.gmra.mxu0 %v647_v41 }
  0x2c   : > { %565 = vmatpush.bf16.msrb.mxu0 %v851_v40  ;;  %541 = vmatmul.bf16.vlgmr.msra.gmra.mxu2 %v655_v42 }
  0x2d   : > { %555 = vmatmul.bf16.vlgmr.msra.gmra.mxu3 %v659_v43 }
  0x2e   : > { %527 = vmatmul.bf16.vlgmr.msra.gmra.mxu1 %v651_v44 }
  0x30   : > { %566 = vmatpush.bf16.msrb.mxu0 %v850_v45 }
  0x34   : > { %567 = vmatpush.bf16.msrb.mxu0 %v849_v46 }
  0x38   : > { %568 = vmatpush.bf16.msrb.mxu0 %v848_v47 }
  0x3b   : > { %808 = vmatmul.msk.bf16.vlgmr.msrb.gmra.mxu0 %vm501_vm0, %v663_v50 }
  0xa8   : > { %v514_v51 = vpop.f32.mrf.mxu0 }
  0xa9   : > { %v515_v54 = vadd.f32 %v861_v52, %v514_v51 }
  0xab   : > { %v528_v53 = vpop.f32.mrf.mxu1 }
  0xac   : > { %v529_v57 = vadd.f32 %v528_v53, %v515_v54 }
  0xaf   : > { %v542_v55 = vpop.f32.mrf.mxu2 }
  0xb0   : > { %v516_v56 = vpop.f32.mrf.mxu0  ;;  %v543_v58 = vadd.f32 %v542_v55, %v529_v57  ;;  %v556_v59 = vpop.f32.mrf.mxu3 }
  0xb1   : > { %v517_v60 = vadd.f32 %v861_v52, %v516_v56 }
  0xb2   : > { %v557_v62 = vadd.f32 %v556_v59, %v543_v58 }
  0xb3   : > { %v530_v61 = vpop.f32.mrf.mxu1 }
  0xb4   : > { %v531_v1 = vadd.f32 %v530_v61, %v517_v60 }
  0xb7   : > { %v544_v63 = vpop.f32.mrf.mxu2 }
  0xb8   : > { %v570_v0 = vpop.f32.mrf.mxu0  ;;  %v545_v3 = vadd.f32 %v544_v63, %v531_v1  ;;  %v558_v5 = vpop.f32.mrf.mxu3 }
  0xb9   : > { %v571_v2 = vadd.f32 %v570_v0, %v557_v62 }
  0xba   : > { %v559_v6 = vadd.f32 %v558_v5, %v545_v3 }
  0xbb   : > { %v575_v4 = vmax.f32 %v571_v2, 0.0 }
  0xbd   : > { %577 = vst [vmem:[%s175_s21] sm:$0xff] %v575_v4 }
  0xc0   : > { %v572_v7 = vpop.f32.mrf.mxu0 }
  0xc1   : > { %v573_v8 = vadd.f32 %v572_v7, %v559_v6 }
  0xc3   : > { %v576_v9 = vmax.f32 %v573_v8, 0.0 }
  0xc5   : > { %578 = vst [vmem:[%s175_s21 + $0x8] sm:$0xff] %v576_v9 }
  0xc6 PF: > { %s13_s12 = sadd.s32 1, %s868_s12  }
  0xc7   : > { %p10_p4 = scmp.ge.s32.totalorder %s13_s12, 4  }
  0xc9   :  { %12 = sbr.rel (!%p10_p4) target bundleno = 1 (0x1), region = 62 }

// kernel: peleenet_forward.38
= control target key start
LH: loop header
LB: loop body
LE: loop exit
PB: predicated region body
PF: predicated region fallthrough
CT: control target
= control target key end

     0   :  { %s383_s12 = smov 0   ;;  %s418_s0 = inlined_call_operand.vmem [shape: bf16[32,80], index: 0, kind: input, shape index: {}]   ;;  %s419_s1 = inlined_call_operand.vmem [shape: bf16[80,128], index: 1, kind: input, shape index: {}]   ;;  %s420_s2 = inlined_call_operand.vmem [shape: f32[1,128], index: 2, kind: input, shape index: {}]   ;;  %s421_s3 = inlined_call_operand.vmem [shape: f32[32,128], index: 3, kind: output, shape index: {}]  }
   0x1 LB: > { %s304_s13 = sadd.s32 4294967295, %s361_s12   ;;  %p308_p0 = scmp.ge.s32.totalorder %s361_s12, 1  ;;  %s361_s12 = sphi %s383_s12, %s13_s12  }
   0x2   : > { %p138_p1 = scmp.lt.s32.totalorder %s361_s12, 3 }
   0x4   : > { %p139_p2 = pnand %p308_p0, %p138_p1 }
   0x5   : > { %s309_s16 = sshll.u32 (!%p139_p2), %s304_s13, 1 }
   0x6   : > { %142 = sbr.rel (%p139_p2) target bundleno = 170 (0xaa), region = 32  ;;  %p163_p3 = scmp.lt.s32.totalorder (!%p139_p2), %s309_s16, 3 }
   0xb   : > { %v345_v0 = vld [vmem:[%s419_s1 + $0x20] sm:$0xff]  ;;  %v344_v1 = vld [vmem:[%s419_s1 + $0x18] sm:$0xff]  ;;  %v343_v2 = vld [vmem:[%s419_s1 + $0x10] sm:$0xff]  ;;  %s423_s16 = smov (!%p163_p3, %s309_s16), 3  ;;  %vm226_vm0 = vcmask 654336  }
   0xc   : > { %233 = vmatpush.bf16.msra.mxu0 %v345_v0  ;;  %v342_v3 = vld [vmem:[%s419_s1 + $0x8] sm:$0xff]  ;;  %s310_s23 = sshll.u32 %s423_s16, 2  ;;  %v341_v4 = vld [vmem:[%s419_s1] sm:$0xff]  ;;  %s312_s4 = sshll.u32 %s423_s16, 3 }
   0xd   : > { %s166_s28 = scalar_lea.vmem %s418_s0, %s310_s23  ;;  %v354_v6 = vld [vmem:[%s420_s2] ss:$0 sm:$0xff]  ;;  %s172_s7 = scalar_lea.vmem %s421_s3, %s312_s4 }
   0xe   : > { %v340_v5 = vld [vmem:[%s166_s28] sm:$0xff] }
  0x10   : > { %234 = vmatpush.bf16.msra.mxu0 %v344_v1 }
  0x14   : > { %235 = vmatpush.bf16.msra.mxu0 %v343_v2 }
  0x18   : > { %236 = vmatpush.bf16.msra.mxu0 %v342_v3 }
  0x1c   : > { %237 = vmatpush.bf16.msra.mxu0 %v341_v4 }
  0x1f   : > { %337 = vmatmul.msk.bf16.vlgmr.msra.gmra.mxu0 %vm226_vm0, %v340_v5 }
  0x9c   : > { %v239_v7 = vpop.f32.mrf.mxu0 }
  0x9d   : > { %v240_v8 = vadd.f32 %v354_v6, %v239_v7 }
  0x9f   : > { %v244_v9 = vmax.f32 %v240_v8, 0.0 }
  0xa1   : > { %246 = vst [vmem:[%s172_s7] sm:$0xff] %v244_v9 }
  0xa4   : > { %v241_v10 = vpop.f32.mrf.mxu0 }
  0xa5   : > { %v242_v11 = vadd.f32 %v354_v6, %v241_v10 }
  0xa7   : > { %v245_v12 = vmax.f32 %v242_v11, 0.0 }
  0xa9   : > { %247 = vst [vmem:[%s172_s7 + $0x8] sm:$0xff] %v245_v12 }
  0xaa PF: > { %s13_s12 = sadd.s32 1, %s361_s12  }
  0xab   : > { %p10_p4 = scmp.ge.s32.totalorder %s13_s12, 4  }
  0xad   :  { %12 = sbr.rel (!%p10_p4) target bundleno = 1 (0x1), region = 62 }

</bundles_post_ra>
